<compile_context>
chip_gen: v7x
topology: tpu7x:2x2x1
jax: 0.10.0
libtpu: 0.0.40
codegen_flags: <defaults>
</compile_context>

<pallas_src>
import jax
import jax.numpy as jnp
from jax.experimental import pallas as pl
from jax.experimental.pallas import tpu as pltpu

_EPS = 1e-5  # PyTorch BatchNorm2d default eps


def _conv3x3_bn_relu(a, w_ref, g_ref, bt_ref, out_dtype):
    """3x3 conv (stride=1, pad=1, no bias) + training-mode BN + ReLU.

    a:      (N, H, W, Cin)  bf16 activations.
    w_ref:  (9, Cin, Cout)  bf16 weights, tap index = 3*dy + dx.
    g_ref:  (1, Cout) f32 BN gamma;  bt_ref: (1, Cout) f32 BN beta.
    Returns (N, H, W, Cout) in `out_dtype`.
    """
    N, H, W, Cin = a.shape
    Cout = w_ref.shape[-1]
    M = N * H * W

    # Unshifted activations feed every tap's MXU dot; with W % 8 == 0 this
    # reshape is layout-compatible (no relayout copy).
    a_flat = a.reshape(M, Cin)

    # Tiny (1,1,W,1) 0/1 edge masks (f32 multiply masks, v5e-safe).
    col = jax.lax.broadcasted_iota(jnp.int32, (1, 1, W, 1), 2)
    mask_l = (col >= 1).astype(jnp.float32)        # kills wrapped column 0
    mask_r = (col <= W - 2).astype(jnp.float32)    # kills wrapped column W-1

    # Per-dy partials, each already combined over the three dx taps.
    z = []
    for dy in range(3):
        t = None
        for dx in range(3):
            y = jnp.dot(a_flat, w_ref[3 * dy + dx],
                        preferred_element_type=jnp.float32)       # (M, Cout) f32
            y = y.reshape(N, H, W, Cout)
            if dx == 0:        # output col w takes input col w-1 (zero at w=0)
                y = pltpu.roll(y, shift=1, axis=2) * mask_l
            elif dx == 2:      # output col w takes input col w+1 (zero at w=W-1)
                y = pltpu.roll(y, shift=W - 1, axis=2) * mask_r
            t = y if t is None else t + y
        z.append(t)

    # dy combine along the untiled H axis (output row h takes rows h-1, h, h+1).
    zrow = jnp.zeros((N, 1, W, Cout), jnp.float32)
    conv = (z[1]
            + jnp.concatenate([zrow, z[0][:, :H - 1]], axis=1)
            + jnp.concatenate([z[2][:, 1:], zrow], axis=1))

    # BatchNorm2d, training mode (biased batch stats), two-pass variance.
    cf = conv.reshape(M, Cout)
    mean = jnp.sum(cf, axis=0, keepdims=True) * (1.0 / M)         # (1, Cout)
    d = cf - mean
    var = jnp.sum(d * d, axis=0, keepdims=True) * (1.0 / M)
    scale = g_ref[...] * jax.lax.rsqrt(var + _EPS)
    shift = bt_ref[...] - mean * scale
    y = jnp.maximum(cf * scale + shift, 0.0)                      # ReLU
    return y.astype(out_dtype).reshape(N, H, W, Cout)


def _depth_kernel(x_ref, w1_ref, g1_ref, b1_ref, w2_ref, g2_ref, b2_ref,
                  w3_ref, g3_ref, b3_ref, o_ref):
    a = x_ref[...]                                                    # (N,H,W,C0) bf16
    a = _conv3x3_bn_relu(a, w1_ref, g1_ref, b1_ref, jnp.bfloat16)     # -> (N,H,W,128)
    a = _conv3x3_bn_relu(a, w2_ref, g2_ref, b2_ref, jnp.bfloat16)     # -> (N,H,W,64)
    o_ref[...] = _conv3x3_bn_relu(a, w3_ref, g3_ref, b3_ref, jnp.float32)  # (N,H,W,1)


def init_depth_estimator_params(key, in_channels, out_channels=1):
    """Deterministic synthetic parameters matching DepthEstmator's shapes.

    Layers: conv3x3(in->128)+BN(128), conv3x3(128->64)+BN(64),
            conv3x3(64->out)+BN(out).  Conv weights are HWIO (3,3,Cin,Cout);
    BN gamma=1, beta=0.  The conv bias is generated for shape parity but is
    unused by the kernel (it is exactly cancelled by training-mode BN).
    """
    chans = [in_channels, 128, 64, out_channels]
    params = []
    for i in range(3):
        cin, cout = chans[i], chans[i + 1]
        key, kw, kb = jax.random.split(key, 3)
        w = jax.random.normal(kw, (3, 3, cin, cout), jnp.float32) * 0.05
        b = jax.random.normal(kb, (cout,), jnp.float32) * 0.01
        gamma = jnp.ones((cout,), jnp.float32)
        beta = jnp.zeros((cout,), jnp.float32)
        params.append((w, b, gamma, beta))
    return params


@jax.jit
def depth_estimator_forward(x_nchw, params):
    """Forward pass. Input is NCHW (PyTorch convention); output is (N,1,H,W)."""
    (w1, _b1, g1, bt1), (w2, _b2, g2, bt2), (w3, _b3, g3, bt3) = params
    N, _C0, H, W = x_nchw.shape
    c1, c2, c3 = w1.shape[-1], w2.shape[-1], w3.shape[-1]

    # NCHW -> NHWC fused with the f32 -> bf16 cast (halves input DMA / VMEM).
    x = jnp.transpose(x_nchw, (0, 2, 3, 1)).astype(jnp.bfloat16)

    def wprep(w):   # (3,3,Cin,Cout) HWIO -> (9,Cin,Cout) bf16, tap index = 3*dy+dx
        return w.reshape(9, w.shape[2], w.shape[3]).astype(jnp.bfloat16)

    def bnprep(v, c):
        return v.reshape(1, c).astype(jnp.float32)

    vmem = pl.BlockSpec(memory_space=pltpu.MemorySpace.VMEM)
    out = pl.pallas_call(
        _depth_kernel,
        out_shape=jax.ShapeDtypeStruct((N, H, W, 1), jnp.float32),
        in_specs=[vmem] * 10,
        out_specs=vmem,
    )(x,
      wprep(w1), bnprep(g1, c1), bnprep(bt1, c1),
      wprep(w2), bnprep(g2, c2), bnprep(bt2, c2),
      wprep(w3), bnprep(g3, c3), bnprep(bt3, c3))

    # (N, H, W, 1) and (N, 1, H, W) share the same element order for 1 channel.
    return out.reshape(N, 1, H, W)


def _reference_forward(x_nchw, params):
    """Pure-JAX f32 reference: (conv3x3 + bias -> training-mode BN -> ReLU) x 3."""
    a = jnp.transpose(x_nchw, (0, 2, 3, 1)).astype(jnp.float32)   # NHWC
    for (w, b, gamma, beta) in params:
        a = jax.lax.conv_general_dilated(
            a, w, window_strides=(1, 1), padding=((1, 1), (1, 1)),
            dimension_numbers=('NHWC', 'HWIO', 'NHWC')) + b
        mean = jnp.mean(a, axis=(0, 1, 2), keepdims=True)
        var = jnp.mean((a - mean) ** 2, axis=(0, 1, 2), keepdims=True)
        a = (a - mean) * jax.lax.rsqrt(var + _EPS) * gamma + beta
        a = jnp.maximum(a, 0.0)
    return jnp.transpose(a, (0, 3, 1, 2))                          # NCHW


if __name__ == "__main__":
    key = jax.random.PRNGKey(0)
    k_x, k_p = jax.random.split(key)

    # Small test shapes: batch=2, in_channels=32 (module default 384 shrunk for
    # the synthetic test), spatial 8x8; intermediate channels 128/64/1 are
    # exactly those of the module.
    N, C_IN, H, W = 2, 32, 8, 8
    x = jax.random.normal(k_x, (N, C_IN, H, W), jnp.float32)
    params = init_depth_estimator_params(k_p, C_IN)

    out = depth_estimator_forward(x, params)
    out = jax.block_until_ready(out)

    assert out.shape == (N, 1, H, W), out.shape
    assert bool(jnp.all(out >= 0.0)) and bool(jnp.all(jnp.isfinite(out)))

    # Loose check vs. the f32 reference (kernel feeds bf16 into the MXU; BN,
    # masks and shift-combine are f32, so only ~1e-2-scale drift is expected).
    ref = _reference_forward(x, params)
    max_err = float(jnp.max(jnp.abs(out - ref)))
    assert max_err < 0.25, f"max abs error vs f32 reference: {max_err}"

    print("KERNEL_OK")
</pallas_src>

<mosaic_0001>
module attributes {stable_mosaic.version = 11 : i64} {
  func.func @_depth_kernel(%arg0: memref<2x8x8x32xbf16, #tpu.memory_space<vmem>>, %arg1: memref<9x32x128xbf16, #tpu.memory_space<vmem>>, %arg2: memref<1x128xf32, #tpu.memory_space<vmem>>, %arg3: memref<1x128xf32, #tpu.memory_space<vmem>>, %arg4: memref<9x128x64xbf16, #tpu.memory_space<vmem>>, %arg5: memref<1x64xf32, #tpu.memory_space<vmem>>, %arg6: memref<1x64xf32, #tpu.memory_space<vmem>>, %arg7: memref<9x64x1xbf16, #tpu.memory_space<vmem>>, %arg8: memref<1x1xf32, #tpu.memory_space<vmem>>, %arg9: memref<1x1xf32, #tpu.memory_space<vmem>>, %arg10: memref<2x8x8x1xf32, #tpu.memory_space<vmem>>) attributes {dimension_semantics = [], scalar_prefetch = 0 : i64, scratch_operands = 0 : i64, tpu.core_type = #tpu.core_type<tc>} {
    %c0 = arith.constant 0 : index
    %c0_0 = arith.constant 0 : index
    %c0_1 = arith.constant 0 : index
    %c0_2 = arith.constant 0 : index
    %0 = vector.load %arg0[%c0, %c0_0, %c0_1, %c0_2] : memref<2x8x8x32xbf16, #tpu.memory_space<vmem>>, vector<2x8x8x32xbf16>
    %1 = vector.shape_cast %0 : vector<2x8x8x32xbf16> to vector<128x32xbf16>
    %2 = tpu.iota {dimensions = array<i32: 2>} : vector<1x1x8x1xi32>
    %c1_i32 = arith.constant 1 : i32
    %3 = vector.broadcast %c1_i32 : i32 to vector<1x1x8x1xi32>
    %4 = arith.cmpi sge, %2, %3 : vector<1x1x8x1xi32>
    %5 = arith.extui %4 : vector<1x1x8x1xi1> to vector<1x1x8x1xi32>
    %6 = arith.sitofp %5 : vector<1x1x8x1xi32> to vector<1x1x8x1xf32>
    %c6_i32 = arith.constant 6 : i32
    %7 = vector.broadcast %c6_i32 : i32 to vector<1x1x8x1xi32>
    %8 = arith.cmpi sle, %2, %7 : vector<1x1x8x1xi32>
    %9 = arith.extui %8 : vector<1x1x8x1xi1> to vector<1x1x8x1xi32>
    %10 = arith.sitofp %9 : vector<1x1x8x1xi32> to vector<1x1x8x1xf32>
    %c0_3 = arith.constant 0 : index
    %c0_4 = arith.constant 0 : index
    %c0_5 = arith.constant 0 : index
    %11 = vector.load %arg1[%c0_3, %c0_4, %c0_5] : memref<9x32x128xbf16, #tpu.memory_space<vmem>>, vector<1x32x128xbf16>
    %12 = vector.shape_cast %11 : vector<1x32x128xbf16> to vector<32x128xbf16>
    %cst = arith.constant dense<0.000000e+00> : vector<128x128xf32>
    %13 = tpu.matmul %1, %12, %cst {dimension_numbers = #tpu.dot_dimension_numbers<[1], [0], [0], [1], [0, 0, 1, 1], [], []>} : vector<128x32xbf16>, vector<32x128xbf16>, vector<128x128xf32> -> vector<128x128xf32>
    %14 = vector.shape_cast %13 : vector<128x128xf32> to vector<2x8x8x128xf32>
    %c1_i32_6 = arith.constant 1 : i32
    %15 = tpu.dynamic_rotate %14 by %c1_i32_6 dim 2 : vector<2x8x8x128xf32>, i32 -> vector<2x8x8x128xf32>
    %16 = vector.broadcast %6 : vector<1x1x8x1xf32> to vector<2x8x8x128xf32>
    %17 = arith.mulf %15, %16 : vector<2x8x8x128xf32>
    %c1 = arith.constant 1 : index
    %c0_7 = arith.constant 0 : index
    %c0_8 = arith.constant 0 : index
    %18 = vector.load %arg1[%c1, %c0_7, %c0_8] : memref<9x32x128xbf16, #tpu.memory_space<vmem>>, vector<1x32x128xbf16>
    %19 = vector.shape_cast %18 : vector<1x32x128xbf16> to vector<32x128xbf16>
    %cst_9 = arith.constant dense<0.000000e+00> : vector<128x128xf32>
    %20 = tpu.matmul %1, %19, %cst_9 {dimension_numbers = #tpu.dot_dimension_numbers<[1], [0], [0], [1], [0, 0, 1, 1], [], []>} : vector<128x32xbf16>, vector<32x128xbf16>, vector<128x128xf32> -> vector<128x128xf32>
    %21 = vector.shape_cast %20 : vector<128x128xf32> to vector<2x8x8x128xf32>
    %22 = arith.addf %17, %21 : vector<2x8x8x128xf32>
    %c2 = arith.constant 2 : index
    %c0_10 = arith.constant 0 : index
    %c0_11 = arith.constant 0 : index
    %23 = vector.load %arg1[%c2, %c0_10, %c0_11] : memref<9x32x128xbf16, #tpu.memory_space<vmem>>, vector<1x32x128xbf16>
    %24 = vector.shape_cast %23 : vector<1x32x128xbf16> to vector<32x128xbf16>
    %cst_12 = arith.constant dense<0.000000e+00> : vector<128x128xf32>
    %25 = tpu.matmul %1, %24, %cst_12 {dimension_numbers = #tpu.dot_dimension_numbers<[1], [0], [0], [1], [0, 0, 1, 1], [], []>} : vector<128x32xbf16>, vector<32x128xbf16>, vector<128x128xf32> -> vector<128x128xf32>
    %26 = vector.shape_cast %25 : vector<128x128xf32> to vector<2x8x8x128xf32>
    %c7_i32 = arith.constant 7 : i32
    %27 = tpu.dynamic_rotate %26 by %c7_i32 dim 2 : vector<2x8x8x128xf32>, i32 -> vector<2x8x8x128xf32>
    %28 = vector.broadcast %10 : vector<1x1x8x1xf32> to vector<2x8x8x128xf32>
    %29 = arith.mulf %27, %28 : vector<2x8x8x128xf32>
    %30 = arith.addf %22, %29 : vector<2x8x8x128xf32>
    %c3 = arith.constant 3 : index
    %c0_13 = arith.constant 0 : index
    %c0_14 = arith.constant 0 : index
    %31 = vector.load %arg1[%c3, %c0_13, %c0_14] : memref<9x32x128xbf16, #tpu.memory_space<vmem>>, vector<1x32x128xbf16>
    %32 = vector.shape_cast %31 : vector<1x32x128xbf16> to vector<32x128xbf16>
    %cst_15 = arith.constant dense<0.000000e+00> : vector<128x128xf32>
    %33 = tpu.matmul %1, %32, %cst_15 {dimension_numbers = #tpu.dot_dimension_numbers<[1], [0], [0], [1], [0, 0, 1, 1], [], []>} : vector<128x32xbf16>, vector<32x128xbf16>, vector<128x128xf32> -> vector<128x128xf32>
    %34 = vector.shape_cast %33 : vector<128x128xf32> to vector<2x8x8x128xf32>
    %c1_i32_16 = arith.constant 1 : i32
    %35 = tpu.dynamic_rotate %34 by %c1_i32_16 dim 2 : vector<2x8x8x128xf32>, i32 -> vector<2x8x8x128xf32>
    %36 = vector.broadcast %6 : vector<1x1x8x1xf32> to vector<2x8x8x128xf32>
    %37 = arith.mulf %35, %36 : vector<2x8x8x128xf32>
    %c4 = arith.constant 4 : index
    %c0_17 = arith.constant 0 : index
    %c0_18 = arith.constant 0 : index
    %38 = vector.load %arg1[%c4, %c0_17, %c0_18] : memref<9x32x128xbf16, #tpu.memory_space<vmem>>, vector<1x32x128xbf16>
    %39 = vector.shape_cast %38 : vector<1x32x128xbf16> to vector<32x128xbf16>
    %cst_19 = arith.constant dense<0.000000e+00> : vector<128x128xf32>
    %40 = tpu.matmul %1, %39, %cst_19 {dimension_numbers = #tpu.dot_dimension_numbers<[1], [0], [0], [1], [0, 0, 1, 1], [], []>} : vector<128x32xbf16>, vector<32x128xbf16>, vector<128x128xf32> -> vector<128x128xf32>
    %41 = vector.shape_cast %40 : vector<128x128xf32> to vector<2x8x8x128xf32>
    %42 = arith.addf %37, %41 : vector<2x8x8x128xf32>
    %c5 = arith.constant 5 : index
    %c0_20 = arith.constant 0 : index
    %c0_21 = arith.constant 0 : index
    %43 = vector.load %arg1[%c5, %c0_20, %c0_21] : memref<9x32x128xbf16, #tpu.memory_space<vmem>>, vector<1x32x128xbf16>
    %44 = vector.shape_cast %43 : vector<1x32x128xbf16> to vector<32x128xbf16>
    %cst_22 = arith.constant dense<0.000000e+00> : vector<128x128xf32>
    %45 = tpu.matmul %1, %44, %cst_22 {dimension_numbers = #tpu.dot_dimension_numbers<[1], [0], [0], [1], [0, 0, 1, 1], [], []>} : vector<128x32xbf16>, vector<32x128xbf16>, vector<128x128xf32> -> vector<128x128xf32>
    %46 = vector.shape_cast %45 : vector<128x128xf32> to vector<2x8x8x128xf32>
    %c7_i32_23 = arith.constant 7 : i32
    %47 = tpu.dynamic_rotate %46 by %c7_i32_23 dim 2 : vector<2x8x8x128xf32>, i32 -> vector<2x8x8x128xf32>
    %48 = vector.broadcast %10 : vector<1x1x8x1xf32> to vector<2x8x8x128xf32>
    %49 = arith.mulf %47, %48 : vector<2x8x8x128xf32>
    %50 = arith.addf %42, %49 : vector<2x8x8x128xf32>
    %c6 = arith.constant 6 : index
    %c0_24 = arith.constant 0 : index
    %c0_25 = arith.constant 0 : index
    %51 = vector.load %arg1[%c6, %c0_24, %c0_25] : memref<9x32x128xbf16, #tpu.memory_space<vmem>>, vector<1x32x128xbf16>
    %52 = vector.shape_cast %51 : vector<1x32x128xbf16> to vector<32x128xbf16>
    %cst_26 = arith.constant dense<0.000000e+00> : vector<128x128xf32>
    %53 = tpu.matmul %1, %52, %cst_26 {dimension_numbers = #tpu.dot_dimension_numbers<[1], [0], [0], [1], [0, 0, 1, 1], [], []>} : vector<128x32xbf16>, vector<32x128xbf16>, vector<128x128xf32> -> vector<128x128xf32>
    %54 = vector.shape_cast %53 : vector<128x128xf32> to vector<2x8x8x128xf32>
    %c1_i32_27 = arith.constant 1 : i32
    %55 = tpu.dynamic_rotate %54 by %c1_i32_27 dim 2 : vector<2x8x8x128xf32>, i32 -> vector<2x8x8x128xf32>
    %56 = vector.broadcast %6 : vector<1x1x8x1xf32> to vector<2x8x8x128xf32>
    %57 = arith.mulf %55, %56 : vector<2x8x8x128xf32>
    %c7 = arith.constant 7 : index
    %c0_28 = arith.constant 0 : index
    %c0_29 = arith.constant 0 : index
    %58 = vector.load %arg1[%c7, %c0_28, %c0_29] : memref<9x32x128xbf16, #tpu.memory_space<vmem>>, vector<1x32x128xbf16>
    %59 = vector.shape_cast %58 : vector<1x32x128xbf16> to vector<32x128xbf16>
    %cst_30 = arith.constant dense<0.000000e+00> : vector<128x128xf32>
    %60 = tpu.matmul %1, %59, %cst_30 {dimension_numbers = #tpu.dot_dimension_numbers<[1], [0], [0], [1], [0, 0, 1, 1], [], []>} : vector<128x32xbf16>, vector<32x128xbf16>, vector<128x128xf32> -> vector<128x128xf32>
    %61 = vector.shape_cast %60 : vector<128x128xf32> to vector<2x8x8x128xf32>
    %62 = arith.addf %57, %61 : vector<2x8x8x128xf32>
    %c8 = arith.constant 8 : index
    %c0_31 = arith.constant 0 : index
    %c0_32 = arith.constant 0 : index
    %63 = vector.load %arg1[%c8, %c0_31, %c0_32] : memref<9x32x128xbf16, #tpu.memory_space<vmem>>, vector<1x32x128xbf16>
    %64 = vector.shape_cast %63 : vector<1x32x128xbf16> to vector<32x128xbf16>
    %cst_33 = arith.constant dense<0.000000e+00> : vector<128x128xf32>
    %65 = tpu.matmul %1, %64, %cst_33 {dimension_numbers = #tpu.dot_dimension_numbers<[1], [0], [0], [1], [0, 0, 1, 1], [], []>} : vector<128x32xbf16>, vector<32x128xbf16>, vector<128x128xf32> -> vector<128x128xf32>
    %66 = vector.shape_cast %65 : vector<128x128xf32> to vector<2x8x8x128xf32>
    %c7_i32_34 = arith.constant 7 : i32
    %67 = tpu.dynamic_rotate %66 by %c7_i32_34 dim 2 : vector<2x8x8x128xf32>, i32 -> vector<2x8x8x128xf32>
    %68 = vector.broadcast %10 : vector<1x1x8x1xf32> to vector<2x8x8x128xf32>
    %69 = arith.mulf %67, %68 : vector<2x8x8x128xf32>
    %70 = arith.addf %62, %69 : vector<2x8x8x128xf32>
    %cst_35 = arith.constant 0.000000e+00 : f32
    %71 = vector.broadcast %cst_35 : f32 to vector<2x1x8x128xf32>
    %72 = vector.extract_strided_slice %30 {offsets = [0, 0, 0, 0], sizes = [2, 7, 8, 128], strides = [1, 1, 1, 1]} : vector<2x8x8x128xf32> to vector<2x7x8x128xf32>
    %73 = tpu.concatenate %71, %72 in 1 : vector<2x1x8x128xf32>, vector<2x7x8x128xf32> -> vector<2x8x8x128xf32>
    %74 = arith.addf %50, %73 : vector<2x8x8x128xf32>
    %75 = vector.extract_strided_slice %70 {offsets = [0, 1, 0, 0], sizes = [2, 7, 8, 128], strides = [1, 1, 1, 1]} : vector<2x8x8x128xf32> to vector<2x7x8x128xf32>
    %76 = tpu.concatenate %75, %71 in 1 : vector<2x7x8x128xf32>, vector<2x1x8x128xf32> -> vector<2x8x8x128xf32>
    %77 = arith.addf %74, %76 : vector<2x8x8x128xf32>
    %78 = vector.shape_cast %77 : vector<2x8x8x128xf32> to vector<128x128xf32>
    %cst_36 = arith.constant dense<0.000000e+00> : vector<128xf32>
    %79 = vector.multi_reduction <add>, %78, %cst_36 [0] : vector<128x128xf32> to vector<128xf32>
    %80 = vector.shape_cast %79 : vector<128xf32> to vector<1x128xf32>
    %cst_37 = arith.constant 7.812500e-03 : f32
    %81 = vector.broadcast %cst_37 : f32 to vector<1x128xf32>
    %82 = arith.mulf %80, %81 : vector<1x128xf32>
    %83 = vector.broadcast %82 : vector<1x128xf32> to vector<128x128xf32>
    %84 = arith.subf %78, %83 : vector<128x128xf32>
    %85 = arith.mulf %84, %84 : vector<128x128xf32>
    %cst_38 = arith.constant dense<0.000000e+00> : vector<128xf32>
    %86 = vector.multi_reduction <add>, %85, %cst_38 [0] : vector<128x128xf32> to vector<128xf32>
    %87 = vector.shape_cast %86 : vector<128xf32> to vector<1x128xf32>
    %cst_39 = arith.constant 7.812500e-03 : f32
    %88 = vector.broadcast %cst_39 : f32 to vector<1x128xf32>
    %89 = arith.mulf %87, %88 : vector<1x128xf32>
    %c0_40 = arith.constant 0 : index
    %c0_41 = arith.constant 0 : index
    %90 = vector.load %arg2[%c0_40, %c0_41] : memref<1x128xf32, #tpu.memory_space<vmem>>, vector<1x128xf32>
    %cst_42 = arith.constant 9.99999974E-6 : f32
    %91 = vector.broadcast %cst_42 : f32 to vector<1x128xf32>
    %92 = arith.addf %89, %91 : vector<1x128xf32>
    %93 = math.rsqrt %92 : vector<1x128xf32>
    %94 = arith.mulf %90, %93 : vector<1x128xf32>
    %c0_43 = arith.constant 0 : index
    %c0_44 = arith.constant 0 : index
    %95 = vector.load %arg3[%c0_43, %c0_44] : memref<1x128xf32, #tpu.memory_space<vmem>>, vector<1x128xf32>
    %96 = arith.mulf %82, %94 : vector<1x128xf32>
    %97 = arith.subf %95, %96 : vector<1x128xf32>
    %98 = vector.broadcast %94 : vector<1x128xf32> to vector<128x128xf32>
    %99 = arith.mulf %78, %98 : vector<128x128xf32>
    %100 = vector.broadcast %97 : vector<1x128xf32> to vector<128x128xf32>
    %101 = arith.addf %99, %100 : vector<128x128xf32>
    %cst_45 = arith.constant 0.000000e+00 : f32
    %102 = vector.broadcast %cst_45 : f32 to vector<128x128xf32>
    %103 = arith.maximumf %101, %102 : vector<128x128xf32>
    %104 = arith.truncf %103 : vector<128x128xf32> to vector<128x128xbf16>
    %105 = vector.shape_cast %104 : vector<128x128xbf16> to vector<2x8x8x128xbf16>
    %106 = vector.shape_cast %105 : vector<2x8x8x128xbf16> to vector<128x128xbf16>
    %107 = tpu.iota {dimensions = array<i32: 2>} : vector<1x1x8x1xi32>
    %c1_i32_46 = arith.constant 1 : i32
    %108 = vector.broadcast %c1_i32_46 : i32 to vector<1x1x8x1xi32>
    %109 = arith.cmpi sge, %107, %108 : vector<1x1x8x1xi32>
    %110 = arith.extui %109 : vector<1x1x8x1xi1> to vector<1x1x8x1xi32>
    %111 = arith.sitofp %110 : vector<1x1x8x1xi32> to vector<1x1x8x1xf32>
    %c6_i32_47 = arith.constant 6 : i32
    %112 = vector.broadcast %c6_i32_47 : i32 to vector<1x1x8x1xi32>
    %113 = arith.cmpi sle, %107, %112 : vector<1x1x8x1xi32>
    %114 = arith.extui %113 : vector<1x1x8x1xi1> to vector<1x1x8x1xi32>
    %115 = arith.sitofp %114 : vector<1x1x8x1xi32> to vector<1x1x8x1xf32>
    %c0_48 = arith.constant 0 : index
    %c0_49 = arith.constant 0 : index
    %c0_50 = arith.constant 0 : index
    %116 = vector.load %arg4[%c0_48, %c0_49, %c0_50] : memref<9x128x64xbf16, #tpu.memory_space<vmem>>, vector<1x128x64xbf16>
    %117 = vector.shape_cast %116 : vector<1x128x64xbf16> to vector<128x64xbf16>
    %cst_51 = arith.constant dense<0.000000e+00> : vector<128x64xf32>
    %118 = tpu.matmul %106, %117, %cst_51 {dimension_numbers = #tpu.dot_dimension_numbers<[1], [0], [0], [1], [0, 0, 1, 1], [], []>} : vector<128x128xbf16>, vector<128x64xbf16>, vector<128x64xf32> -> vector<128x64xf32>
    %119 = vector.shape_cast %118 : vector<128x64xf32> to vector<2x8x8x64xf32>
    %c1_i32_52 = arith.constant 1 : i32
    %120 = tpu.dynamic_rotate %119 by %c1_i32_52 dim 2 : vector<2x8x8x64xf32>, i32 -> vector<2x8x8x64xf32>
    %121 = vector.broadcast %111 : vector<1x1x8x1xf32> to vector<2x8x8x64xf32>
    %122 = arith.mulf %120, %121 : vector<2x8x8x64xf32>
    %c1_53 = arith.constant 1 : index
    %c0_54 = arith.constant 0 : index
    %c0_55 = arith.constant 0 : index
    %123 = vector.load %arg4[%c1_53, %c0_54, %c0_55] : memref<9x128x64xbf16, #tpu.memory_space<vmem>>, vector<1x128x64xbf16>
    %124 = vector.shape_cast %123 : vector<1x128x64xbf16> to vector<128x64xbf16>
    %cst_56 = arith.constant dense<0.000000e+00> : vector<128x64xf32>
    %125 = tpu.matmul %106, %124, %cst_56 {dimension_numbers = #tpu.dot_dimension_numbers<[1], [0], [0], [1], [0, 0, 1, 1], [], []>} : vector<128x128xbf16>, vector<128x64xbf16>, vector<128x64xf32> -> vector<128x64xf32>
    %126 = vector.shape_cast %125 : vector<128x64xf32> to vector<2x8x8x64xf32>
    %127 = arith.addf %122, %126 : vector<2x8x8x64xf32>
    %c2_57 = arith.constant 2 : index
    %c0_58 = arith.constant 0 : index
    %c0_59 = arith.constant 0 : index
    %128 = vector.load %arg4[%c2_57, %c0_58, %c0_59] : memref<9x128x64xbf16, #tpu.memory_space<vmem>>, vector<1x128x64xbf16>
    %129 = vector.shape_cast %128 : vector<1x128x64xbf16> to vector<128x64xbf16>
    %cst_60 = arith.constant dense<0.000000e+00> : vector<128x64xf32>
    %130 = tpu.matmul %106, %129, %cst_60 {dimension_numbers = #tpu.dot_dimension_numbers<[1], [0], [0], [1], [0, 0, 1, 1], [], []>} : vector<128x128xbf16>, vector<128x64xbf16>, vector<128x64xf32> -> vector<128x64xf32>
    %131 = vector.shape_cast %130 : vector<128x64xf32> to vector<2x8x8x64xf32>
    %c7_i32_61 = arith.constant 7 : i32
    %132 = tpu.dynamic_rotate %131 by %c7_i32_61 dim 2 : vector<2x8x8x64xf32>, i32 -> vector<2x8x8x64xf32>
    %133 = vector.broadcast %115 : vector<1x1x8x1xf32> to vector<2x8x8x64xf32>
    %134 = arith.mulf %132, %133 : vector<2x8x8x64xf32>
    %135 = arith.addf %127, %134 : vector<2x8x8x64xf32>
    %c3_62 = arith.constant 3 : index
    %c0_63 = arith.constant 0 : index
    %c0_64 = arith.constant 0 : index
    %136 = vector.load %arg4[%c3_62, %c0_63, %c0_64] : memref<9x128x64xbf16, #tpu.memory_space<vmem>>, vector<1x128x64xbf16>
    %137 = vector.shape_cast %136 : vector<1x128x64xbf16> to vector<128x64xbf16>
    %cst_65 = arith.constant dense<0.000000e+00> : vector<128x64xf32>
    %138 = tpu.matmul %106, %137, %cst_65 {dimension_numbers = #tpu.dot_dimension_numbers<[1], [0], [0], [1], [0, 0, 1, 1], [], []>} : vector<128x128xbf16>, vector<128x64xbf16>, vector<128x64xf32> -> vector<128x64xf32>
    %139 = vector.shape_cast %138 : vector<128x64xf32> to vector<2x8x8x64xf32>
    %c1_i32_66 = arith.constant 1 : i32
    %140 = tpu.dynamic_rotate %139 by %c1_i32_66 dim 2 : vector<2x8x8x64xf32>, i32 -> vector<2x8x8x64xf32>
    %141 = vector.broadcast %111 : vector<1x1x8x1xf32> to vector<2x8x8x64xf32>
    %142 = arith.mulf %140, %141 : vector<2x8x8x64xf32>
    %c4_67 = arith.constant 4 : index
    %c0_68 = arith.constant 0 : index
    %c0_69 = arith.constant 0 : index
    %143 = vector.load %arg4[%c4_67, %c0_68, %c0_69] : memref<9x128x64xbf16, #tpu.memory_space<vmem>>, vector<1x128x64xbf16>
    %144 = vector.shape_cast %143 : vector<1x128x64xbf16> to vector<128x64xbf16>
    %cst_70 = arith.constant dense<0.000000e+00> : vector<128x64xf32>
    %145 = tpu.matmul %106, %144, %cst_70 {dimension_numbers = #tpu.dot_dimension_numbers<[1], [0], [0], [1], [0, 0, 1, 1], [], []>} : vector<128x128xbf16>, vector<128x64xbf16>, vector<128x64xf32> -> vector<128x64xf32>
    %146 = vector.shape_cast %145 : vector<128x64xf32> to vector<2x8x8x64xf32>
    %147 = arith.addf %142, %146 : vector<2x8x8x64xf32>
    %c5_71 = arith.constant 5 : index
    %c0_72 = arith.constant 0 : index
    %c0_73 = arith.constant 0 : index
    %148 = vector.load %arg4[%c5_71, %c0_72, %c0_73] : memref<9x128x64xbf16, #tpu.memory_space<vmem>>, vector<1x128x64xbf16>
    %149 = vector.shape_cast %148 : vector<1x128x64xbf16> to vector<128x64xbf16>
    %cst_74 = arith.constant dense<0.000000e+00> : vector<128x64xf32>
    %150 = tpu.matmul %106, %149, %cst_74 {dimension_numbers = #tpu.dot_dimension_numbers<[1], [0], [0], [1], [0, 0, 1, 1], [], []>} : vector<128x128xbf16>, vector<128x64xbf16>, vector<128x64xf32> -> vector<128x64xf32>
    %151 = vector.shape_cast %150 : vector<128x64xf32> to vector<2x8x8x64xf32>
    %c7_i32_75 = arith.constant 7 : i32
    %152 = tpu.dynamic_rotate %151 by %c7_i32_75 dim 2 : vector<2x8x8x64xf32>, i32 -> vector<2x8x8x64xf32>
    %153 = vector.broadcast %115 : vector<1x1x8x1xf32> to vector<2x8x8x64xf32>
    %154 = arith.mulf %152, %153 : vector<2x8x8x64xf32>
    %155 = arith.addf %147, %154 : vector<2x8x8x64xf32>
    %c6_76 = arith.constant 6 : index
    %c0_77 = arith.constant 0 : index
    %c0_78 = arith.constant 0 : index
    %156 = vector.load %arg4[%c6_76, %c0_77, %c0_78] : memref<9x128x64xbf16, #tpu.memory_space<vmem>>, vector<1x128x64xbf16>
    %157 = vector.shape_cast %156 : vector<1x128x64xbf16> to vector<128x64xbf16>
    %cst_79 = arith.constant dense<0.000000e+00> : vector<128x64xf32>
    %158 = tpu.matmul %106, %157, %cst_79 {dimension_numbers = #tpu.dot_dimension_numbers<[1], [0], [0], [1], [0, 0, 1, 1], [], []>} : vector<128x128xbf16>, vector<128x64xbf16>, vector<128x64xf32> -> vector<128x64xf32>
    %159 = vector.shape_cast %158 : vector<128x64xf32> to vector<2x8x8x64xf32>
    %c1_i32_80 = arith.constant 1 : i32
    %160 = tpu.dynamic_rotate %159 by %c1_i32_80 dim 2 : vector<2x8x8x64xf32>, i32 -> vector<2x8x8x64xf32>
    %161 = vector.broadcast %111 : vector<1x1x8x1xf32> to vector<2x8x8x64xf32>
    %162 = arith.mulf %160, %161 : vector<2x8x8x64xf32>
    %c7_81 = arith.constant 7 : index
    %c0_82 = arith.constant 0 : index
    %c0_83 = arith.constant 0 : index
    %163 = vector.load %arg4[%c7_81, %c0_82, %c0_83] : memref<9x128x64xbf16, #tpu.memory_space<vmem>>, vector<1x128x64xbf16>
    %164 = vector.shape_cast %163 : vector<1x128x64xbf16> to vector<128x64xbf16>
    %cst_84 = arith.constant dense<0.000000e+00> : vector<128x64xf32>
    %165 = tpu.matmul %106, %164, %cst_84 {dimension_numbers = #tpu.dot_dimension_numbers<[1], [0], [0], [1], [0, 0, 1, 1], [], []>} : vector<128x128xbf16>, vector<128x64xbf16>, vector<128x64xf32> -> vector<128x64xf32>
    %166 = vector.shape_cast %165 : vector<128x64xf32> to vector<2x8x8x64xf32>
    %167 = arith.addf %162, %166 : vector<2x8x8x64xf32>
    %c8_85 = arith.constant 8 : index
    %c0_86 = arith.constant 0 : index
    %c0_87 = arith.constant 0 : index
    %168 = vector.load %arg4[%c8_85, %c0_86, %c0_87] : memref<9x128x64xbf16, #tpu.memory_space<vmem>>, vector<1x128x64xbf16>
    %169 = vector.shape_cast %168 : vector<1x128x64xbf16> to vector<128x64xbf16>
    %cst_88 = arith.constant dense<0.000000e+00> : vector<128x64xf32>
    %170 = tpu.matmul %106, %169, %cst_88 {dimension_numbers = #tpu.dot_dimension_numbers<[1], [0], [0], [1], [0, 0, 1, 1], [], []>} : vector<128x128xbf16>, vector<128x64xbf16>, vector<128x64xf32> -> vector<128x64xf32>
    %171 = vector.shape_cast %170 : vector<128x64xf32> to vector<2x8x8x64xf32>
    %c7_i32_89 = arith.constant 7 : i32
    %172 = tpu.dynamic_rotate %171 by %c7_i32_89 dim 2 : vector<2x8x8x64xf32>, i32 -> vector<2x8x8x64xf32>
    %173 = vector.broadcast %115 : vector<1x1x8x1xf32> to vector<2x8x8x64xf32>
    %174 = arith.mulf %172, %173 : vector<2x8x8x64xf32>
    %175 = arith.addf %167, %174 : vector<2x8x8x64xf32>
    %cst_90 = arith.constant 0.000000e+00 : f32
    %176 = vector.broadcast %cst_90 : f32 to vector<2x1x8x64xf32>
    %177 = vector.extract_strided_slice %135 {offsets = [0, 0, 0, 0], sizes = [2, 7, 8, 64], strides = [1, 1, 1, 1]} : vector<2x8x8x64xf32> to vector<2x7x8x64xf32>
    %178 = tpu.concatenate %176, %177 in 1 : vector<2x1x8x64xf32>, vector<2x7x8x64xf32> -> vector<2x8x8x64xf32>
    %179 = arith.addf %155, %178 : vector<2x8x8x64xf32>
    %180 = vector.extract_strided_slice %175 {offsets = [0, 1, 0, 0], sizes = [2, 7, 8, 64], strides = [1, 1, 1, 1]} : vector<2x8x8x64xf32> to vector<2x7x8x64xf32>
    %181 = tpu.concatenate %180, %176 in 1 : vector<2x7x8x64xf32>, vector<2x1x8x64xf32> -> vector<2x8x8x64xf32>
    %182 = arith.addf %179, %181 : vector<2x8x8x64xf32>
    %183 = vector.shape_cast %182 : vector<2x8x8x64xf32> to vector<128x64xf32>
    %cst_91 = arith.constant dense<0.000000e+00> : vector<64xf32>
    %184 = vector.multi_reduction <add>, %183, %cst_91 [0] : vector<128x64xf32> to vector<64xf32>
    %185 = vector.shape_cast %184 : vector<64xf32> to vector<1x64xf32>
    %cst_92 = arith.constant 7.812500e-03 : f32
    %186 = vector.broadcast %cst_92 : f32 to vector<1x64xf32>
    %187 = arith.mulf %185, %186 : vector<1x64xf32>
    %188 = vector.broadcast %187 : vector<1x64xf32> to vector<128x64xf32>
    %189 = arith.subf %183, %188 : vector<128x64xf32>
    %190 = arith.mulf %189, %189 : vector<128x64xf32>
    %cst_93 = arith.constant dense<0.000000e+00> : vector<64xf32>
    %191 = vector.multi_reduction <add>, %190, %cst_93 [0] : vector<128x64xf32> to vector<64xf32>
    %192 = vector.shape_cast %191 : vector<64xf32> to vector<1x64xf32>
    %cst_94 = arith.constant 7.812500e-03 : f32
    %193 = vector.broadcast %cst_94 : f32 to vector<1x64xf32>
    %194 = arith.mulf %192, %193 : vector<1x64xf32>
    %c0_95 = arith.constant 0 : index
    %c0_96 = arith.constant 0 : index
    %195 = vector.load %arg5[%c0_95, %c0_96] : memref<1x64xf32, #tpu.memory_space<vmem>>, vector<1x64xf32>
    %cst_97 = arith.constant 9.99999974E-6 : f32
    %196 = vector.broadcast %cst_97 : f32 to vector<1x64xf32>
    %197 = arith.addf %194, %196 : vector<1x64xf32>
    %198 = math.rsqrt %197 : vector<1x64xf32>
    %199 = arith.mulf %195, %198 : vector<1x64xf32>
    %c0_98 = arith.constant 0 : index
    %c0_99 = arith.constant 0 : index
    %200 = vector.load %arg6[%c0_98, %c0_99] : memref<1x64xf32, #tpu.memory_space<vmem>>, vector<1x64xf32>
    %201 = arith.mulf %187, %199 : vector<1x64xf32>
    %202 = arith.subf %200, %201 : vector<1x64xf32>
    %203 = vector.broadcast %199 : vector<1x64xf32> to vector<128x64xf32>
    %204 = arith.mulf %183, %203 : vector<128x64xf32>
    %205 = vector.broadcast %202 : vector<1x64xf32> to vector<128x64xf32>
    %206 = arith.addf %204, %205 : vector<128x64xf32>
    %cst_100 = arith.constant 0.000000e+00 : f32
    %207 = vector.broadcast %cst_100 : f32 to vector<128x64xf32>
    %208 = arith.maximumf %206, %207 : vector<128x64xf32>
    %209 = arith.truncf %208 : vector<128x64xf32> to vector<128x64xbf16>
    %210 = vector.shape_cast %209 : vector<128x64xbf16> to vector<2x8x8x64xbf16>
    %211 = vector.shape_cast %210 : vector<2x8x8x64xbf16> to vector<128x64xbf16>
    %212 = tpu.iota {dimensions = array<i32: 2>} : vector<1x1x8x1xi32>
    %c1_i32_101 = arith.constant 1 : i32
    %213 = vector.broadcast %c1_i32_101 : i32 to vector<1x1x8x1xi32>
    %214 = arith.cmpi sge, %212, %213 : vector<1x1x8x1xi32>
    %215 = arith.extui %214 : vector<1x1x8x1xi1> to vector<1x1x8x1xi32>
    %216 = arith.sitofp %215 : vector<1x1x8x1xi32> to vector<1x1x8x1xf32>
    %c6_i32_102 = arith.constant 6 : i32
    %217 = vector.broadcast %c6_i32_102 : i32 to vector<1x1x8x1xi32>
    %218 = arith.cmpi sle, %212, %217 : vector<1x1x8x1xi32>
    %219 = arith.extui %218 : vector<1x1x8x1xi1> to vector<1x1x8x1xi32>
    %220 = arith.sitofp %219 : vector<1x1x8x1xi32> to vector<1x1x8x1xf32>
    %c0_103 = arith.constant 0 : index
    %c0_104 = arith.constant 0 : index
    %c0_105 = arith.constant 0 : index
    %221 = vector.load %arg7[%c0_103, %c0_104, %c0_105] : memref<9x64x1xbf16, #tpu.memory_space<vmem>>, vector<1x64x1xbf16>
    %222 = vector.shape_cast %221 : vector<1x64x1xbf16> to vector<64x1xbf16>
    %cst_106 = arith.constant dense<0.000000e+00> : vector<128x1xf32>
    %223 = tpu.matmul %211, %222, %cst_106 {dimension_numbers = #tpu.dot_dimension_numbers<[1], [0], [0], [1], [0, 0, 1, 1], [], []>} : vector<128x64xbf16>, vector<64x1xbf16>, vector<128x1xf32> -> vector<128x1xf32>
    %224 = vector.shape_cast %223 : vector<128x1xf32> to vector<2x8x8x1xf32>
    %c1_i32_107 = arith.constant 1 : i32
    %225 = tpu.dynamic_rotate %224 by %c1_i32_107 dim 2 : vector<2x8x8x1xf32>, i32 -> vector<2x8x8x1xf32>
    %226 = vector.broadcast %216 : vector<1x1x8x1xf32> to vector<2x8x8x1xf32>
    %227 = arith.mulf %225, %226 : vector<2x8x8x1xf32>
    %c1_108 = arith.constant 1 : index
    %c0_109 = arith.constant 0 : index
    %c0_110 = arith.constant 0 : index
    %228 = vector.load %arg7[%c1_108, %c0_109, %c0_110] : memref<9x64x1xbf16, #tpu.memory_space<vmem>>, vector<1x64x1xbf16>
    %229 = vector.shape_cast %228 : vector<1x64x1xbf16> to vector<64x1xbf16>
    %cst_111 = arith.constant dense<0.000000e+00> : vector<128x1xf32>
    %230 = tpu.matmul %211, %229, %cst_111 {dimension_numbers = #tpu.dot_dimension_numbers<[1], [0], [0], [1], [0, 0, 1, 1], [], []>} : vector<128x64xbf16>, vector<64x1xbf16>, vector<128x1xf32> -> vector<128x1xf32>
    %231 = vector.shape_cast %230 : vector<128x1xf32> to vector<2x8x8x1xf32>
    %232 = arith.addf %227, %231 : vector<2x8x8x1xf32>
    %c2_112 = arith.constant 2 : index
    %c0_113 = arith.constant 0 : index
    %c0_114 = arith.constant 0 : index
    %233 = vector.load %arg7[%c2_112, %c0_113, %c0_114] : memref<9x64x1xbf16, #tpu.memory_space<vmem>>, vector<1x64x1xbf16>
    %234 = vector.shape_cast %233 : vector<1x64x1xbf16> to vector<64x1xbf16>
    %cst_115 = arith.constant dense<0.000000e+00> : vector<128x1xf32>
    %235 = tpu.matmul %211, %234, %cst_115 {dimension_numbers = #tpu.dot_dimension_numbers<[1], [0], [0], [1], [0, 0, 1, 1], [], []>} : vector<128x64xbf16>, vector<64x1xbf16>, vector<128x1xf32> -> vector<128x1xf32>
    %236 = vector.shape_cast %235 : vector<128x1xf32> to vector<2x8x8x1xf32>
    %c7_i32_116 = arith.constant 7 : i32
    %237 = tpu.dynamic_rotate %236 by %c7_i32_116 dim 2 : vector<2x8x8x1xf32>, i32 -> vector<2x8x8x1xf32>
    %238 = vector.broadcast %220 : vector<1x1x8x1xf32> to vector<2x8x8x1xf32>
    %239 = arith.mulf %237, %238 : vector<2x8x8x1xf32>
    %240 = arith.addf %232, %239 : vector<2x8x8x1xf32>
    %c3_117 = arith.constant 3 : index
    %c0_118 = arith.constant 0 : index
    %c0_119 = arith.constant 0 : index
    %241 = vector.load %arg7[%c3_117, %c0_118, %c0_119] : memref<9x64x1xbf16, #tpu.memory_space<vmem>>, vector<1x64x1xbf16>
    %242 = vector.shape_cast %241 : vector<1x64x1xbf16> to vector<64x1xbf16>
    %cst_120 = arith.constant dense<0.000000e+00> : vector<128x1xf32>
    %243 = tpu.matmul %211, %242, %cst_120 {dimension_numbers = #tpu.dot_dimension_numbers<[1], [0], [0], [1], [0, 0, 1, 1], [], []>} : vector<128x64xbf16>, vector<64x1xbf16>, vector<128x1xf32> -> vector<128x1xf32>
    %244 = vector.shape_cast %243 : vector<128x1xf32> to vector<2x8x8x1xf32>
    %c1_i32_121 = arith.constant 1 : i32
    %245 = tpu.dynamic_rotate %244 by %c1_i32_121 dim 2 : vector<2x8x8x1xf32>, i32 -> vector<2x8x8x1xf32>
    %246 = vector.broadcast %216 : vector<1x1x8x1xf32> to vector<2x8x8x1xf32>
    %247 = arith.mulf %245, %246 : vector<2x8x8x1xf32>
    %c4_122 = arith.constant 4 : index
    %c0_123 = arith.constant 0 : index
    %c0_124 = arith.constant 0 : index
    %248 = vector.load %arg7[%c4_122, %c0_123, %c0_124] : memref<9x64x1xbf16, #tpu.memory_space<vmem>>, vector<1x64x1xbf16>
    %249 = vector.shape_cast %248 : vector<1x64x1xbf16> to vector<64x1xbf16>
    %cst_125 = arith.constant dense<0.000000e+00> : vector<128x1xf32>
    %250 = tpu.matmul %211, %249, %cst_125 {dimension_numbers = #tpu.dot_dimension_numbers<[1], [0], [0], [1], [0, 0, 1, 1], [], []>} : vector<128x64xbf16>, vector<64x1xbf16>, vector<128x1xf32> -> vector<128x1xf32>
    %251 = vector.shape_cast %250 : vector<128x1xf32> to vector<2x8x8x1xf32>
    %252 = arith.addf %247, %251 : vector<2x8x8x1xf32>
    %c5_126 = arith.constant 5 : index
    %c0_127 = arith.constant 0 : index
    %c0_128 = arith.constant 0 : index
    %253 = vector.load %arg7[%c5_126, %c0_127, %c0_128] : memref<9x64x1xbf16, #tpu.memory_space<vmem>>, vector<1x64x1xbf16>
    %254 = vector.shape_cast %253 : vector<1x64x1xbf16> to vector<64x1xbf16>
    %cst_129 = arith.constant dense<0.000000e+00> : vector<128x1xf32>
    %255 = tpu.matmul %211, %254, %cst_129 {dimension_numbers = #tpu.dot_dimension_numbers<[1], [0], [0], [1], [0, 0, 1, 1], [], []>} : vector<128x64xbf16>, vector<64x1xbf16>, vector<128x1xf32> -> vector<128x1xf32>
    %256 = vector.shape_cast %255 : vector<128x1xf32> to vector<2x8x8x1xf32>
    %c7_i32_130 = arith.constant 7 : i32
    %257 = tpu.dynamic_rotate %256 by %c7_i32_130 dim 2 : vector<2x8x8x1xf32>, i32 -> vector<2x8x8x1xf32>
    %258 = vector.broadcast %220 : vector<1x1x8x1xf32> to vector<2x8x8x1xf32>
    %259 = arith.mulf %257, %258 : vector<2x8x8x1xf32>
    %260 = arith.addf %252, %259 : vector<2x8x8x1xf32>
    %c6_131 = arith.constant 6 : index
    %c0_132 = arith.constant 0 : index
    %c0_133 = arith.constant 0 : index
    %261 = vector.load %arg7[%c6_131, %c0_132, %c0_133] : memref<9x64x1xbf16, #tpu.memory_space<vmem>>, vector<1x64x1xbf16>
    %262 = vector.shape_cast %261 : vector<1x64x1xbf16> to vector<64x1xbf16>
    %cst_134 = arith.constant dense<0.000000e+00> : vector<128x1xf32>
    %263 = tpu.matmul %211, %262, %cst_134 {dimension_numbers = #tpu.dot_dimension_numbers<[1], [0], [0], [1], [0, 0, 1, 1], [], []>} : vector<128x64xbf16>, vector<64x1xbf16>, vector<128x1xf32> -> vector<128x1xf32>
    %264 = vector.shape_cast %263 : vector<128x1xf32> to vector<2x8x8x1xf32>
    %c1_i32_135 = arith.constant 1 : i32
    %265 = tpu.dynamic_rotate %264 by %c1_i32_135 dim 2 : vector<2x8x8x1xf32>, i32 -> vector<2x8x8x1xf32>
    %266 = vector.broadcast %216 : vector<1x1x8x1xf32> to vector<2x8x8x1xf32>
    %267 = arith.mulf %265, %266 : vector<2x8x8x1xf32>
    %c7_136 = arith.constant 7 : index
    %c0_137 = arith.constant 0 : index
    %c0_138 = arith.constant 0 : index
    %268 = vector.load %arg7[%c7_136, %c0_137, %c0_138] : memref<9x64x1xbf16, #tpu.memory_space<vmem>>, vector<1x64x1xbf16>
    %269 = vector.shape_cast %268 : vector<1x64x1xbf16> to vector<64x1xbf16>
    %cst_139 = arith.constant dense<0.000000e+00> : vector<128x1xf32>
    %270 = tpu.matmul %211, %269, %cst_139 {dimension_numbers = #tpu.dot_dimension_numbers<[1], [0], [0], [1], [0, 0, 1, 1], [], []>} : vector<128x64xbf16>, vector<64x1xbf16>, vector<128x1xf32> -> vector<128x1xf32>
    %271 = vector.shape_cast %270 : vector<128x1xf32> to vector<2x8x8x1xf32>
    %272 = arith.addf %267, %271 : vector<2x8x8x1xf32>
    %c8_140 = arith.constant 8 : index
    %c0_141 = arith.constant 0 : index
    %c0_142 = arith.constant 0 : index
    %273 = vector.load %arg7[%c8_140, %c0_141, %c0_142] : memref<9x64x1xbf16, #tpu.memory_space<vmem>>, vector<1x64x1xbf16>
    %274 = vector.shape_cast %273 : vector<1x64x1xbf16> to vector<64x1xbf16>
    %cst_143 = arith.constant dense<0.000000e+00> : vector<128x1xf32>
    %275 = tpu.matmul %211, %274, %cst_143 {dimension_numbers = #tpu.dot_dimension_numbers<[1], [0], [0], [1], [0, 0, 1, 1], [], []>} : vector<128x64xbf16>, vector<64x1xbf16>, vector<128x1xf32> -> vector<128x1xf32>
    %276 = vector.shape_cast %275 : vector<128x1xf32> to vector<2x8x8x1xf32>
    %c7_i32_144 = arith.constant 7 : i32
    %277 = tpu.dynamic_rotate %276 by %c7_i32_144 dim 2 : vector<2x8x8x1xf32>, i32 -> vector<2x8x8x1xf32>
    %278 = vector.broadcast %220 : vector<1x1x8x1xf32> to vector<2x8x8x1xf32>
    %279 = arith.mulf %277, %278 : vector<2x8x8x1xf32>
    %280 = arith.addf %272, %279 : vector<2x8x8x1xf32>
    %cst_145 = arith.constant 0.000000e+00 : f32
    %281 = vector.broadcast %cst_145 : f32 to vector<2x1x8x1xf32>
    %282 = vector.extract_strided_slice %240 {offsets = [0, 0, 0, 0], sizes = [2, 7, 8, 1], strides = [1, 1, 1, 1]} : vector<2x8x8x1xf32> to vector<2x7x8x1xf32>
    %283 = tpu.concatenate %281, %282 in 1 : vector<2x1x8x1xf32>, vector<2x7x8x1xf32> -> vector<2x8x8x1xf32>
    %284 = arith.addf %260, %283 : vector<2x8x8x1xf32>
    %285 = vector.extract_strided_slice %280 {offsets = [0, 1, 0, 0], sizes = [2, 7, 8, 1], strides = [1, 1, 1, 1]} : vector<2x8x8x1xf32> to vector<2x7x8x1xf32>
    %286 = tpu.concatenate %285, %281 in 1 : vector<2x7x8x1xf32>, vector<2x1x8x1xf32> -> vector<2x8x8x1xf32>
    %287 = arith.addf %284, %286 : vector<2x8x8x1xf32>
    %288 = vector.shape_cast %287 : vector<2x8x8x1xf32> to vector<128x1xf32>
    %cst_146 = arith.constant dense<0.000000e+00> : vector<1xf32>
    %289 = vector.multi_reduction <add>, %288, %cst_146 [0] : vector<128x1xf32> to vector<1xf32>
    %290 = vector.shape_cast %289 : vector<1xf32> to vector<1x1xf32>
    %cst_147 = arith.constant 7.812500e-03 : f32
    %291 = vector.broadcast %cst_147 : f32 to vector<1x1xf32>
    %292 = arith.mulf %290, %291 : vector<1x1xf32>
    %293 = vector.broadcast %292 : vector<1x1xf32> to vector<128x1xf32>
    %294 = arith.subf %288, %293 : vector<128x1xf32>
    %295 = arith.mulf %294, %294 : vector<128x1xf32>
    %cst_148 = arith.constant dense<0.000000e+00> : vector<1xf32>
    %296 = vector.multi_reduction <add>, %295, %cst_148 [0] : vector<128x1xf32> to vector<1xf32>
    %297 = vector.shape_cast %296 : vector<1xf32> to vector<1x1xf32>
    %cst_149 = arith.constant 7.812500e-03 : f32
    %298 = vector.broadcast %cst_149 : f32 to vector<1x1xf32>
    %299 = arith.mulf %297, %298 : vector<1x1xf32>
    %c0_150 = arith.constant 0 : index
    %c0_151 = arith.constant 0 : index
    %300 = vector.load %arg8[%c0_150, %c0_151] : memref<1x1xf32, #tpu.memory_space<vmem>>, vector<1x1xf32>
    %cst_152 = arith.constant 9.99999974E-6 : f32
    %301 = vector.broadcast %cst_152 : f32 to vector<1x1xf32>
    %302 = arith.addf %299, %301 : vector<1x1xf32>
    %303 = math.rsqrt %302 : vector<1x1xf32>
    %304 = arith.mulf %300, %303 : vector<1x1xf32>
    %c0_153 = arith.constant 0 : index
    %c0_154 = arith.constant 0 : index
    %305 = vector.load %arg9[%c0_153, %c0_154] : memref<1x1xf32, #tpu.memory_space<vmem>>, vector<1x1xf32>
    %306 = arith.mulf %292, %304 : vector<1x1xf32>
    %307 = arith.subf %305, %306 : vector<1x1xf32>
    %308 = vector.broadcast %304 : vector<1x1xf32> to vector<128x1xf32>
    %309 = arith.mulf %288, %308 : vector<128x1xf32>
    %310 = vector.broadcast %307 : vector<1x1xf32> to vector<128x1xf32>
    %311 = arith.addf %309, %310 : vector<128x1xf32>
    %cst_155 = arith.constant 0.000000e+00 : f32
    %312 = vector.broadcast %cst_155 : f32 to vector<128x1xf32>
    %313 = arith.maximumf %311, %312 : vector<128x1xf32>
    %314 = vector.shape_cast %313 : vector<128x1xf32> to vector<2x8x8x1xf32>
    %c0_156 = arith.constant 0 : index
    %c0_157 = arith.constant 0 : index
    %c0_158 = arith.constant 0 : index
    %c0_159 = arith.constant 0 : index
    %315 = vector.load %arg10[%c0_156, %c0_157, %c0_158, %c0_159] : memref<2x8x8x1xf32, #tpu.memory_space<vmem>>, vector<2x8x8x1xf32>
    tpu.vector_store %arg10[%c0_156, %c0_157, %c0_158, %c0_159], %314 {strides = array<i32>} : memref<2x8x8x1xf32, #tpu.memory_space<vmem>>, vector<2x8x8x1xf32>,
    return
  }
}

</mosaic_0001>

<bundles_post_ra>
// kernel: depth_estimator_forward.1
= control target key start
LH: loop header
LB: loop body
LE: loop exit
PB: predicated region body
PF: predicated region fallthrough
CT: control target
= control target key end

     0   :  { %vm120_vm0 = vcmask 261120   ;;  %v56_v30 = vlaneseq  ;;  %v6862_v46 = vmov 0.0   ;;  %vm3330_vm3 = vcmask 523264   ;;  %s9167_s1 = inlined_call_operand.vmem [shape: bf16[9,32,128], index: 1, kind: input, shape index: {}]   ;;  %s9168_s0 = inlined_call_operand.vmem [shape: bf16[2,8,8,32], index: 0, kind: input, shape index: {}]   ;;  %s9169_s4 = inlined_call_operand.vmem [shape: bf16[9,128,64], index: 4, kind: input, shape index: {}]   ;;  %s9170_s2 = inlined_call_operand.vmem [shape: f32[1,128], index: 2, kind: input, shape index: {}]   ;;  %s9171_s3 = inlined_call_operand.vmem [shape: f32[1,128], index: 3, kind: input, shape index: {}]   ;;  %s9172_s7 = inlined_call_operand.vmem [shape: bf16[9,64,1], index: 7, kind: input, shape index: {}]   ;;  %s9173_s5 = inlined_call_operand.vmem [shape: f32[1,64], index: 5, kind: input, shape index: {}]   ;;  %s9174_s6 = inlined_call_operand.vmem [shape: f32[1,64], index: 6, kind: input, shape index: {}]   ;;  %s9175_s8 = inlined_call_operand.<no memory space> [shape: f32[1,1], index: 8, kind: input, shape index: {}]   ;;  %s9176_s9 = inlined_call_operand.<no memory space> [shape: f32[1,1], index: 9, kind: input, shape index: {}]   ;;  %s9177_s10 = inlined_call_operand.vmem [shape: f32[2,8,8,1], index: 10, kind: output, shape index: {}]  }
   0x1   :  { %v6722_v0 = vld [vmem:[%s9167_s1] sm:$0xff]   ;;  %v6723_v1 = vld [vmem:[%s9167_s1 + $0x8] sm:$0xff]   ;;  %v6729_v7 = vld [vmem:[%s9167_s1 + $0x10] sm:$0xff]   ;;  %vm4991_vm4 = vcmask 7168  }
   0x2   :  { %6033 = vmatprep.subr.bf16.mxu0 %v6722_v0  ;;  %6717 = vmatprep.subr.bf16.mxu1 %v6722_v0  ;;  %v6927_v2 = vld [vmem:[%s9168_s0] sm:$0xff]   ;;  %v6937_v4 = vld [vmem:[%s9168_s0 + $0x8] sm:$0xff]   ;;  %v6957_v8 = vld [vmem:[%s9168_s0 + $0x10] sm:$0xff]   ;;  %v7164_v35 = vshrl.u32 %v56_v30, 7 }
   0x3   :  { %6034 = vmatpush3.bf16.msra.mxu0 %v6722_v0  ;;  %6719 = vmatpush3.bf16.msra.mxu1 %v6722_v0  ;;  %v6932_v3 = vld [vmem:[%s9168_s0 + $0x20] sm:$0xff]   ;;  %v6946_v5 = vld [vmem:[%s9168_s0 + $0x28] sm:$0xff]   ;;  %v6962_v9 = vld [vmem:[%s9168_s0 + $0x30] sm:$0xff]  }
   0x4   :  { %6035 = vmatprep.subr.bf16.mxu0 %v6723_v1  ;;  %6718 = vmatprep.subr.bf16.mxu1 %v6723_v1  ;;  %v6728_v6 = vld [vmem:[%s9167_s1 + $0x20] sm:$0xff]   ;;  %v6975_v10 = vld [vmem:[%s9168_s0 + $0x18] sm:$0xff]   ;;  %v6734_v12 = vld [vmem:[%s9167_s1 + $0x28] sm:$0xff]   ;;  %vm58_vm1 = vcmp.ge.s32.totalorder %v7164_v35, 1  ;;  %vm61_vm2 = vcmp.le.s32.totalorder %v7164_v35, 6 }
   0x5   :  { %6037 = vmatprep.mubr.msk.bf16.mxu0 %vm120_vm0, %v6927_v2  ;;  %6045 = vmatprep.mubr.msk.bf16.mxu1 %vm120_vm0, %v6932_v3  ;;  %v6980_v11 = vld [vmem:[%s9168_s0 + $0x38] sm:$0xff]   ;;  %v6736_v14 = vld [vmem:[%s9167_s1 + $0x40] sm:$0xff]   ;;  %v6737_v15 = vld [vmem:[%s9167_s1 + $0x30] sm:$0xff]   ;;  %v7173_v47 = vsel %vm58_vm1, 1.0, %v6862_v46  ;;  %v7177_v52 = vsel %vm61_vm2, 1.0, %v6862_v46 }
   0x6   :  { %v6735_v13 = vld [vmem:[%s9167_s1 + $0x18] sm:$0xff]   ;;  %v6738_v16 = vld [vmem:[%s9167_s1 + $0x48] sm:$0xff]   ;;  %v6740_v18 = vld [vmem:[%s9167_s1 + $0x60] sm:$0xff]  }
   0x7   :  { %6036 = vmatpush3.bf16.msra.mxu0 %v6723_v1  ;;  %6720 = vmatpush3.bf16.msra.mxu1 %v6723_v1  ;;  %v6739_v17 = vld [vmem:[%s9167_s1 + $0x38] sm:$0xff]   ;;  %v6741_v19 = vld [vmem:[%s9167_s1 + $0x50] sm:$0xff]   ;;  %v6742_v20 = vld [vmem:[%s9167_s1 + $0x68] sm:$0xff]  }
   0x8   :  { %6073 = vmatprep.subr.bf16.mxu0 %v6728_v6  ;;  %6053 = vmatprep.subr.bf16.mxu1 %v6729_v7  ;;  %v6743_v21 = vld [vmem:[%s9167_s1 + $0x58] sm:$0xff]   ;;  %v6744_v22 = vld [vmem:[%s9167_s1 + $0x80] sm:$0xff]   ;;  %v6745_v23 = vld [vmem:[%s9167_s1 + $0x70] sm:$0xff]  }
   0x9   :  { %v6746_v24 = vld [vmem:[%s9167_s1 + $0x88] sm:$0xff]   ;;  %v6747_v25 = vld [vmem:[%s9167_s1 + $0x78] sm:$0xff]  }
   0xa   :  { %6038 = vmatmul.mubr.msk.bf16.vlgmr.msra.gmra.mrb[0].mxu0 %vm120_vm0, %v6937_v4  ;;  %6046 = vmatmul.mubr.msk.bf16.vlgmr.msra.gmra.mrb[0].mxu1 %vm120_vm0, %v6946_v5 }
   0xb   :  { %6074 = vmatpush3.bf16.msra.mxu0 %v6728_v6  ;;  %6054 = vmatpush3.bf16.msra.mxu1 %v6729_v7 }
   0xc   :  { %6041 = vmatprep.mubr.msk.bf16.mxu0 %vm120_vm0, %v6957_v8  ;;  %6049 = vmatprep.mubr.msk.bf16.mxu1 %vm120_vm0, %v6962_v9 }
   0xd   :  { %6075 = vmatprep.subr.bf16.mxu0 %v6734_v12  ;;  %6055 = vmatprep.subr.bf16.mxu1 %v6735_v13 }
   0xf   :  { %6076 = vmatpush3.bf16.msra.mxu0 %v6734_v12  ;;  %6056 = vmatpush3.bf16.msra.mxu1 %v6735_v13 }
  0x10   :  { %6113 = vmatprep.subr.bf16.mxu0 %v6736_v14  ;;  %6093 = vmatprep.subr.bf16.mxu1 %v6737_v15 }
  0x12   :  { %6042 = vmatmul.mubr.msk.bf16.gmra.mrb[4].mxu0 %vm120_vm0, %v6975_v10  ;;  %6050 = vmatmul.mubr.msk.bf16.gmra.mrb[4].mxu1 %vm120_vm0, %v6980_v11 }
  0x13   :  { %6057 = vmatprep.mubr.msk.bf16.mxu1 %vm120_vm0, %v6927_v2  ;;  %6077 = vmatprep.mubr.msk.bf16.mxu0 %vm120_vm0, %v6927_v2 }
  0x1a   :  { %6058 = vmatmul.mubr.msk.bf16.vlgmr.msra.gmra.mrb[8].mxu1 %vm120_vm0, %v6937_v4  ;;  %6078 = vmatmul.mubr.msk.bf16.vlgmr.msra.gmra.mrb[8].mxu0 %vm120_vm0, %v6937_v4 }
  0x1b   :  { %6114 = vmatpush3.bf16.msra.mxu0 %v6736_v14  ;;  %6094 = vmatpush3.bf16.msra.mxu1 %v6737_v15 }
  0x1c   :  { %6061 = vmatprep.mubr.msk.bf16.mxu1 %vm120_vm0, %v6957_v8  ;;  %6081 = vmatprep.mubr.msk.bf16.mxu0 %vm120_vm0, %v6957_v8 }
  0x1d   :  { %6115 = vmatprep.subr.bf16.mxu0 %v6738_v16  ;;  %6095 = vmatprep.subr.bf16.mxu1 %v6739_v17 }
  0x1f   :  { %6116 = vmatpush3.bf16.msra.mxu0 %v6738_v16  ;;  %6096 = vmatpush3.bf16.msra.mxu1 %v6739_v17 }
  0x20   :  { %6153 = vmatprep.subr.bf16.mxu0 %v6740_v18  ;;  %6133 = vmatprep.subr.bf16.mxu1 %v6741_v19 }
  0x22   :  { %6062 = vmatmul.mubr.msk.bf16.gmra.mrb[12].mxu1 %vm120_vm0, %v6975_v10  ;;  %6082 = vmatmul.mubr.msk.bf16.gmra.mrb[12].mxu0 %vm120_vm0, %v6975_v10 }
  0x23   :  { %6065 = vmatprep.mubr.msk.bf16.mxu1 %vm120_vm0, %v6932_v3  ;;  %6085 = vmatprep.mubr.msk.bf16.mxu0 %vm120_vm0, %v6932_v3 }
  0x2a   :  { %6066 = vmatmul.mubr.msk.bf16.gmra.mrb[16].mxu1 %vm120_vm0, %v6946_v5  ;;  %6086 = vmatmul.mubr.msk.bf16.gmra.mrb[16].mxu0 %vm120_vm0, %v6946_v5 }
  0x2b   :  { %6069 = vmatprep.mubr.msk.bf16.mxu1 %vm120_vm0, %v6962_v9  ;;  %6089 = vmatprep.mubr.msk.bf16.mxu0 %vm120_vm0, %v6962_v9 }
  0x32   :  { %6070 = vmatmul.mubr.msk.bf16.gmra.mrb[20].mxu1 %vm120_vm0, %v6980_v11  ;;  %6090 = vmatmul.mubr.msk.bf16.gmra.mrb[20].mxu0 %vm120_vm0, %v6980_v11 }
  0x33   :  { %6097 = vmatprep.mubr.msk.bf16.mxu1 %vm120_vm0, %v6927_v2  ;;  %6117 = vmatprep.mubr.msk.bf16.mxu0 %vm120_vm0, %v6927_v2 }
  0x3a   :  { %6098 = vmatmul.mubr.msk.bf16.vlgmr.msra.gmra.mrb[24].mxu1 %vm120_vm0, %v6937_v4  ;;  %6118 = vmatmul.mubr.msk.bf16.vlgmr.msra.gmra.mrb[24].mxu0 %vm120_vm0, %v6937_v4 }
  0x3b   :  { %6154 = vmatpush3.bf16.msra.mxu0 %v6740_v18  ;;  %6134 = vmatpush3.bf16.msra.mxu1 %v6741_v19 }
  0x3c   :  { %6101 = vmatprep.mubr.msk.bf16.mxu1 %vm120_vm0, %v6957_v8  ;;  %6121 = vmatprep.mubr.msk.bf16.mxu0 %vm120_vm0, %v6957_v8 }
  0x3d   :  { %6155 = vmatprep.subr.bf16.mxu0 %v6742_v20  ;;  %6135 = vmatprep.subr.bf16.mxu1 %v6743_v21 }
  0x3f   :  { %6156 = vmatpush3.bf16.msra.mxu0 %v6742_v20  ;;  %6136 = vmatpush3.bf16.msra.mxu1 %v6743_v21 }
  0x40   :  { %6193 = vmatprep.subr.bf16.mxu0 %v6744_v22  ;;  %6173 = vmatprep.subr.bf16.mxu1 %v6745_v23 }
  0x42   :  { %6102 = vmatmul.mubr.msk.bf16.gmra.mrb[28].mxu1 %vm120_vm0, %v6975_v10  ;;  %6122 = vmatmul.mubr.msk.bf16.gmra.mrb[28].mxu0 %vm120_vm0, %v6975_v10 }
  0x43   :  { %6105 = vmatprep.mubr.msk.bf16.mxu1 %vm120_vm0, %v6932_v3  ;;  %6125 = vmatprep.mubr.msk.bf16.mxu0 %vm120_vm0, %v6932_v3 }
  0x4a   :  { %6106 = vmatmul.mubr.msk.bf16.gmra.mrb[32].mxu1 %vm120_vm0, %v6946_v5  ;;  %6126 = vmatmul.mubr.msk.bf16.gmra.mrb[32].mxu0 %vm120_vm0, %v6946_v5 }
  0x4b   :  { %6109 = vmatprep.mubr.msk.bf16.mxu1 %vm120_vm0, %v6962_v9  ;;  %6129 = vmatprep.mubr.msk.bf16.mxu0 %vm120_vm0, %v6962_v9 }
  0x52   :  { %6110 = vmatmul.mubr.msk.bf16.gmra.mrb[36].mxu1 %vm120_vm0, %v6980_v11  ;;  %6130 = vmatmul.mubr.msk.bf16.gmra.mrb[36].mxu0 %vm120_vm0, %v6980_v11 }
  0x53   :  { %6137 = vmatprep.mubr.msk.bf16.mxu1 %vm120_vm0, %v6927_v2  ;;  %6157 = vmatprep.mubr.msk.bf16.mxu0 %vm120_vm0, %v6927_v2 }
  0x5a   :  { %6138 = vmatmul.mubr.msk.bf16.vlgmr.msra.gmra.mrb[40].mxu1 %vm120_vm0, %v6937_v4  ;;  %6158 = vmatmul.mubr.msk.bf16.vlgmr.msra.gmra.mrb[40].mxu0 %vm120_vm0, %v6937_v4 }
  0x5b   :  { %6194 = vmatpush3.bf16.msra.mxu0 %v6744_v22  ;;  %6174 = vmatpush3.bf16.msra.mxu1 %v6745_v23 }
  0x5c   :  { %6141 = vmatprep.mubr.msk.bf16.mxu1 %vm120_vm0, %v6957_v8  ;;  %6161 = vmatprep.mubr.msk.bf16.mxu0 %vm120_vm0, %v6957_v8 }
  0x5d   :  { %6195 = vmatprep.subr.bf16.mxu0 %v6746_v24  ;;  %6175 = vmatprep.subr.bf16.mxu1 %v6747_v25 }
  0x5f   :  { %6196 = vmatpush3.bf16.msra.mxu0 %v6746_v24  ;;  %6176 = vmatpush3.bf16.msra.mxu1 %v6747_v25 }
  0x62   :  { %6142 = vmatmul.mubr.msk.bf16.gmra.mrb[44].mxu1 %vm120_vm0, %v6975_v10  ;;  %6162 = vmatmul.mubr.msk.bf16.gmra.mrb[44].mxu0 %vm120_vm0, %v6975_v10 }
  0x63   :  { %6145 = vmatprep.mubr.msk.bf16.mxu1 %vm120_vm0, %v6932_v3  ;;  %6165 = vmatprep.mubr.msk.bf16.mxu0 %vm120_vm0, %v6932_v3 }
  0x6a   :  { %6146 = vmatmul.mubr.msk.bf16.gmra.mrb[48].mxu1 %vm120_vm0, %v6946_v5  ;;  %6166 = vmatmul.mubr.msk.bf16.gmra.mrb[48].mxu0 %vm120_vm0, %v6946_v5 }
  0x6b   :  { %6149 = vmatprep.mubr.msk.bf16.mxu1 %vm120_vm0, %v6962_v9  ;;  %6169 = vmatprep.mubr.msk.bf16.mxu0 %vm120_vm0, %v6962_v9 }
  0x72   :  { %6150 = vmatmul.mubr.msk.bf16.gmra.mrb[52].mxu1 %vm120_vm0, %v6980_v11  ;;  %6170 = vmatmul.mubr.msk.bf16.gmra.mrb[52].mxu0 %vm120_vm0, %v6980_v11 }
  0x73   :  { %6177 = vmatprep.mubr.msk.bf16.mxu1 %vm120_vm0, %v6927_v2  ;;  %6197 = vmatprep.mubr.msk.bf16.mxu0 %vm120_vm0, %v6927_v2 }
  0x7a   :  { %6178 = vmatmul.mubr.msk.bf16.vlgmr.msra.gmra.mrb[56].mxu1 %vm120_vm0, %v6937_v4  ;;  %6198 = vmatmul.mubr.msk.bf16.vlgmr.msra.gmra.mrb[56].mxu0 %vm120_vm0, %v6937_v4 }
  0x7b   :  { %6181 = vmatprep.mubr.msk.bf16.mxu1 %vm120_vm0, %v6957_v8  ;;  %6201 = vmatprep.mubr.msk.bf16.mxu0 %vm120_vm0, %v6957_v8 }
  0x82   :  { %6182 = vmatmul.mubr.msk.bf16.gmra.mrb[60].mxu1 %vm120_vm0, %v6975_v10  ;;  %6202 = vmatmul.mubr.msk.bf16.gmra.mrb[60].mxu0 %vm120_vm0, %v6975_v10 }
  0x83   :  { %6185 = vmatprep.mubr.msk.bf16.mxu1 %vm120_vm0, %v6932_v3  ;;  %6205 = vmatprep.mubr.msk.bf16.mxu0 %vm120_vm0, %v6932_v3 }
  0x8a   :  { %6186 = vmatmul.mubr.msk.bf16.gmra.mrb[64].mxu1 %vm120_vm0, %v6946_v5  ;;  %6206 = vmatmul.mubr.msk.bf16.gmra.mrb[64].mxu0 %vm120_vm0, %v6946_v5 }
  0x8b   :  { %6189 = vmatprep.mubr.msk.bf16.mxu1 %vm120_vm0, %v6962_v9  ;;  %6209 = vmatprep.mubr.msk.bf16.mxu0 %vm120_vm0, %v6962_v9 }
  0x92   :  { %6190 = vmatmul.mubr.msk.bf16.gmra.mrb[68].mxu1 %vm120_vm0, %v6980_v11  ;;  %6210 = vmatmul.mubr.msk.bf16.gmra.mrb[68].mxu0 %vm120_vm0, %v6980_v11 }
  0xdd   :  { %v6039_v26 = vpop.f32.mrb[0].mxu0  ;;  %v7156_v27 = vpop.f32.mrb[0].mxu1 }
  0xde   :  { %v179_v28 = vpop.f32.mrb[1].mxu0  ;;  %v7158_v29 = vpop.f32.mrb[1].mxu1  ;;  %v242_v42 = vrot.slane %v6039_v26, 7 }
  0xdf   :  { %v6040_v31 = vpop.f32.mrb[2].mxu0  ;;  %v7160_v32 = vpop.f32.mrb[2].mxu1  ;;  %v240_v45 = vrot.slane %v179_v28, 7 }
  0xe0   :  { %v182_v33 = vpop.f32.mrb[3].mxu0  ;;  %v7162_v34 = vpop.f32.mrb[3].mxu1  ;;  %v243_v48 = vrot.slane %v6040_v31, 7  ;;  %v256_v50 = vmul.f32 %v7173_v47, %v242_v42  ;;  %v247_v42 = vrot.slane %v7158_v29, 7 }
  0xe1   :  { %v241_v49 = vrot.slane %v182_v33, 7  ;;  %v254_v54 = vmul.f32 %v7173_v47, %v240_v45 }
  0xe2   :  { %v257_v59 = vmul.f32 %v7173_v47, %v243_v48  ;;  %v250_v48 = vrot.slane %v7160_v32, 7 }
  0xe3   :  { %v255_v0 = vmul.f32 %v7173_v47, %v241_v49 }
  0xe5   :  { %v6043_v36 = vpop.f32.mrb[4].mxu0  ;;  %v7166_v37 = vpop.f32.mrb[4].mxu1 }
  0xe6   :  { %v195_v38 = vpop.f32.mrb[5].mxu0  ;;  %v7168_v39 = vpop.f32.mrb[5].mxu1  ;;  %v246_v1 = vrot.slane %v6043_v36, 7  ;;  %v249_v36 = vrot.slane %v7156_v27, 7 }
  0xe7   :  { %v6044_v40 = vpop.f32.mrb[6].mxu0  ;;  %v6052_v41 = vpop.f32.mrb[6].mxu1  ;;  %v244_v7 = vrot.slane %v195_v38, 7 }
  0xe8   :  { %v198_v43 = vpop.f32.mrb[7].mxu0  ;;  %v7171_v44 = vpop.f32.mrb[7].mxu1  ;;  %v260_v17 = vmul.f32 %v7173_v47, %v246_v1  ;;  %v253_v1 = vrot.slane %v7166_v37, 7 }
  0xe9   :  { %v245_v13 = vrot.slane %v198_v43, 7  ;;  %v258_v21 = vmul.f32 %v7173_v47, %v244_v7  ;;  %v251_v7 = vrot.slane %v7168_v39, 7 }
  0xeb   :  { %v259_v33 = vmul.f32 %v7173_v47, %v245_v13 }
  0xed   :  { %v6059_v51 = vpop.f32.mrb[8].mxu1  ;;  %v6079_v53 = vpop.f32.mrb[8].mxu0 }
  0xee   :  { %v382_v55 = vadd.f32 %v6059_v51, %v256_v50  ;;  %v508_v56 = vrot.slane %v6079_v53, 1  ;;  %v319_v57 = vpop.f32.mrb[9].mxu1  ;;  %v445_v58 = vpop.f32.mrb[9].mxu0  ;;  %v248_v50 = vrot.slane %v7162_v34, 7  ;;  %v263_v53 = vmul.f32 %v7173_v47, %v249_v36 }
  0xef   :  { %v380_v60 = vadd.f32 %v319_v57, %v254_v54  ;;  %v506_v61 = vrot.slane %v445_v58, 1  ;;  %v6060_v62 = vpop.f32.mrb[10].mxu1  ;;  %v6080_v63 = vpop.f32.mrb[10].mxu0 }
  0xf0   :  { %v522_v2 = vmul.f32 %v7177_v52, %v508_v56  ;;  %v383_v3 = vadd.f32 %v6060_v62, %v257_v59  ;;  %v509_v4 = vrot.slane %v6080_v63, 1  ;;  %v322_v5 = vpop.f32.mrb[11].mxu1  ;;  %v448_v6 = vpop.f32.mrb[11].mxu0  ;;  %v261_v56 = vmul.f32 %v7173_v47, %v247_v42 }
  0xf1   :  { %v520_v8 = vmul.f32 %v7177_v52, %v506_v61  ;;  %v381_v9 = vadd.f32 %v322_v5, %v255_v0  ;;  %v507_v10 = vrot.slane %v448_v6, 1  ;;  %v262_v0 = vmul.f32 %v7173_v47, %v248_v50 }
  0xf2   :  { %v7184_v11 = vadd.f32 %v522_v2, %v382_v55  ;;  %v523_v12 = vmul.f32 %v7177_v52, %v509_v4 }
  0xf3   :  { %v7187_v14 = vadd.f32 %v520_v8, %v380_v60  ;;  %v521_v15 = vmul.f32 %v7177_v52, %v507_v10  ;;  %v264_v60 = vmul.f32 %v7173_v47, %v250_v48 }
  0xf4   :  { %v7190_v16 = vadd.f32 %v523_v12, %v383_v3 }
  0xf5   :  { %v7193_v18 = vadd.f32 %v521_v15, %v381_v9  ;;  %v6063_v19 = vpop.f32.mrb[12].mxu1  ;;  %v6083_v20 = vpop.f32.mrb[12].mxu0  ;;  %v252_v15 = vrot.slane %v7171_v44, 7 }
  0xf6   :  { %v386_v22 = vadd.f32 %v6063_v19, %v260_v17  ;;  %v512_v23 = vrot.slane %v6083_v20, 1  ;;  %v335_v24 = vpop.f32.mrb[13].mxu1  ;;  %v461_v25 = vpop.f32.mrb[13].mxu0  ;;  %v267_v20 = vmul.f32 %v7173_v47, %v253_v1 }
  0xf7   :  { %v384_v26 = vadd.f32 %v335_v24, %v258_v21  ;;  %v510_v28 = vrot.slane %v461_v25, 1  ;;  %v6064_v30 = vpop.f32.mrb[14].mxu1  ;;  %v6084_v31 = vpop.f32.mrb[14].mxu0  ;;  %v266_v36 = vmul.f32 %v7173_v47, %v252_v15 }
  0xf8   :  { %v526_v38 = vmul.f32 %v7177_v52, %v512_v23  ;;  %v338_v40 = vpop.f32.mrb[15].mxu1  ;;  %v464_v41 = vpop.f32.mrb[15].mxu0  ;;  %v265_v23 = vmul.f32 %v7173_v47, %v251_v7 }
  0xf9   :  { %v524_v43 = vmul.f32 %v7177_v52, %v510_v28  ;;  %v385_v45 = vadd.f32 %v338_v40, %v259_v33  ;;  %v511_v46 = vrot.slane %v464_v41, 1 }
  0xfa   :  { %v7202_v49 = vadd.f32 %v526_v38, %v386_v22 }
  0xfb   :  { %v7205_v51 = vadd.f32 %v524_v43, %v384_v26  ;;  %v525_v27 = vmul.f32 %v7177_v52, %v511_v46 }
  0xfd   :  { %v7209_v54 = vadd.f32 %v525_v27, %v385_v45  ;;  %v6067_v55 = vpop.f32.mrb[16].mxu1  ;;  %v6087_v29 = vpop.f32.mrb[16].mxu0 }
  0xfe   :  { %v389_v57 = vadd.f32 %v6067_v55, %v263_v53  ;;  %v515_v58 = vrot.slane %v6087_v29, 1  ;;  %v350_v59 = vpop.f32.mrb[17].mxu1  ;;  %v476_v32 = vpop.f32.mrb[17].mxu0 }
  0xff   :  { %v387_v61 = vadd.f32 %v350_v59, %v261_v56  ;;  %v513_v34 = vrot.slane %v476_v32, 1  ;;  %v6068_v62 = vpop.f32.mrb[18].mxu1  ;;  %v6088_v63 = vpop.f32.mrb[18].mxu0 }
 0x100   :  { %v529_v2 = vmul.f32 %v7177_v52, %v515_v58  ;;  %v390_v3 = vadd.f32 %v6068_v62, %v264_v60  ;;  %v516_v4 = vrot.slane %v6088_v63, 1  ;;  %v353_v5 = vpop.f32.mrb[19].mxu1  ;;  %v479_v6 = vpop.f32.mrb[19].mxu0 }
 0x101   :  { %v527_v8 = vmul.f32 %v7177_v52, %v513_v34  ;;  %v388_v9 = vadd.f32 %v353_v5, %v262_v0  ;;  %v514_v10 = vrot.slane %v479_v6, 1 }
 0x102   :  { %v7218_v12 = vadd.f32 %v529_v2, %v389_v57  ;;  %v530_v13 = vmul.f32 %v7177_v52, %v516_v4 }
 0x103   :  { %v7222_v17 = vadd.f32 %v527_v8, %v387_v61  ;;  %v528_v37 = vmul.f32 %v7177_v52, %v514_v10 }
 0x104   :  { %v7225_v19 = vadd.f32 %v530_v13, %v390_v3 }
 0x105   :  { %v7228_v21 = vadd.f32 %v528_v37, %v388_v9  ;;  %v6071_v39 = vpop.f32.mrb[20].mxu1  ;;  %v6091_v22 = vpop.f32.mrb[20].mxu0 }
 0x106   :  { %v393_v24 = vadd.f32 %v6071_v39, %v267_v20  ;;  %v519_v25 = vrot.slane %v6091_v22, 1  ;;  %v366_v26 = vpop.f32.mrb[21].mxu1  ;;  %v492_v28 = vpop.f32.mrb[21].mxu0 }
 0x107   :  { %v391_v30 = vadd.f32 %v366_v26, %v265_v23  ;;  %v517_v44 = vrot.slane %v492_v28, 1  ;;  %v6072_v31 = vpop.f32.mrb[22].mxu1  ;;  %v6092_v33 = vpop.f32.mrb[22].mxu0 }
 0x108   :  { %v533_v38 = vmul.f32 %v7177_v52, %v519_v25  ;;  %v369_v40 = vpop.f32.mrb[23].mxu1  ;;  %v495_v41 = vpop.f32.mrb[23].mxu0 }
 0x109   :  { %v531_v42 = vmul.f32 %v7177_v52, %v517_v44  ;;  %v392_v43 = vadd.f32 %v369_v40, %v266_v36  ;;  %v518_v45 = vrot.slane %v495_v41, 1 }
 0x10a   :  { %v7234_v46 = vadd.f32 %v533_v38, %v393_v24 }
 0x10b   :  { %v7236_v48 = vadd.f32 %v531_v42, %v391_v30  ;;  %v532_v50 = vmul.f32 %v7177_v52, %v518_v45 }
 0x10d   :  { %v7239_v27 = vadd.f32 %v532_v50, %v392_v43  ;;  %v6099_v53 = vpop.f32.mrb[24].mxu1  ;;  %v6119_v55 = vpop.f32.mrb[24].mxu0 }
 0x10e   :  { %v664_v29 = vrot.slane %v6099_v53, 7  ;;  %v599_v56 = vpop.f32.mrb[25].mxu1  ;;  %v745_v57 = vpop.f32.mrb[25].mxu0 }
 0x10f   :  { %v662_v58 = vrot.slane %v599_v56, 7  ;;  %v6100_v59 = vpop.f32.mrb[26].mxu1  ;;  %v6120_v32 = vpop.f32.mrb[26].mxu0 }
 0x110   :  { %v680_v60 = vmul.f32 %v7173_v47, %v664_v29  ;;  %v665_v61 = vrot.slane %v6100_v59, 7  ;;  %v602_v34 = vpop.f32.mrb[27].mxu1  ;;  %v748_v62 = vpop.f32.mrb[27].mxu0 }
 0x111   :  { %v678_v63 = vmul.f32 %v7173_v47, %v662_v58  ;;  %v663_v0 = vrot.slane %v602_v34, 7 }
 0x112   :  { %v7243_v1 = vadd.f32 %v6119_v55, %v680_v60  ;;  %v681_v2 = vmul.f32 %v7173_v47, %v665_v61 }
 0x113   :  { %v7246_v3 = vadd.f32 %v745_v57, %v678_v63  ;;  %v679_v4 = vmul.f32 %v7173_v47, %v663_v0 }
 0x114   :  { %v7249_v5 = vadd.f32 %v6120_v32, %v681_v2 }
 0x115   :  { %v7251_v6 = vadd.f32 %v748_v62, %v679_v4  ;;  %v6103_v7 = vpop.f32.mrb[28].mxu1  ;;  %v6123_v8 = vpop.f32.mrb[28].mxu0 }
 0x116   :  { %v668_v9 = vrot.slane %v6103_v7, 7  ;;  %v615_v10 = vpop.f32.mrb[29].mxu1  ;;  %v761_v13 = vpop.f32.mrb[29].mxu0 }
 0x117   :  { %v666_v15 = vrot.slane %v615_v10, 7  ;;  %v6104_v37 = vpop.f32.mrb[30].mxu1  ;;  %v6124_v20 = vpop.f32.mrb[30].mxu0 }
 0x118   :  { %v684_v39 = vmul.f32 %v7173_v47, %v668_v9  ;;  %v669_v22 = vrot.slane %v6104_v37, 7  ;;  %v618_v23 = vpop.f32.mrb[31].mxu1  ;;  %v764_v24 = vpop.f32.mrb[31].mxu0 }
 0x119   :  { %v682_v25 = vmul.f32 %v7173_v47, %v666_v15  ;;  %v667_v26 = vrot.slane %v618_v23, 7 }
 0x11a   :  { %v7255_v28 = vadd.f32 %v6123_v8, %v684_v39  ;;  %v685_v30 = vmul.f32 %v7173_v47, %v669_v22 }
 0x11b   :  { %v7258_v44 = vadd.f32 %v761_v13, %v682_v25  ;;  %v683_v31 = vmul.f32 %v7173_v47, %v667_v26 }
 0x11c   :  { %v7261_v33 = vadd.f32 %v6124_v20, %v685_v30 }
 0x11d   :  { %v7263_v36 = vadd.f32 %v764_v24, %v683_v31  ;;  %v6107_v38 = vpop.f32.mrb[32].mxu1  ;;  %v6127_v40 = vpop.f32.mrb[32].mxu0 }
 0x11e   :  { %v672_v41 = vrot.slane %v6107_v38, 7  ;;  %v631_v42 = vpop.f32.mrb[33].mxu1  ;;  %v777_v43 = vpop.f32.mrb[33].mxu0 }
 0x11f   :  { %v670_v45 = vrot.slane %v631_v42, 7  ;;  %v6108_v50 = vpop.f32.mrb[34].mxu1  ;;  %v6128_v53 = vpop.f32.mrb[34].mxu0 }
 0x120   :  { %v688_v55 = vmul.f32 %v7173_v47, %v672_v41  ;;  %v673_v29 = vrot.slane %v6108_v50, 7  ;;  %v634_v56 = vpop.f32.mrb[35].mxu1  ;;  %v780_v57 = vpop.f32.mrb[35].mxu0 }
 0x121   :  { %v686_v58 = vmul.f32 %v7173_v47, %v670_v45  ;;  %v671_v59 = vrot.slane %v634_v56, 7 }
 0x122   :  { %v7267_v32 = vadd.f32 %v6127_v40, %v688_v55  ;;  %v689_v60 = vmul.f32 %v7173_v47, %v673_v29 }
 0x123   :  { %v7270_v61 = vadd.f32 %v777_v43, %v686_v58  ;;  %v687_v34 = vmul.f32 %v7173_v47, %v671_v59 }
 0x124   :  { %v7273_v62 = vadd.f32 %v6128_v53, %v689_v60 }
 0x125   :  { %v7275_v63 = vadd.f32 %v780_v57, %v687_v34  ;;  %v6111_v0 = vpop.f32.mrb[36].mxu1  ;;  %v6131_v2 = vpop.f32.mrb[36].mxu0 }
 0x126   :  { %v676_v4 = vrot.slane %v6111_v0, 7  ;;  %v647_v7 = vpop.f32.mrb[37].mxu1  ;;  %v793_v8 = vpop.f32.mrb[37].mxu0 }
 0x127   :  { %v674_v9 = vrot.slane %v647_v7, 7  ;;  %v6112_v10 = vpop.f32.mrb[38].mxu1  ;;  %v6132_v13 = vpop.f32.mrb[38].mxu0 }
 0x128   :  { %v692_v15 = vmul.f32 %v7173_v47, %v676_v4  ;;  %v677_v37 = vrot.slane %v6112_v10, 7  ;;  %v650_v20 = vpop.f32.mrb[39].mxu1  ;;  %v796_v39 = vpop.f32.mrb[39].mxu0 }
 0x129   :  { %v690_v22 = vmul.f32 %v7173_v47, %v674_v9  ;;  %v675_v23 = vrot.slane %v650_v20, 7 }
 0x12a   :  { %v7279_v24 = vadd.f32 %v6131_v2, %v692_v15  ;;  %v693_v25 = vmul.f32 %v7173_v47, %v677_v37 }
 0x12b   :  { %v7282_v26 = vadd.f32 %v793_v8, %v690_v22  ;;  %v691_v30 = vmul.f32 %v7173_v47, %v675_v23 }
 0x12c   :  { %v7285_v31 = vadd.f32 %v6132_v13, %v693_v25 }
 0x12d   :  { %v7287_v38 = vadd.f32 %v796_v39, %v691_v30  ;;  %v6139_v40 = vpop.f32.mrb[40].mxu1  ;;  %v7289_v41 = vpop.f32.mrb[40].mxu0  ;;  %v6749_v30 = vld [vmem:[%s9169_s4 + $0x40] sm:$0xff]  }
 0x12e   :  { %v940_v42 = vrot.slane %v6139_v40, 1  ;;  %v875_v43 = vpop.f32.mrb[41].mxu1  ;;  %v1037_v45 = vpop.f32.mrb[41].mxu0  ;;  %6245 = vmatprep.subr.bf16.mxu0 %v6749_v30 }
 0x12f   :  { %v938_v50 = vrot.slane %v875_v43, 1  ;;  %v6140_v53 = vpop.f32.mrb[42].mxu1  ;;  %v7291_v55 = vpop.f32.mrb[42].mxu0  ;;  %6246 = vmatpush3.bf16.msra.mxu0 %v6749_v30 }
 0x130   :  { %v956_v29 = vmul.f32 %v7177_v52, %v940_v42  ;;  %v941_v56 = vrot.slane %v6140_v53, 1  ;;  %v878_v57 = vpop.f32.mrb[43].mxu1  ;;  %v7294_v58 = vpop.f32.mrb[43].mxu0  ;;  %v6750_v53 = vld [vmem:[%s9169_s4 + $0x8] sm:$0xff]  }
 0x131   :  { %v954_v59 = vmul.f32 %v7177_v52, %v938_v50  ;;  %v939_v60 = vrot.slane %v878_v57, 1 }
 0x132   :  { %v972_v34 = vadd.f32 %v956_v29, %v7243_v1  ;;  %v957_v0 = vmul.f32 %v7177_v52, %v941_v56 }
 0x133   :  { %v7300_v2 = vadd.f32 %v954_v59, %v7246_v3  ;;  %v955_v4 = vmul.f32 %v7177_v52, %v939_v60 }
 0x134   :  { %v7304_v7 = vadd.f32 %v972_v34, %v7193_v18  ;;  %v973_v8 = vadd.f32 %v957_v0, %v7249_v5 }
 0x135   :  { %v971_v9 = vadd.f32 %v955_v4, %v7251_v6  ;;  %v6143_v10 = vpop.f32.mrb[44].mxu1  ;;  %v7308_v13 = vpop.f32.mrb[44].mxu0 }
 0x136   :  { %v7311_v15 = vadd.f32 %v973_v8, %v7184_v11  ;;  %v944_v1 = vrot.slane %v6143_v10, 1  ;;  %v891_v37 = vpop.f32.mrb[45].mxu1  ;;  %v7313_v20 = vpop.f32.mrb[45].mxu0  ;;  %v6748_v11 = vld [vmem:[%s9169_s4] sm:$0xff]  }
 0x137   :  { %v7316_v3 = vadd.f32 %v971_v9, %v7187_v14  ;;  %v942_v39 = vrot.slane %v891_v37, 1  ;;  %v6144_v18 = vpop.f32.mrb[46].mxu1  ;;  %v7318_v22 = vpop.f32.mrb[46].mxu0  ;;  %6213 = vmatprep.subr.bf16.mxu1 %v6748_v11 }
 0x138   :  { %v960_v5 = vmul.f32 %v7177_v52, %v944_v1  ;;  %v945_v6 = vrot.slane %v6144_v18, 1  ;;  %v894_v23 = vpop.f32.mrb[47].mxu1  ;;  %v7321_v25 = vpop.f32.mrb[47].mxu0  ;;  %6214 = vmatpush3.bf16.msra.mxu1 %v6748_v11  ;;  %v6755_v11 = vld [vmem:[%s9169_s4 + $0x58] sm:$0xff]  }
 0x139   :  { %v958_v14 = vmul.f32 %v7177_v52, %v942_v39  ;;  %v943_v40 = vrot.slane %v894_v23, 1  ;;  %6215 = vmatprep.subr.bf16.mxu1 %v6750_v53  ;;  %v6754_v23 = vld [vmem:[%s9169_s4 + $0x18] sm:$0xff]  }
 0x13a   :  { %v976_v42 = vadd.f32 %v960_v5, %v7255_v28  ;;  %v961_v43 = vmul.f32 %v7177_v52, %v945_v6  ;;  %v6751_v28 = vld [vmem:[%s9169_s4 + $0x48] sm:$0xff]  }
 0x13b   :  { %v974_v45 = vadd.f32 %v958_v14, %v7258_v44  ;;  %v959_v50 = vmul.f32 %v7177_v52, %v943_v40  ;;  %6247 = vmatprep.subr.bf16.mxu0 %v6751_v28 }
 0x13c   :  { %v7338_v29 = vadd.f32 %v976_v42, %v7209_v54  ;;  %v977_v56 = vadd.f32 %v961_v43, %v7261_v33  ;;  %v6752_v33 = vld [vmem:[%s9169_s4 + $0x10] sm:$0xff]   ;;  %6216 = vmatpush3.bf16.msra.mxu1 %v6750_v53  ;;  %6248 = vmatpush3.bf16.msra.mxu0 %v6751_v28 }
 0x13d   :  { %v7345_v57 = vadd.f32 %v974_v45, %v7190_v16  ;;  %v975_v44 = vadd.f32 %v959_v50, %v7263_v36  ;;  %v6147_v59 = vpop.f32.mrb[48].mxu1  ;;  %v7348_v60 = vpop.f32.mrb[48].mxu0  ;;  %v6753_v16 = vld [vmem:[%s9169_s4 + $0x50] sm:$0xff]   ;;  %6217 = vmatprep.subr.bf16.mxu1 %v6752_v33 }
 0x13e   :  { %v7351_v34 = vadd.f32 %v977_v56, %v7202_v49  ;;  %v948_v54 = vrot.slane %v6147_v59, 1  ;;  %v907_v0 = vpop.f32.mrb[49].mxu1  ;;  %v1068_v4 = vpop.f32.mrb[49].mxu0  ;;  %6249 = vmatprep.subr.bf16.mxu0 %v6753_v16 }
 0x13f   :  { %v7360_v36 = vadd.f32 %v975_v44, %v7205_v51  ;;  %v946_v8 = vrot.slane %v907_v0, 1  ;;  %v6148_v9 = vpop.f32.mrb[50].mxu1  ;;  %v7362_v10 = vpop.f32.mrb[50].mxu0 }
 0x140   :  { %v964_v49 = vmul.f32 %v7177_v52, %v948_v54  ;;  %v949_v1 = vrot.slane %v6148_v9, 1  ;;  %v910_v37 = vpop.f32.mrb[51].mxu1  ;;  %v7365_v39 = vpop.f32.mrb[51].mxu0  ;;  %6218 = vmatpush3.bf16.msra.mxu1 %v6752_v33  ;;  %6250 = vmatpush3.bf16.msra.mxu0 %v6753_v16  ;;  %v1098_v9 = vrot.slane %v7294_v58, 7 }
 0x141   :  { %v962_v18 = vmul.f32 %v7177_v52, %v946_v8  ;;  %v947_v5 = vrot.slane %v910_v37, 1  ;;  %6219 = vmatprep.subr.bf16.mxu1 %v6754_v23  ;;  %6251 = vmatprep.subr.bf16.mxu0 %v6755_v11  ;;  %v1100_v8 = vrot.slane %v7291_v55, 7  ;;  %v6759_v37 = vld [vmem:[%s9169_s4 + $0x68] sm:$0xff]  }
 0x142   :  { %v980_v51 = vadd.f32 %v964_v49, %v7267_v32  ;;  %v965_v6 = vmul.f32 %v7177_v52, %v949_v1 }
 0x143   :  { %v7377_v30 = vadd.f32 %v962_v18, %v7270_v61  ;;  %v963_v14 = vmul.f32 %v7177_v52, %v947_v5 }
 0x144   :  { %v7381_v40 = vadd.f32 %v980_v51, %v7228_v21  ;;  %v981_v32 = vadd.f32 %v965_v6, %v7273_v62  ;;  %v6756_v21 = vld [vmem:[%s9169_s4 + $0x20] sm:$0xff]   ;;  %6220 = vmatpush3.bf16.msra.mxu1 %v6754_v23  ;;  %6252 = vmatpush3.bf16.msra.mxu0 %v6755_v11 }
 0x145   :  { %v979_v42 = vadd.f32 %v963_v14, %v7275_v63  ;;  %v6151_v43 = vpop.f32.mrb[52].mxu1  ;;  %v7385_v45 = vpop.f32.mrb[52].mxu0  ;;  %v6757_v62 = vld [vmem:[%s9169_s4 + $0x60] sm:$0xff]   ;;  %6221 = vmatprep.subr.bf16.mxu1 %v6756_v21 }
 0x146   :  { %v7388_v50 = vadd.f32 %v981_v32, %v7218_v12  ;;  %v952_v61 = vrot.slane %v6151_v43, 1  ;;  %v923_v53 = vpop.f32.mrb[53].mxu1  ;;  %v7390_v56 = vpop.f32.mrb[53].mxu0  ;;  %v1099_v12 = vrot.slane %v7289_v41, 7  ;;  %6253 = vmatprep.subr.bf16.mxu0 %v6757_v62  ;;  %v6758_v41 = vld [vmem:[%s9169_s4 + $0x28] sm:$0xff]   ;;  %v6760_v43 = vld [vmem:[%s9169_s4 + $0x30] sm:$0xff]  }
 0x147   :  { %v7399_v63 = vadd.f32 %v979_v42, %v7222_v17  ;;  %v950_v28 = vrot.slane %v923_v53, 1  ;;  %v6152_v44 = vpop.f32.mrb[54].mxu1  ;;  %v7401_v59 = vpop.f32.mrb[54].mxu0  ;;  %v1112_v53 = vmul.f32 %v7173_v47, %v1098_v9 }
 0x148   :  { %v968_v54 = vmul.f32 %v7177_v52, %v952_v61  ;;  %v953_v0 = vrot.slane %v6152_v44, 1  ;;  %v926_v4 = vpop.f32.mrb[55].mxu1  ;;  %v7405_v33 = vpop.f32.mrb[55].mxu0  ;;  %6222 = vmatpush3.bf16.msra.mxu1 %v6756_v21  ;;  %6254 = vmatpush3.bf16.msra.mxu0 %v6757_v62  ;;  %v1113_v58 = vmul.f32 %v7173_v47, %v1099_v12  ;;  %v1103_v21 = vrot.slane %v7308_v13, 7  ;;  %v6762_v13 = vld [vmem:[%s9169_s4 + $0x38] sm:$0xff]  }
 0x149   :  { %v966_v16 = vmul.f32 %v7177_v52, %v950_v28  ;;  %v951_v17 = vrot.slane %v926_v4, 1  ;;  %6223 = vmatprep.subr.bf16.mxu1 %v6758_v41  ;;  %6255 = vmatprep.subr.bf16.mxu0 %v6759_v37 }
 0x14a   :  { %v984_v49 = vadd.f32 %v968_v54, %v7279_v24  ;;  %v969_v1 = vmul.f32 %v7177_v52, %v953_v0  ;;  %v1101_v0 = vrot.slane %v7313_v20, 7 }
 0x14b   :  { %v982_v18 = vadd.f32 %v966_v16, %v7282_v26  ;;  %v967_v5 = vmul.f32 %v7177_v52, %v951_v17  ;;  %v1104_v16 = vrot.slane %v7318_v22, 7  ;;  %v1102_v17 = vrot.slane %v7321_v25, 7 }
 0x14c   :  { %v7421_v55 = vadd.f32 %v984_v49, %v7239_v27  ;;  %v985_v24 = vadd.f32 %v969_v1, %v7285_v31  ;;  %v1114_v31 = vmul.f32 %v7173_v47, %v1100_v8  ;;  %6224 = vmatpush3.bf16.msra.mxu1 %v6758_v41  ;;  %6256 = vmatpush3.bf16.msra.mxu0 %v6759_v37  ;;  %v6763_v49 = vld [vmem:[%s9169_s4 + $0x78] sm:$0xff]  }
 0x14d   :  { %v7426_v51 = vadd.f32 %v982_v18, %v7225_v19  ;;  %v983_v6 = vadd.f32 %v967_v5, %v7287_v38  ;;  %v6179_v23 = vpop.f32.mrb[56].mxu1  ;;  %v6199_v26 = vpop.f32.mrb[56].mxu0  ;;  %v6761_v19 = vld [vmem:[%s9169_s4 + $0x70] sm:$0xff]   ;;  %6225 = vmatprep.subr.bf16.mxu1 %v6760_v43  ;;  %v1117_v25 = vmul.f32 %v7173_v47, %v1103_v21  ;;  %v1115_v5 = vmul.f32 %v7173_v47, %v1101_v0 }
 0x14e   :  { %v7430_v11 = vadd.f32 %v985_v24, %v7234_v46  ;;  %v1239_v14 = vadd.f32 %v6179_v23, %v1113_v58  ;;  %v1365_v32 = vrot.slane %v6199_v26, 1  ;;  %v1177_v27 = vpop.f32.mrb[57].mxu1  ;;  %v1303_v42 = vpop.f32.mrb[57].mxu0  ;;  %6257 = vmatprep.subr.bf16.mxu0 %v6761_v19  ;;  %v1107_v0 = vrot.slane %v7362_v10, 7 }
 0x14f   :  { %v7440_v38 = vadd.f32 %v983_v6, %v7236_v48  ;;  %v6180_v61 = vpop.f32.mrb[58].mxu1  ;;  %v6200_v46 = vpop.f32.mrb[58].mxu0 }
 0x150   :  { %v1379_v62 = vmul.f32 %v7177_v52, %v1365_v32  ;;  %v1240_v28 = vadd.f32 %v6180_v61, %v1114_v31  ;;  %v1366_v44 = vrot.slane %v6200_v46, 1  ;;  %v1179_v12 = vpop.f32.mrb[59].mxu1  ;;  %v1305_v54 = vpop.f32.mrb[59].mxu0  ;;  %6226 = vmatpush3.bf16.msra.mxu1 %v6760_v43  ;;  %6258 = vmatpush3.bf16.msra.mxu0 %v6761_v19  ;;  %v7473_v32 = vld [vmem:[%s9169_s4 + $0xc0] sm:$0xff]   ;;  %v1116_v19 = vmul.f32 %v7173_v47, %v1102_v17 }
 0x151   :  { %v1238_v48 = vadd.f32 %v1179_v12, %v1112_v53  ;;  %v1364_v4 = vrot.slane %v1305_v54, 1  ;;  %6227 = vmatprep.subr.bf16.mxu1 %v6762_v13  ;;  %6259 = vmatprep.subr.bf16.mxu0 %v6763_v49  ;;  %v1106_v61 = vrot.slane %v7348_v60, 7  ;;  %v1105_v60 = vrot.slane %v7365_v39, 7 }
 0x152   :  { %v1393_v8 = vadd.f32 %v1379_v62, %v1239_v14  ;;  %v1380_v9 = vmul.f32 %v7177_v52, %v1366_v44  ;;  %v7468_v14 = vld [vmem:[%s9169_s4 + $0x80] sm:$0xff]  }
 0x153   :  { %v1378_v1 = vmul.f32 %v7177_v52, %v1364_v4 }
 0x154   :  { %v7457_v20 = vadd.f32 %v7316_v3, %v1393_v8  ;;  %v1394_v22 = vadd.f32 %v1380_v9, %v1240_v28  ;;  %v1118_v3 = vmul.f32 %v7173_v47, %v1104_v16  ;;  %6228 = vmatpush3.bf16.msra.mxu1 %v6762_v13  ;;  %6260 = vmatpush3.bf16.msra.mxu0 %v6763_v49 }
 0x155   :  { %v1392_v41 = vadd.f32 %v1378_v1, %v1238_v48  ;;  %v6183_v37 = vpop.f32.mrb[60].mxu1  ;;  %v6203_v18 = vpop.f32.mrb[60].mxu0  ;;  %6277 = vmatprep.subr.bf16.mxu1 %v7468_v14  ;;  %6309 = vmatprep.subr.bf16.mxu0 %v7473_v32  ;;  %v1120_v13 = vmul.f32 %v7173_v47, %v1106_v61  ;;  %v1111_v61 = vrot.slane %v7401_v59, 7 }
 0x156   :  { %v7462_v24 = vadd.f32 %v7304_v7, %v1394_v22  ;;  %v1243_v58 = vadd.f32 %v6183_v37, %v1117_v25  ;;  %v1369_v6 = vrot.slane %v6203_v18, 1  ;;  %v1192_v23 = vpop.f32.mrb[61].mxu1  ;;  %v1318_v26 = vpop.f32.mrb[61].mxu0 }
 0x157   :  { %v7476_v27 = vadd.f32 %v1392_v41, %v7300_v2  ;;  %v1241_v7 = vadd.f32 %v1192_v23, %v1115_v5  ;;  %v1367_v42 = vrot.slane %v1318_v26, 1  ;;  %v6184_v31 = vpop.f32.mrb[62].mxu1  ;;  %v6204_v43 = vpop.f32.mrb[62].mxu0 }
 0x158   :  { %v1383_v46 = vmul.f32 %v7177_v52, %v1369_v6  ;;  %v1244_v53 = vadd.f32 %v6184_v31, %v1118_v3  ;;  %v1370_v21 = vrot.slane %v6204_v43, 1  ;;  %v1195_v62 = vpop.f32.mrb[63].mxu1  ;;  %v1321_v28 = vpop.f32.mrb[63].mxu0  ;;  %v1119_v3 = vmul.f32 %v7173_v47, %v1105_v60 }
 0x159   :  { %v1438_v2 = vadd.f32 %v7457_v20, %v7476_v27  ;;  %v1381_v44 = vmul.f32 %v7177_v52, %v1367_v42  ;;  %v1242_v12 = vadd.f32 %v1195_v62, %v1116_v19  ;;  %v1368_v54 = vrot.slane %v1321_v28, 1 }
 0x15a   :  { %v1397_v48 = vadd.f32 %v1383_v46, %v1243_v58  ;;  %v1384_v4 = vmul.f32 %v7177_v52, %v1370_v21  ;;  %v1110_v58 = vrot.slane %v7385_v45, 7 }
 0x15b   :  { %v1395_v16 = vadd.f32 %v1381_v44, %v1241_v7  ;;  %v1382_v17 = vmul.f32 %v7177_v52, %v1368_v54  ;;  %v1439_v1 = vadd.f32 %v1438_v2, %v7462_v24 }
 0x15c   :  { %v7491_v8 = vadd.f32 %v7360_v36, %v1397_v48  ;;  %v1398_v9 = vadd.f32 %v1384_v4, %v1244_v53  ;;  %v1121_v36 = vmul.f32 %v7173_v47, %v1107_v0  ;;  %v1125_v48 = vmul.f32 %v7173_v47, %v1111_v61 }
 0x15d   :  { %v7495_v49 = vadd.f32 %v7311_v15, %v1395_v16  ;;  %v1396_v10 = vadd.f32 %v1382_v17, %v1242_v12  ;;  %v6187_v22 = vpop.f32.mrb[64].mxu1  ;;  %v6207_v39 = vpop.f32.mrb[64].mxu0  ;;  %v1124_v12 = vmul.f32 %v7173_v47, %v1110_v58 }
 0x15e   :  { %v7499_v25 = vadd.f32 %v7338_v29, %v1398_v9  ;;  %v1246_v41 = vadd.f32 %v6187_v22, %v1120_v13  ;;  %v1372_v37 = vrot.slane %v6207_v39, 1  ;;  %v1208_v18 = vpop.f32.mrb[65].mxu1  ;;  %v1334_v5 = vpop.f32.mrb[65].mxu0  ;;  %v1108_v29 = vrot.slane %v7390_v56, 7 }
 0x15f   :  { %v1440_v6 = vadd.f32 %v1439_v1, %v7495_v49  ;;  %v7505_v15 = vadd.f32 %v7345_v57, %v1396_v10  ;;  %v6188_v23 = vpop.f32.mrb[66].mxu1  ;;  %v6208_v26 = vpop.f32.mrb[66].mxu0  ;;  %v1109_v57 = vrot.slane %v7405_v33, 7 }
 0x160   :  { %v1386_v7 = vmul.f32 %v7177_v52, %v1372_v37  ;;  %v1247_v42 = vadd.f32 %v6188_v23, %v1121_v36  ;;  %v1373_v31 = vrot.slane %v6208_v26, 1  ;;  %v1210_v43 = vpop.f32.mrb[67].mxu1  ;;  %v1336_v19 = vpop.f32.mrb[67].mxu0  ;;  %v1122_v33 = vmul.f32 %v7173_v47, %v1108_v29 }
 0x161   :  { %v1441_v45 = vadd.f32 %v1440_v6, %v7505_v15  ;;  %v1245_v46 = vadd.f32 %v1210_v43, %v1119_v3  ;;  %v1371_v53 = vrot.slane %v1336_v19, 1  ;;  %v1123_v13 = vmul.f32 %v7173_v47, %v1109_v57 }
 0x162   :  { %v1400_v21 = vadd.f32 %v1386_v7, %v1246_v41  ;;  %v1387_v62 = vmul.f32 %v7177_v52, %v1373_v31 }
 0x163   :  { %v1442_v28 = vadd.f32 %v1441_v45, %v7491_v8  ;;  %v1385_v56 = vmul.f32 %v7177_v52, %v1371_v53 }
 0x164   :  { %v7517_v2 = vadd.f32 %v7399_v63, %v1400_v21  ;;  %v1401_v44 = vadd.f32 %v1387_v62, %v1247_v42 }
 0x165   :  { %v1399_v59 = vadd.f32 %v1385_v56, %v1245_v46  ;;  %v1443_v54 = vadd.f32 %v1442_v28, %v7499_v25  ;;  %v6191_v0 = vpop.f32.mrb[68].mxu1  ;;  %v6211_v60 = vpop.f32.mrb[68].mxu0 }
 0x166   :  { %v7524_v4 = vadd.f32 %v7381_v40, %v1401_v44  ;;  %v1250_v16 = vadd.f32 %v6191_v0, %v1124_v12  ;;  %v1376_v17 = vrot.slane %v6211_v60, 1  ;;  %v1223_v9 = vpop.f32.mrb[69].mxu1  ;;  %v1349_v63 = vpop.f32.mrb[69].mxu0 }
 0x167   :  { %v7528_v1 = vadd.f32 %v1399_v59, %v7377_v30  ;;  %v1444_v10 = vadd.f32 %v1443_v54, %v7351_v34  ;;  %v1248_v22 = vadd.f32 %v1223_v9, %v1122_v33  ;;  %v1374_v39 = vrot.slane %v1349_v63, 1  ;;  %v6192_v41 = vpop.f32.mrb[70].mxu1  ;;  %v6212_v37 = vpop.f32.mrb[70].mxu0 }
 0x168   :  { %v1390_v18 = vmul.f32 %v7177_v52, %v1376_v17  ;;  %v1251_v5 = vadd.f32 %v6192_v41, %v1125_v48  ;;  %v1377_v40 = vrot.slane %v6212_v37, 1  ;;  %v1226_v36 = vpop.f32.mrb[71].mxu1  ;;  %v1352_v58 = vpop.f32.mrb[71].mxu0 }
 0x169   :  { %v1445_v6 = vadd.f32 %v1444_v10, %v7528_v1  ;;  %v1388_v23 = vmul.f32 %v7177_v52, %v1374_v39  ;;  %v1249_v26 = vadd.f32 %v1226_v36, %v1123_v13  ;;  %v1375_v3 = vrot.slane %v1352_v58, 1 }
 0x16a   :  { %v1404_v30 = vadd.f32 %v1390_v18, %v1250_v16  ;;  %v1391_v29 = vmul.f32 %v7177_v52, %v1377_v40 }
 0x16b   :  { %v1446_v7 = vadd.f32 %v1445_v6, %v7517_v2  ;;  %v1402_v42 = vadd.f32 %v1388_v23, %v1248_v22  ;;  %v1389_v31 = vmul.f32 %v7177_v52, %v1375_v3 }
 0x16c   :  { %v7538_v43 = vadd.f32 %v7440_v38, %v1404_v30  ;;  %v1405_v19 = vadd.f32 %v1391_v29, %v1251_v5 }
 0x16d   :  { %v7541_v61 = vadd.f32 %v7388_v50, %v1402_v42  ;;  %v1447_v45 = vadd.f32 %v1446_v7, %v7524_v4  ;;  %v1403_v46 = vadd.f32 %v1389_v31, %v1249_v26 }
 0x16e   :  { %v7545_v53 = vadd.f32 %v7421_v55, %v1405_v19 }
 0x16f   :  { %v1448_v57 = vadd.f32 %v1447_v45, %v7541_v61  ;;  %v7549_v21 = vadd.f32 %v7426_v51, %v1403_v46 }
 0x171   :  { %v1449_v62 = vadd.f32 %v1448_v57, %v7549_v21 }
 0x173   :  { %v1450_v38 = vadd.f32 %v1449_v62, %v7538_v43 }
 0x175   :  { %v1451_v28 = vadd.f32 %v1450_v38, %v7545_v53 }
 0x177   :  { %v1452_v50 = vadd.f32 %v1451_v28, %v7430_v11 }
 0x179   :  { %v1453_v56 = vrot.slane %v1452_v50, 4 }
 0x17b   :  { %v1454_v44 = vadd.f32 %v1453_v56, %v1452_v50 }
 0x17d   :  { %v1455_v12 = vrot.slane %v1454_v44, 2 }
 0x17f   :  { %v1456_v59 = vadd.f32 %v1455_v12, %v1454_v44 }
 0x181   :  { %v1457_v54 = vrot.slane %v1456_v59, 1 }
 0x183   :  { %v1458_v55 = vadd.f32 %v1457_v54, %v1456_v59 }
 0x185   :  { %v7555_v0 = vmul.f32 0.0078125, %v1458_v55 }
 0x187   :  { %v1460_v51 = vsub.f32 %v7476_v27, %v7555_v0  ;;  %v1461_v60 = vsub.f32 %v7457_v20, %v7555_v0  ;;  %v1462_v33 = vsub.f32 %v7462_v24, %v7555_v0  ;;  %v1463_v17 = vsub.f32 %v7495_v49, %v7555_v0 }
 0x188   :  { %v1464_v9 = vsub.f32 %v7505_v15, %v7555_v0  ;;  %v1465_v10 = vsub.f32 %v7491_v8, %v7555_v0  ;;  %v1466_v41 = vsub.f32 %v7499_v25, %v7555_v0  ;;  %v1467_v5 = vsub.f32 %v7351_v34, %v7555_v0 }
 0x189   :  { %v1476_v48 = vmul.f32 %v1460_v51, %v1460_v51  ;;  %v1477_v16 = vmul.f32 %v1461_v60, %v1461_v60  ;;  %v1478_v63 = vmul.f32 %v1462_v33, %v1462_v33  ;;  %v1479_v22 = vmul.f32 %v1463_v17, %v1463_v17 }
 0x18a   :  { %v1480_v37 = vmul.f32 %v1464_v9, %v1464_v9  ;;  %v1481_v40 = vmul.f32 %v1465_v10, %v1465_v10  ;;  %v1468_v58 = vsub.f32 %v7528_v1, %v7555_v0  ;;  %v1482_v6 = vmul.f32 %v1466_v41, %v1466_v41 }
 0x18b   :  { %v1492_v13 = vadd.f32 %v1477_v16, %v1476_v48  ;;  %v1469_v26 = vsub.f32 %v7517_v2, %v7555_v0  ;;  %v1483_v3 = vmul.f32 %v1467_v5, %v1467_v5  ;;  %v1470_v29 = vsub.f32 %v7524_v4, %v7555_v0 }
 0x18c   :  { %v1484_v7 = vmul.f32 %v1468_v58, %v1468_v58  ;;  %v1471_v31 = vsub.f32 %v7541_v61, %v7555_v0  ;;  %v1472_v46 = vsub.f32 %v7549_v21, %v7555_v0  ;;  %v1473_v38 = vsub.f32 %v7538_v43, %v7555_v0 }
 0x18d   :  { %v1493_v39 = vadd.f32 %v1492_v13, %v1478_v63  ;;  %v1485_v19 = vmul.f32 %v1469_v26, %v1469_v26  ;;  %v1486_v57 = vmul.f32 %v1470_v29, %v1470_v29  ;;  %v1474_v56 = vsub.f32 %v7545_v53, %v7555_v0 }
 0x18e   :  { %v1487_v28 = vmul.f32 %v1471_v31, %v1471_v31  ;;  %v1488_v44 = vmul.f32 %v1472_v46, %v1472_v46  ;;  %v1475_v59 = vsub.f32 %v7430_v11, %v7555_v0  ;;  %v1489_v54 = vmul.f32 %v1473_v38, %v1473_v38 }
 0x18f   :  { %v1494_v18 = vadd.f32 %v1493_v39, %v1479_v22  ;;  %v1490_v51 = vmul.f32 %v1474_v56, %v1474_v56 }
 0x190   :  { %v1491_v33 = vmul.f32 %v1475_v59, %v1475_v59  ;;  %v6766_v59 = vld [vmem:[%s9169_s4 + $0x88] sm:$0xff]  }
 0x191   :  { %v1495_v36 = vadd.f32 %v1494_v18, %v1480_v37  ;;  %v1514_v37 = vld [vmem:[%s9170_s2] sm:$0x1]  ;;  %v7593_v18 = vsub.s32 0, %v7164_v35 }
 0x193   :  { %v1496_v23 = vadd.f32 %v1495_v36, %v1481_v40  ;;  %v1518_v36 = vld [vmem:[%s9171_s3] sm:$0x1] }
 0x195   :  { %v1497_v30 = vadd.f32 %v1496_v23, %v1482_v6 }
 0x197   :  { %v1498_v42 = vadd.f32 %v1497_v30, %v1483_v3 }
 0x199   :  { %v1499_v45 = vadd.f32 %v1498_v42, %v1484_v7 }
 0x19b   :  { %v1500_v62 = vadd.f32 %v1499_v45, %v1485_v19 }
 0x19d   :  { %v1501_v50 = vadd.f32 %v1500_v62, %v1486_v57 }
 0x19f   :  { %v1502_v12 = vadd.f32 %v1501_v50, %v1487_v28 }
 0x1a1   :  { %v1503_v55 = vadd.f32 %v1502_v12, %v1488_v44 }
 0x1a3   :  { %v1504_v60 = vadd.f32 %v1503_v55, %v1489_v54 }
 0x1a5   :  { %v1505_v48 = vadd.f32 %v1504_v60, %v1490_v51  ;;  %v6768_v60 = vld [vmem:[%s9169_s4 + $0x90] sm:$0xff]  }
 0x1a7   :  { %v1506_v16 = vadd.f32 %v1505_v48, %v1491_v33  ;;  %v6769_v33 = vld [vmem:[%s9169_s4 + $0xd0] sm:$0xff]  }
 0x1a9   :  { %v1507_v17 = vrot.slane %v1506_v16, 4 }
 0x1ab   :  { %v1508_v9 = vadd.f32 %v1507_v17, %v1506_v16 }
 0x1ad   :  { %v1509_v63 = vrot.slane %v1508_v9, 2 }
 0x1af   :  { %v1510_v13 = vadd.f32 %v1509_v63, %v1508_v9 }
 0x1b1   :  { %v1511_v10 = vrot.slane %v1510_v13, 1 }
 0x1b3   :  { %v1512_v22 = vadd.f32 %v1511_v10, %v1510_v13 }
 0x1b5   :  { %v1513_v39 = vmul.f32 0.0078125, %v1512_v22 }
 0x1b7   :  { %v1515_v41 = vadd.f32 1e-05, %v1513_v39 }
 0x1b9   :  { %6856 = vrsqrt.f32 %v1515_v41 }
 0x1c3   :  { %v6857_v5 = vpop.eup %6856 }
 0x1c4   :  { %v1517_v40 = vmul.f32 %v6857_v5, %v1514_v37 }
 0x1c6   :  { %v1519_v58 = vmul.f32 %v1517_v40, %v7555_v0  ;;  %v7600_v6 = vrot.slane %v1517_v40, %v7593_v18  ;;  %v6772_v40 = vld [vmem:[%s9169_s4 + $0xa0] sm:$0xff]  }
 0x1c8   :  { %v1520_v23 = vsub.f32 %v1518_v36, %v1519_v58  ;;  %v1527_v3 = vmul.f32 %v7600_v6, %v7476_v27  ;;  %v1528_v35 = vmul.f32 %v7600_v6, %v7457_v20  ;;  %v1529_v30 = vmul.f32 %v7600_v6, %v7462_v24  ;;  %v6773_v36 = vld [vmem:[%s9169_s4 + $0xe0] sm:$0xff]  }
 0x1c9   :  { %v1530_v29 = vmul.f32 %v7600_v6, %v7495_v49  ;;  %v1531_v0 = vmul.f32 %v7600_v6, %v7505_v15  ;;  %v1532_v7 = vmul.f32 %v7600_v6, %v7491_v8  ;;  %v1533_v15 = vmul.f32 %v7600_v6, %v7499_v25 }
 0x1ca   :  { %v7603_v26 = vrot.slane %v1520_v23, %v7593_v18  ;;  %v1534_v8 = vmul.f32 %v7600_v6, %v7351_v34  ;;  %v1535_v50 = vmul.f32 %v7600_v6, %v7528_v1  ;;  %v1536_v56 = vmul.f32 %v7600_v6, %v7517_v2  ;;  %v6767_v2 = vld [vmem:[%s9169_s4 + $0xc8] sm:$0xff]  }
 0x1cb   :  { %v1537_v17 = vmul.f32 %v7600_v6, %v7524_v4  ;;  %v1540_v9 = vmul.f32 %v7600_v6, %v7538_v43  ;;  %v6770_v43 = vld [vmem:[%s9169_s4 + $0x98] sm:$0xff]   ;;  %v1541_v58 = vmul.f32 %v7600_v6, %v7545_v53  ;;  %v1542_v23 = vmul.f32 %v7600_v6, %v7430_v11  ;;  %v6775_v11 = vld [vmem:[%s9169_s4 + $0xe8] sm:$0xff]  }
 0x1cc   :  { %v1549_v42 = vadd.f32 %v7603_v26, %v1527_v3  ;;  %v1550_v31 = vadd.f32 %v7603_v26, %v1528_v35  ;;  %v1551_v27 = vadd.f32 %v7603_v26, %v1529_v30  ;;  %v1552_v20 = vadd.f32 %v7603_v26, %v1530_v29 }
 0x1cd   :  { %v1553_v19 = vadd.f32 %v7603_v26, %v1531_v0  ;;  %v1554_v24 = vadd.f32 %v7603_v26, %v1532_v7  ;;  %v1555_v12 = vadd.f32 %v7603_v26, %v1533_v15  ;;  %v1556_v25 = vadd.f32 %v7603_v26, %v1534_v8  ;;  %v6774_v0 = vld [vmem:[%s9169_s4 + $0xa8] sm:$0xff]   ;;  %v6777_v7 = vld [vmem:[%s9169_s4 + $0xf0] sm:$0xff]   ;;  %v6786_v8 = vld [vmem:[%s9169_s4 + $0x118] sm:$0xff]  }
 0x1ce   :  { %v1565_v45 = vmax.f32 %v1549_v42, 0.0  ;;  %v1566_v49 = vmax.f32 %v1550_v31, 0.0  ;;  %v1567_v46 = vmax.f32 %v1551_v27, 0.0  ;;  %v1568_v57 = vmax.f32 %v1552_v20, 0.0  ;;  %v6778_v31 = vld [vmem:[%s9169_s4 + $0xb8] sm:$0xff]   ;;  %v6780_v20 = vld [vmem:[%s9169_s4 + $0x100] sm:$0xff]  }
 0x1cf   :  { %v1569_v62 = vmax.f32 %v1553_v19, 0.0  ;;  %v1570_v38 = vmax.f32 %v1554_v24, 0.0  ;;  %v1557_v1 = vadd.f32 %v7603_v26, %v1535_v50  ;;  %v1558_v54 = vadd.f32 %v7603_v26, %v1536_v56  ;;  %v6779_v27 = vld [vmem:[%s9169_s4 + $0xf8] sm:$0xff]   ;;  %v6781_v19 = vld [vmem:[%s9169_s4 + $0x140] sm:$0xff]   ;;  %v6782_v24 = vld [vmem:[%s9169_s4 + $0x108] sm:$0xff]  }
 0x1d0   :  { %v7627_v28 = vpack.c.bf16 %v1566_v49, %v1565_v45  ;;  %v7633_v44 = vpack.c.bf16 %v1568_v57, %v1567_v46  ;;  %v1571_v55 = vmax.f32 %v1555_v12, 0.0  ;;  %v1572_v51 = vmax.f32 %v1556_v25, 0.0  ;;  %v6783_v45 = vld [vmem:[%s9169_s4 + $0x148] sm:$0xff]   ;;  %v6784_v49 = vld [vmem:[%s9169_s4 + $0x110] sm:$0xff]   ;;  %v6787_v46 = vld [vmem:[%s9169_s4 + $0x158] sm:$0xff]  }
 0x1d1   :  { %v7639_v34 = vpack.c.bf16 %v1570_v38, %v1569_v62  ;;  %v1573_v48 = vmax.f32 %v1557_v1, 0.0  ;;  %v1574_v16 = vmax.f32 %v1558_v54, 0.0  ;;  %v1559_v13 = vadd.f32 %v7603_v26, %v1537_v17  ;;  %v6785_v15 = vld [vmem:[%s9169_s4 + $0x150] sm:$0xff]   ;;  %v6788_v57 = vld [vmem:[%s9169_s4 + $0x120] sm:$0xff]   ;;  %v6790_v38 = vld [vmem:[%s9169_s4 + $0x128] sm:$0xff]  }
 0x1d2   :  { %6229 = vmatprep.mubr.bf16.mxu1 %v7627_v28  ;;  %6261 = vmatprep.mubr.bf16.mxu0 %v7627_v28  ;;  %v7669_v63 = vpack.c.bf16 %v1572_v51, %v1571_v55  ;;  %v1562_v4 = vadd.f32 %v7603_v26, %v1540_v9  ;;  %v1563_v35 = vadd.f32 %v7603_v26, %v1541_v58  ;;  %v6789_v62 = vld [vmem:[%s9169_s4 + $0x160] sm:$0xff]   ;;  %v6791_v50 = vld [vmem:[%s9169_s4 + $0x168] sm:$0xff]   ;;  %v6792_v56 = vld [vmem:[%s9169_s4 + $0x130] sm:$0xff]  }
 0x1d3   :  { %6230 = vmatmul.mubr.bf16.vlgmr.msra.gmra.mrb[72].mxu1 %v7633_v44  ;;  %6262 = vmatmul.mubr.bf16.vlgmr.msra.gmra.mrb[72].mxu0 %v7633_v44  ;;  %v1575_v39 = vmax.f32 %v1559_v13, 0.0  ;;  %v1564_v30 = vadd.f32 %v7603_v26, %v1542_v23  ;;  %v6793_v12 = vld [vmem:[%s9169_s4 + $0x170] sm:$0xff]   ;;  %v6794_v25 = vld [vmem:[%s9169_s4 + $0x138] sm:$0xff]   ;;  %v6797_v1 = vld [vmem:[%s9169_s4 + $0x1c0] sm:$0xff]  }
 0x1d4   :  { %6233 = vmatprep.mubr.bf16.mxu1 %v7639_v34  ;;  %6265 = vmatprep.mubr.bf16.mxu0 %v7639_v34  ;;  %v1578_v5 = vmax.f32 %v1562_v4, 0.0  ;;  %v1579_v53 = vmax.f32 %v1563_v35, 0.0  ;;  %v6798_v54 = vld [vmem:[%s9169_s4 + $0x188] sm:$0xff]   ;;  %v6800_v51 = vld [vmem:[%s9169_s4 + $0x190] sm:$0xff]   ;;  %v6805_v17 = vld [vmem:[%s9169_s4 + $0x1e0] sm:$0xff]  }
 0x1d5   :  { %6278 = vmatpush3.bf16.msra.mxu1 %v7468_v14  ;;  %6310 = vmatpush3.bf16.msra.mxu0 %v7473_v32  ;;  %v1538_v14 = vmul.f32 %v7600_v6, %v7541_v61  ;;  %v1539_v32 = vmul.f32 %v7600_v6, %v7549_v21  ;;  %v7675_v61 = vpack.c.bf16 %v1574_v16, %v1573_v48  ;;  %v6771_v21 = vld [vmem:[%s9169_s4 + $0xd8] sm:$0xff]   ;;  %v1580_v6 = vmax.f32 %v1564_v30, 0.0  ;;  %v6799_v55 = vld [vmem:[%s9169_s4 + $0x1c8] sm:$0xff]   ;;  %v6804_v16 = vld [vmem:[%s9169_s4 + $0x1a0] sm:$0xff]  }
 0x1d6   :  { %6279 = vmatprep.subr.bf16.mxu1 %v6766_v59  ;;  %6311 = vmatprep.subr.bf16.mxu0 %v6767_v2  ;;  %v6803_v48 = vld [vmem:[%s9169_s4 + $0x1d8] sm:$0xff]   ;;  %v6808_v9 = vld [vmem:[%s9169_s4 + $0x1b0] sm:$0xff]   ;;  %v6812_v4 = vld [vmem:[%s9169_s4 + $0x200] sm:$0xff]  }
 0x1d7   :  { %v1560_v10 = vadd.f32 %v7603_v26, %v1538_v14  ;;  %v1561_v22 = vadd.f32 %v7603_v26, %v1539_v32  ;;  %v6776_v26 = vld [vmem:[%s9169_s4 + $0xb0] sm:$0xff]   ;;  %v7719_v42 = vpack.c.bf16 %v1580_v6, %v1579_v53  ;;  %v6806_v14 = vld [vmem:[%s9169_s4 + $0x1a8] sm:$0xff]  }
 0x1d8   :  { %v6807_v32 = vld [vmem:[%s9169_s4 + $0x1e8] sm:$0xff]   ;;  %v6809_v13 = vld [vmem:[%s9169_s4 + $0x1f0] sm:$0xff]  }
 0x1d9   :  { %6280 = vmatpush3.bf16.msra.mxu1 %v6766_v59  ;;  %6312 = vmatpush3.bf16.msra.mxu0 %v6767_v2  ;;  %v1576_v41 = vmax.f32 %v1560_v10, 0.0  ;;  %v1577_v37 = vmax.f32 %v1561_v22, 0.0  ;;  %v6795_v59 = vld [vmem:[%s9169_s4 + $0x178] sm:$0xff]   ;;  %v6796_v2 = vld [vmem:[%s9169_s4 + $0x180] sm:$0xff]  }
 0x1da   :  { %6281 = vmatprep.subr.bf16.mxu1 %v6768_v60  ;;  %6313 = vmatprep.subr.bf16.mxu0 %v6769_v33  ;;  %v6810_v10 = vld [vmem:[%s9169_s4 + $0x1b8] sm:$0xff]  }
 0x1db   :  { %6234 = vmatmul.mubr.bf16.gmra.mrb[76].mxu1 %v7669_v63  ;;  %6266 = vmatmul.mubr.bf16.gmra.mrb[76].mxu0 %v7669_v63  ;;  %v7697_v3 = vpack.c.bf16 %v1576_v41, %v1575_v39  ;;  %v7701_v29 = vpack.c.bf16 %v1578_v5, %v1577_v37  ;;  %v6811_v22 = vld [vmem:[%s9169_s4 + $0x1f8] sm:$0xff]   ;;  %v6816_v41 = vld [vmem:[%s9169_s4 + $0x220] sm:$0xff]   ;;  %v6817_v37 = vld [vmem:[%s9169_s4 + $0x228] sm:$0xff]  }
 0x1dc   :  { %6237 = vmatprep.mubr.bf16.mxu1 %v7675_v61  ;;  %6269 = vmatprep.mubr.bf16.mxu0 %v7675_v61  ;;  %v6815_v39 = vld [vmem:[%s9169_s4 + $0x218] sm:$0xff]   ;;  %v6818_v5 = vld [vmem:[%s9169_s4 + $0x230] sm:$0xff]  }
 0x1dd   :  { %6282 = vmatpush3.bf16.msra.mxu1 %v6768_v60  ;;  %6314 = vmatpush3.bf16.msra.mxu0 %v6769_v33  ;;  %v6801_v60 = vld [vmem:[%s9169_s4 + $0x1d0] sm:$0xff]   ;;  %v6802_v33 = vld [vmem:[%s9169_s4 + $0x198] sm:$0xff]  }
 0x1de   :  { %6283 = vmatprep.subr.bf16.mxu1 %v6770_v43  ;;  %6315 = vmatprep.subr.bf16.mxu0 %v6771_v21 }
 0x1e1   :  { %6284 = vmatpush3.bf16.msra.mxu1 %v6770_v43  ;;  %6316 = vmatpush3.bf16.msra.mxu0 %v6771_v21  ;;  %v6813_v43 = vld [vmem:[%s9169_s4 + $0x208] sm:$0xff]   ;;  %v6814_v21 = vld [vmem:[%s9169_s4 + $0x210] sm:$0xff]  }
 0x1e2   :  { %6285 = vmatprep.subr.bf16.mxu1 %v6772_v40  ;;  %6317 = vmatprep.subr.bf16.mxu0 %v6773_v36 }
 0x1e3   :  { %6238 = vmatmul.mubr.bf16.gmra.mrb[80].mxu1 %v7697_v3  ;;  %6270 = vmatmul.mubr.bf16.gmra.mrb[80].mxu0 %v7697_v3 }
 0x1e4   :  { %6241 = vmatprep.mubr.bf16.mxu1 %v7701_v29  ;;  %6273 = vmatprep.mubr.bf16.mxu0 %v7701_v29 }
 0x1e5   :  { %6286 = vmatpush3.bf16.msra.mxu1 %v6772_v40  ;;  %6318 = vmatpush3.bf16.msra.mxu0 %v6773_v36  ;;  %v6819_v40 = vld [vmem:[%s9169_s4 + $0x238] sm:$0xff]  }
 0x1e6   :  { %6287 = vmatprep.subr.bf16.mxu1 %v6774_v0  ;;  %6319 = vmatprep.subr.bf16.mxu0 %v6775_v11 }
 0x1e9   :  { %6288 = vmatpush3.bf16.msra.mxu1 %v6774_v0  ;;  %6320 = vmatpush3.bf16.msra.mxu0 %v6775_v11 }
 0x1ea   :  { %6289 = vmatprep.subr.bf16.mxu1 %v6776_v26  ;;  %6321 = vmatprep.subr.bf16.mxu0 %v6777_v7 }
 0x1eb   :  { %6242 = vmatmul.mubr.bf16.gmra.mrb[84].mxu1 %v7719_v42  ;;  %6274 = vmatmul.mubr.bf16.gmra.mrb[84].mxu0 %v7719_v42 }
 0x1ec   :  { %6293 = vmatprep.mubr.bf16.mxu1 %v7627_v28  ;;  %6325 = vmatprep.mubr.bf16.mxu0 %v7627_v28 }
 0x1ed   :  { %6290 = vmatpush3.bf16.msra.mxu1 %v6776_v26  ;;  %6322 = vmatpush3.bf16.msra.mxu0 %v6777_v7 }
 0x1ee   :  { %6291 = vmatprep.subr.bf16.mxu1 %v6778_v31  ;;  %6323 = vmatprep.subr.bf16.mxu0 %v6779_v27 }
 0x1f1   :  { %6292 = vmatpush3.bf16.msra.mxu1 %v6778_v31  ;;  %6324 = vmatpush3.bf16.msra.mxu0 %v6779_v27 }
 0x1f2   :  { %6341 = vmatprep.subr.bf16.mxu1 %v6780_v20  ;;  %6373 = vmatprep.subr.bf16.mxu0 %v6781_v19 }
 0x1f4   :  { %6294 = vmatmul.mubr.bf16.vlgmr.msra.gmra.mrb[88].mxu1 %v7633_v44  ;;  %6326 = vmatmul.mubr.bf16.vlgmr.msra.gmra.mrb[88].mxu0 %v7633_v44 }
 0x1f5   :  { %6297 = vmatprep.mubr.bf16.mxu1 %v7639_v34  ;;  %6329 = vmatprep.mubr.bf16.mxu0 %v7639_v34 }
 0x1f6   :  { %6342 = vmatpush3.bf16.msra.mxu1 %v6780_v20  ;;  %6374 = vmatpush3.bf16.msra.mxu0 %v6781_v19 }
 0x1f7   :  { %6343 = vmatprep.subr.bf16.mxu1 %v6782_v24  ;;  %6375 = vmatprep.subr.bf16.mxu0 %v6783_v45 }
 0x1fa   :  { %6344 = vmatpush3.bf16.msra.mxu1 %v6782_v24  ;;  %6376 = vmatpush3.bf16.msra.mxu0 %v6783_v45 }
 0x1fb   :  { %6345 = vmatprep.subr.bf16.mxu1 %v6784_v49  ;;  %6377 = vmatprep.subr.bf16.mxu0 %v6785_v15 }
 0x1fc   :  { %6298 = vmatmul.mubr.bf16.gmra.mrb[92].mxu1 %v7669_v63  ;;  %6330 = vmatmul.mubr.bf16.gmra.mrb[92].mxu0 %v7669_v63 }
 0x1fd   :  { %6301 = vmatprep.mubr.bf16.mxu1 %v7675_v61  ;;  %6333 = vmatprep.mubr.bf16.mxu0 %v7675_v61 }
 0x1fe   :  { %6346 = vmatpush3.bf16.msra.mxu1 %v6784_v49  ;;  %6378 = vmatpush3.bf16.msra.mxu0 %v6785_v15 }
 0x1ff   :  { %6347 = vmatprep.subr.bf16.mxu1 %v6786_v8  ;;  %6379 = vmatprep.subr.bf16.mxu0 %v6787_v46 }
 0x202   :  { %6348 = vmatpush3.bf16.msra.mxu1 %v6786_v8  ;;  %6380 = vmatpush3.bf16.msra.mxu0 %v6787_v46 }
 0x203   :  { %6349 = vmatprep.subr.bf16.mxu1 %v6788_v57  ;;  %6381 = vmatprep.subr.bf16.mxu0 %v6789_v62 }
 0x204   :  { %6302 = vmatmul.mubr.bf16.gmra.mrb[96].mxu1 %v7697_v3  ;;  %6334 = vmatmul.mubr.bf16.gmra.mrb[96].mxu0 %v7697_v3 }
 0x205   :  { %6305 = vmatprep.mubr.bf16.mxu1 %v7701_v29  ;;  %6337 = vmatprep.mubr.bf16.mxu0 %v7701_v29 }
 0x206   :  { %6350 = vmatpush3.bf16.msra.mxu1 %v6788_v57  ;;  %6382 = vmatpush3.bf16.msra.mxu0 %v6789_v62 }
 0x207   :  { %6351 = vmatprep.subr.bf16.mxu1 %v6790_v38  ;;  %6383 = vmatprep.subr.bf16.mxu0 %v6791_v50 }
 0x20a   :  { %6352 = vmatpush3.bf16.msra.mxu1 %v6790_v38  ;;  %6384 = vmatpush3.bf16.msra.mxu0 %v6791_v50 }
 0x20b   :  { %6353 = vmatprep.subr.bf16.mxu1 %v6792_v56  ;;  %6385 = vmatprep.subr.bf16.mxu0 %v6793_v12 }
 0x20c   :  { %6306 = vmatmul.mubr.bf16.gmra.mrb[100].mxu1 %v7719_v42  ;;  %6338 = vmatmul.mubr.bf16.gmra.mrb[100].mxu0 %v7719_v42 }
 0x20d   :  { %6357 = vmatprep.mubr.bf16.mxu1 %v7627_v28  ;;  %6389 = vmatprep.mubr.bf16.mxu0 %v7627_v28 }
 0x20e   :  { %6354 = vmatpush3.bf16.msra.mxu1 %v6792_v56  ;;  %6386 = vmatpush3.bf16.msra.mxu0 %v6793_v12 }
 0x20f   :  { %6355 = vmatprep.subr.bf16.mxu1 %v6794_v25  ;;  %6387 = vmatprep.subr.bf16.mxu0 %v6795_v59 }
 0x212   :  { %6356 = vmatpush3.bf16.msra.mxu1 %v6794_v25  ;;  %6388 = vmatpush3.bf16.msra.mxu0 %v6795_v59 }
 0x213   :  { %6405 = vmatprep.subr.bf16.mxu1 %v6796_v2  ;;  %6437 = vmatprep.subr.bf16.mxu0 %v6797_v1 }
 0x215   :  { %6358 = vmatmul.mubr.bf16.vlgmr.msra.gmra.mrb[104].mxu1 %v7633_v44  ;;  %6390 = vmatmul.mubr.bf16.vlgmr.msra.gmra.mrb[104].mxu0 %v7633_v44 }
 0x216   :  { %6361 = vmatprep.mubr.bf16.mxu1 %v7639_v34  ;;  %6393 = vmatprep.mubr.bf16.mxu0 %v7639_v34 }
 0x217   :  { %6406 = vmatpush3.bf16.msra.mxu1 %v6796_v2  ;;  %6438 = vmatpush3.bf16.msra.mxu0 %v6797_v1 }
 0x218   :  { %6407 = vmatprep.subr.bf16.mxu1 %v6798_v54  ;;  %6439 = vmatprep.subr.bf16.mxu0 %v6799_v55 }
 0x21b   :  { %6408 = vmatpush3.bf16.msra.mxu1 %v6798_v54  ;;  %6440 = vmatpush3.bf16.msra.mxu0 %v6799_v55 }
 0x21c   :  { %6409 = vmatprep.subr.bf16.mxu1 %v6800_v51  ;;  %6441 = vmatprep.subr.bf16.mxu0 %v6801_v60 }
 0x21d   :  { %6362 = vmatmul.mubr.bf16.gmra.mrb[108].mxu1 %v7669_v63  ;;  %6394 = vmatmul.mubr.bf16.gmra.mrb[108].mxu0 %v7669_v63 }
 0x21e   :  { %6365 = vmatprep.mubr.bf16.mxu1 %v7675_v61  ;;  %6397 = vmatprep.mubr.bf16.mxu0 %v7675_v61 }
 0x21f   :  { %6410 = vmatpush3.bf16.msra.mxu1 %v6800_v51  ;;  %6442 = vmatpush3.bf16.msra.mxu0 %v6801_v60 }
 0x220   :  { %6411 = vmatprep.subr.bf16.mxu1 %v6802_v33  ;;  %6443 = vmatprep.subr.bf16.mxu0 %v6803_v48 }
 0x223   :  { %6412 = vmatpush3.bf16.msra.mxu1 %v6802_v33  ;;  %6444 = vmatpush3.bf16.msra.mxu0 %v6803_v48 }
 0x224   :  { %6413 = vmatprep.subr.bf16.mxu1 %v6804_v16  ;;  %6445 = vmatprep.subr.bf16.mxu0 %v6805_v17 }
 0x225   :  { %6366 = vmatmul.mubr.bf16.gmra.mrb[112].mxu1 %v7697_v3  ;;  %6398 = vmatmul.mubr.bf16.gmra.mrb[112].mxu0 %v7697_v3 }
 0x226   :  { %6369 = vmatprep.mubr.bf16.mxu1 %v7701_v29  ;;  %6401 = vmatprep.mubr.bf16.mxu0 %v7701_v29 }
 0x227   :  { %6414 = vmatpush3.bf16.msra.mxu1 %v6804_v16  ;;  %6446 = vmatpush3.bf16.msra.mxu0 %v6805_v17 }
 0x228   :  { %6415 = vmatprep.subr.bf16.mxu1 %v6806_v14  ;;  %6447 = vmatprep.subr.bf16.mxu0 %v6807_v32 }
 0x22b   :  { %6416 = vmatpush3.bf16.msra.mxu1 %v6806_v14  ;;  %6448 = vmatpush3.bf16.msra.mxu0 %v6807_v32 }
 0x22c   :  { %6417 = vmatprep.subr.bf16.mxu1 %v6808_v9  ;;  %6449 = vmatprep.subr.bf16.mxu0 %v6809_v13 }
 0x22d   :  { %6370 = vmatmul.mubr.bf16.gmra.mrb[116].mxu1 %v7719_v42  ;;  %6402 = vmatmul.mubr.bf16.gmra.mrb[116].mxu0 %v7719_v42 }
 0x22e   :  { %6421 = vmatprep.mubr.bf16.mxu1 %v7627_v28  ;;  %6453 = vmatprep.mubr.bf16.mxu0 %v7627_v28 }
 0x22f   :  { %6418 = vmatpush3.bf16.msra.mxu1 %v6808_v9  ;;  %6450 = vmatpush3.bf16.msra.mxu0 %v6809_v13 }
 0x230   :  { %6419 = vmatprep.subr.bf16.mxu1 %v6810_v10  ;;  %6451 = vmatprep.subr.bf16.mxu0 %v6811_v22 }
 0x233   :  { %6420 = vmatpush3.bf16.msra.mxu1 %v6810_v10  ;;  %6452 = vmatpush3.bf16.msra.mxu0 %v6811_v22 }
 0x234   :  { %6469 = vmatprep.subr.bf16.mxu1 %v6812_v4 }
 0x236   :  { %6422 = vmatmul.mubr.bf16.vlgmr.msra.gmra.mrb[120].mxu1 %v7633_v44  ;;  %6454 = vmatmul.mubr.bf16.vlgmr.msra.gmra.mrb[120].mxu0 %v7633_v44 }
 0x237   :  { %6425 = vmatprep.mubr.bf16.mxu1 %v7639_v34  ;;  %6457 = vmatprep.mubr.bf16.mxu0 %v7639_v34 }
 0x238   :  { %6470 = vmatpush3.bf16.msra.mxu1 %v6812_v4 }
 0x239   :  { %6471 = vmatprep.subr.bf16.mxu1 %v6813_v43 }
 0x23c   :  { %6472 = vmatpush3.bf16.msra.mxu1 %v6813_v43 }
 0x23d   :  { %6473 = vmatprep.subr.bf16.mxu1 %v6814_v21 }
 0x23e   :  { %6426 = vmatmul.mubr.bf16.gmra.mrb[124].mxu1 %v7669_v63  ;;  %6458 = vmatmul.mubr.bf16.gmra.mrb[124].mxu0 %v7669_v63 }
 0x23f   :  { %6429 = vmatprep.mubr.bf16.mxu1 %v7675_v61  ;;  %6461 = vmatprep.mubr.bf16.mxu0 %v7675_v61 }
 0x240   :  { %6474 = vmatpush3.bf16.msra.mxu1 %v6814_v21 }
 0x241   :  { %6475 = vmatprep.subr.bf16.mxu1 %v6815_v39 }
 0x244   :  { %6476 = vmatpush3.bf16.msra.mxu1 %v6815_v39 }
 0x245   :  { %6477 = vmatprep.subr.bf16.mxu1 %v6816_v41 }
 0x246   :  { %6430 = vmatmul.mubr.bf16.gmra.mrb[128].mxu1 %v7697_v3  ;;  %6462 = vmatmul.mubr.bf16.gmra.mrb[128].mxu0 %v7697_v3 }
 0x247   :  { %6433 = vmatprep.mubr.bf16.mxu1 %v7701_v29  ;;  %6465 = vmatprep.mubr.bf16.mxu0 %v7701_v29 }
 0x248   :  { %6478 = vmatpush3.bf16.msra.mxu1 %v6816_v41 }
 0x249   :  { %6479 = vmatprep.subr.bf16.mxu1 %v6817_v37 }
 0x24c   :  { %6480 = vmatpush3.bf16.msra.mxu1 %v6817_v37 }
 0x24d   :  { %6481 = vmatprep.subr.bf16.mxu1 %v6818_v5 }
 0x24e   :  { %6434 = vmatmul.mubr.bf16.gmra.mrb[132].mxu1 %v7719_v42  ;;  %6466 = vmatmul.mubr.bf16.gmra.mrb[132].mxu0 %v7719_v42 }
 0x24f   :  { %6485 = vmatprep.mubr.bf16.mxu1 %v7627_v28 }
 0x250   :  { %6482 = vmatpush3.bf16.msra.mxu1 %v6818_v5 }
 0x251   :  { %6483 = vmatprep.subr.bf16.mxu1 %v6819_v40 }
 0x254   :  { %6484 = vmatpush3.bf16.msra.mxu1 %v6819_v40 }
 0x257   :  { %6486 = vmatmul.mubr.bf16.vlgmr.msra.gmra.mrb[136].mxu1 %v7633_v44 }
 0x258   :  { %6489 = vmatprep.mubr.bf16.mxu1 %v7639_v34 }
 0x25f   :  { %6490 = vmatmul.mubr.bf16.gmra.mrb[140].mxu1 %v7669_v63 }
 0x260   :  { %6493 = vmatprep.mubr.bf16.mxu1 %v7675_v61 }
 0x267   :  { %6494 = vmatmul.mubr.bf16.gmra.mrb[144].mxu1 %v7697_v3 }
 0x268   :  { %6497 = vmatprep.mubr.bf16.mxu1 %v7701_v29 }
 0x26f   :  { %6498 = vmatmul.mubr.bf16.gmra.mrb[148].mxu1 %v7719_v42 }
 0x2a6   :  { %v6231_v36 = vpop.f32.mrb[72].mxu1  ;;  %v6263_v58 = vpop.f32.mrb[72].mxu0 }
 0x2a7   :  { %v1750_v28 = vrot.slane %v6231_v36, 7  ;;  %v1687_v23 = vpop.f32.mrb[73].mxu1  ;;  %v1875_v35 = vpop.f32.mrb[73].mxu0 }
 0x2a8   :  { %v1748_v30 = vrot.slane %v1687_v23, 7  ;;  %v6232_v0 = vpop.f32.mrb[74].mxu1  ;;  %v6264_v44 = vpop.f32.mrb[74].mxu0 }
 0x2a9   :  { %v1764_v34 = vmul.f32 %v7173_v47, %v1750_v28  ;;  %v1751_v11 = vrot.slane %v6232_v0, 7  ;;  %v1690_v63 = vpop.f32.mrb[75].mxu1  ;;  %v1878_v53 = vpop.f32.mrb[75].mxu0 }
 0x2aa   :  { %v1762_v61 = vmul.f32 %v7173_v47, %v1748_v30  ;;  %v1749_v3 = vrot.slane %v1690_v63, 7 }
 0x2ab   :  { %v7907_v6 = vadd.f32 %v6263_v58, %v1764_v34  ;;  %v1765_v29 = vmul.f32 %v7173_v47, %v1751_v11 }
 0x2ac   :  { %v7910_v26 = vadd.f32 %v1875_v35, %v1762_v61  ;;  %v1763_v7 = vmul.f32 %v7173_v47, %v1749_v3 }
 0x2ad   :  { %v7913_v42 = vadd.f32 %v6264_v44, %v1765_v29 }
 0x2ae   :  { %v7915_v31 = vadd.f32 %v1878_v53, %v1763_v7  ;;  %v6235_v27 = vpop.f32.mrb[76].mxu1  ;;  %v6267_v20 = vpop.f32.mrb[76].mxu0 }
 0x2af   :  { %v1754_v19 = vrot.slane %v6235_v27, 7  ;;  %v1703_v24 = vpop.f32.mrb[77].mxu1  ;;  %v1891_v45 = vpop.f32.mrb[77].mxu0 }
 0x2b0   :  { %v1752_v49 = vrot.slane %v1703_v24, 7  ;;  %v6236_v15 = vpop.f32.mrb[78].mxu1  ;;  %v6268_v8 = vpop.f32.mrb[78].mxu0 }
 0x2b1   :  { %v1768_v46 = vmul.f32 %v7173_v47, %v1754_v19  ;;  %v1706_v57 = vpop.f32.mrb[79].mxu1  ;;  %v1894_v62 = vpop.f32.mrb[79].mxu0 }
 0x2b2   :  { %v1766_v38 = vmul.f32 %v7173_v47, %v1752_v49  ;;  %v1753_v50 = vrot.slane %v1706_v57, 7 }
 0x2b3   :  { %v7919_v56 = vadd.f32 %v6267_v20, %v1768_v46 }
 0x2b4   :  { %v7921_v12 = vadd.f32 %v1891_v45, %v1766_v38  ;;  %v1767_v25 = vmul.f32 %v7173_v47, %v1753_v50 }
 0x2b6   :  { %v7924_v59 = vadd.f32 %v1894_v62, %v1767_v25  ;;  %v6239_v2 = vpop.f32.mrb[80].mxu1  ;;  %v6271_v1 = vpop.f32.mrb[80].mxu0 }
 0x2b7   :  { %v1757_v54 = vrot.slane %v6239_v2, 7  ;;  %v1718_v55 = vpop.f32.mrb[81].mxu1  ;;  %v1906_v51 = vpop.f32.mrb[81].mxu0 }
 0x2b8   :  { %v1755_v60 = vrot.slane %v1718_v55, 7  ;;  %v6240_v33 = vpop.f32.mrb[82].mxu1  ;;  %v6272_v48 = vpop.f32.mrb[82].mxu0 }
 0x2b9   :  { %v1771_v16 = vmul.f32 %v7173_v47, %v1757_v54  ;;  %v1758_v17 = vrot.slane %v6240_v33, 7  ;;  %v1721_v14 = vpop.f32.mrb[83].mxu1  ;;  %v1909_v32 = vpop.f32.mrb[83].mxu0 }
 0x2ba   :  { %v1769_v9 = vmul.f32 %v7173_v47, %v1755_v60  ;;  %v1756_v13 = vrot.slane %v1721_v14, 7 }
 0x2bb   :  { %v7928_v10 = vadd.f32 %v6271_v1, %v1771_v16  ;;  %v1772_v22 = vmul.f32 %v7173_v47, %v1758_v17 }
 0x2bc   :  { %v7931_v4 = vadd.f32 %v1906_v51, %v1769_v9  ;;  %v1770_v43 = vmul.f32 %v7173_v47, %v1756_v13 }
 0x2bd   :  { %v7934_v21 = vadd.f32 %v6272_v48, %v1772_v22 }
 0x2be   :  { %v7936_v39 = vadd.f32 %v1909_v32, %v1770_v43  ;;  %v6243_v41 = vpop.f32.mrb[84].mxu1  ;;  %v6275_v37 = vpop.f32.mrb[84].mxu0 }
 0x2bf   :  { %v1761_v5 = vrot.slane %v6243_v41, 7  ;;  %v1734_v40 = vpop.f32.mrb[85].mxu1  ;;  %v1922_v36 = vpop.f32.mrb[85].mxu0 }
 0x2c0   :  { %v1759_v58 = vrot.slane %v1734_v40, 7  ;;  %v6244_v28 = vpop.f32.mrb[86].mxu1  ;;  %v6276_v23 = vpop.f32.mrb[86].mxu0 }
 0x2c1   :  { %v1775_v35 = vmul.f32 %v7173_v47, %v1761_v5  ;;  %v1737_v30 = vpop.f32.mrb[87].mxu1  ;;  %v1925_v0 = vpop.f32.mrb[87].mxu0 }
 0x2c2   :  { %v1773_v44 = vmul.f32 %v7173_v47, %v1759_v58  ;;  %v1760_v34 = vrot.slane %v1737_v30, 7 }
 0x2c3   :  { %v7940_v11 = vadd.f32 %v6275_v37, %v1775_v35 }
 0x2c4   :  { %v7942_v63 = vadd.f32 %v1922_v36, %v1773_v44  ;;  %v1774_v53 = vmul.f32 %v7173_v47, %v1760_v34 }
 0x2c6   :  { %v7945_v61 = vadd.f32 %v1925_v0, %v1774_v53 }
 0x2c7   :  { %v6295_v3 = vpop.f32.mrb[88].mxu1  ;;  %v7947_v29 = vpop.f32.mrb[88].mxu0 }
 0x2c8   :  { %v2112_v7 = vrot.slane %v6295_v3, 1  ;;  %v2049_v27 = vpop.f32.mrb[89].mxu1  ;;  %v7949_v20 = vpop.f32.mrb[89].mxu0 }
 0x2c9   :  { %v2110_v19 = vrot.slane %v2049_v27, 1  ;;  %v6296_v24 = vpop.f32.mrb[90].mxu1  ;;  %v7951_v45 = vpop.f32.mrb[90].mxu0 }
 0x2ca   :  { %v2126_v49 = vmul.f32 %v7177_v52, %v2112_v7  ;;  %v2113_v15 = vrot.slane %v6296_v24, 1  ;;  %v2052_v8 = vpop.f32.mrb[91].mxu1  ;;  %v7954_v46 = vpop.f32.mrb[91].mxu0 }
 0x2cb   :  { %v2124_v57 = vmul.f32 %v7177_v52, %v2110_v19  ;;  %v2111_v62 = vrot.slane %v2052_v8, 1 }
 0x2cc   :  { %v7958_v38 = vadd.f32 %v2126_v49, %v7907_v6  ;;  %v2127_v50 = vmul.f32 %v7177_v52, %v2113_v15 }
 0x2cd   :  { %v7962_v25 = vadd.f32 %v2124_v57, %v7910_v26  ;;  %v2125_v2 = vmul.f32 %v7177_v52, %v2111_v62 }
 0x2ce   :  { %v7966_v1 = vadd.f32 %v2127_v50, %v7913_v42 }
 0x2cf   :  { %v7969_v54 = vadd.f32 %v2125_v2, %v7915_v31  ;;  %v6299_v55 = vpop.f32.mrb[92].mxu1  ;;  %v7971_v51 = vpop.f32.mrb[92].mxu0 }
 0x2d0   :  { %v2116_v60 = vrot.slane %v6299_v55, 1  ;;  %v2065_v33 = vpop.f32.mrb[93].mxu1  ;;  %v7973_v6 = vpop.f32.mrb[93].mxu0 }
 0x2d1   :  { %v2114_v48 = vrot.slane %v2065_v33, 1  ;;  %v6300_v16 = vpop.f32.mrb[94].mxu1  ;;  %v7975_v17 = vpop.f32.mrb[94].mxu0 }
 0x2d2   :  { %v2130_v26 = vmul.f32 %v7177_v52, %v2116_v60  ;;  %v2068_v14 = vpop.f32.mrb[95].mxu1  ;;  %v7978_v32 = vpop.f32.mrb[95].mxu0  ;;  %v2314_v60 = vrot.slane %v7949_v20, 7 }
 0x2d3   :  { %v2128_v42 = vmul.f32 %v7177_v52, %v2114_v48  ;;  %v2115_v31 = vrot.slane %v2068_v14, 1  ;;  %v2317_v48 = vrot.slane %v7951_v45, 7  ;;  %v2315_v14 = vrot.slane %v7954_v46, 7 }
 0x2d4   :  { %v7982_v9 = vadd.f32 %v2130_v26, %v7919_v56  ;;  %v2330_v20 = vmul.f32 %v7173_v47, %v2314_v60 }
 0x2d5   :  { %v7985_v13 = vadd.f32 %v2128_v42, %v7921_v12  ;;  %v2129_v22 = vmul.f32 %v7177_v52, %v2115_v31  ;;  %v2331_v46 = vmul.f32 %v7173_v47, %v2315_v14 }
 0x2d7   :  { %v7989_v43 = vadd.f32 %v2129_v22, %v7924_v59  ;;  %v6303_v41 = vpop.f32.mrb[96].mxu1  ;;  %v7991_v37 = vpop.f32.mrb[96].mxu0 }
 0x2d8   :  { %v2119_v5 = vrot.slane %v6303_v41, 1  ;;  %v2080_v40 = vpop.f32.mrb[97].mxu1  ;;  %v7993_v36 = vpop.f32.mrb[97].mxu0 }
 0x2d9   :  { %v2117_v58 = vrot.slane %v2080_v40, 1  ;;  %v6304_v28 = vpop.f32.mrb[98].mxu1  ;;  %v7995_v23 = vpop.f32.mrb[98].mxu0 }
 0x2da   :  { %v2133_v56 = vmul.f32 %v7177_v52, %v2119_v5  ;;  %v2120_v12 = vrot.slane %v6304_v28, 1  ;;  %v2083_v35 = vpop.f32.mrb[99].mxu1  ;;  %v7998_v30 = vpop.f32.mrb[99].mxu0 }
 0x2db   :  { %v2131_v59 = vmul.f32 %v7177_v52, %v2117_v58  ;;  %v2118_v0 = vrot.slane %v2083_v35, 1 }
 0x2dc   :  { %v8002_v44 = vadd.f32 %v2133_v56, %v7928_v10  ;;  %v2134_v34 = vmul.f32 %v7177_v52, %v2120_v12 }
 0x2dd   :  { %v8006_v53 = vadd.f32 %v2131_v59, %v7931_v4  ;;  %v2132_v3 = vmul.f32 %v7177_v52, %v2118_v0 }
 0x2de   :  { %v8010_v7 = vadd.f32 %v2134_v34, %v7934_v21  ;;  %v2316_v21 = vrot.slane %v7947_v29, 7 }
 0x2df   :  { %v8013_v27 = vadd.f32 %v2132_v3, %v7936_v39  ;;  %v6307_v19 = vpop.f32.mrb[100].mxu1  ;;  %v8015_v24 = vpop.f32.mrb[100].mxu0  ;;  %v2318_v3 = vrot.slane %v7973_v6, 7 }
 0x2e0   :  { %v2123_v49 = vrot.slane %v6307_v19, 1  ;;  %v2096_v15 = vpop.f32.mrb[101].mxu1  ;;  %v8017_v10 = vpop.f32.mrb[101].mxu0  ;;  %v2332_v29 = vmul.f32 %v7173_v47, %v2316_v21 }
 0x2e1   :  { %v2121_v8 = vrot.slane %v2096_v15, 1  ;;  %v6308_v57 = vpop.f32.mrb[102].mxu1  ;;  %v8019_v62 = vpop.f32.mrb[102].mxu0 }
 0x2e2   :  { %v2137_v4 = vmul.f32 %v7177_v52, %v2123_v49  ;;  %v2099_v50 = vpop.f32.mrb[103].mxu1  ;;  %v8022_v2 = vpop.f32.mrb[103].mxu0 }
 0x2e3   :  { %v2135_v39 = vmul.f32 %v7177_v52, %v2121_v8  ;;  %v2122_v55 = vrot.slane %v2099_v50, 1  ;;  %v2321_v8 = vrot.slane %v7975_v17, 7  ;;  %v2319_v50 = vrot.slane %v7978_v32, 7 }
 0x2e4   :  { %v8028_v33 = vadd.f32 %v2137_v4, %v7940_v11  ;;  %v2334_v17 = vmul.f32 %v7173_v47, %v2318_v3  ;;  %v2323_v3 = vrot.slane %v7998_v30, 7 }
 0x2e5   :  { %v8032_v16 = vadd.f32 %v2135_v39, %v7942_v63  ;;  %v2136_v26 = vmul.f32 %v7177_v52, %v2122_v55  ;;  %v2333_v63 = vmul.f32 %v7173_v47, %v2317_v48 }
 0x2e7   :  { %v8037_v42 = vadd.f32 %v2136_v26, %v7945_v61  ;;  %v2320_v61 = vrot.slane %v7971_v51, 7 }
 0x2e8   :  { %v6359_v31 = vpop.f32.mrb[104].mxu1  ;;  %v6391_v22 = vpop.f32.mrb[104].mxu0 }
 0x2e9   :  { %v2510_v11 = vadd.f32 %v6359_v31, %v2332_v29  ;;  %v2688_v41 = vrot.slane %v6391_v22, 1  ;;  %v2445_v5 = vpop.f32.mrb[105].mxu1  ;;  %v2623_v45 = vpop.f32.mrb[105].mxu0  ;;  %v2336_v6 = vmul.f32 %v7173_v47, %v2320_v61  ;;  %v2322_v61 = vrot.slane %v7993_v36, 7 }
 0x2ea   :  { %v2508_v40 = vadd.f32 %v2445_v5, %v2330_v20  ;;  %v2686_v58 = vrot.slane %v2623_v45, 1  ;;  %v6360_v28 = vpop.f32.mrb[106].mxu1  ;;  %v6392_v56 = vpop.f32.mrb[106].mxu0  ;;  %v2337_v20 = vmul.f32 %v7173_v47, %v2321_v8 }
 0x2eb   :  { %v2704_v12 = vmul.f32 %v7177_v52, %v2688_v41  ;;  %v2511_v35 = vadd.f32 %v6360_v28, %v2333_v63  ;;  %v2689_v59 = vrot.slane %v6392_v56, 1  ;;  %v2448_v0 = vpop.f32.mrb[107].mxu1  ;;  %v2626_v34 = vpop.f32.mrb[107].mxu0  ;;  %v2335_v63 = vmul.f32 %v7173_v47, %v2319_v50 }
 0x2ec   :  { %v2702_v19 = vmul.f32 %v7177_v52, %v2686_v58  ;;  %v2509_v49 = vadd.f32 %v2448_v0, %v2331_v46  ;;  %v2687_v15 = vrot.slane %v2626_v34, 1  ;;  %v2338_v50 = vmul.f32 %v7173_v47, %v2322_v61 }
 0x2ed   :  { %v2720_v57 = vadd.f32 %v2704_v12, %v2510_v11  ;;  %v2705_v4 = vmul.f32 %v7177_v52, %v2689_v59  ;;  %v2325_v59 = vrot.slane %v7995_v23, 7 }
 0x2ee   :  { %v8050_v51 = vadd.f32 %v2702_v19, %v2508_v40  ;;  %v2703_v21 = vmul.f32 %v7177_v52, %v2687_v15  ;;  %v2324_v40 = vrot.slane %v7991_v37, 7 }
 0x2ef   :  { %v8054_v39 = vadd.f32 %v2720_v57, %v7969_v54  ;;  %v2721_v55 = vadd.f32 %v2705_v4, %v2511_v35 }
 0x2f0   :  { %v2719_v60 = vadd.f32 %v2703_v21, %v2509_v49  ;;  %v6363_v48 = vpop.f32.mrb[108].mxu1  ;;  %v6395_v26 = vpop.f32.mrb[108].mxu0  ;;  %v2340_v36 = vmul.f32 %v7173_v47, %v2324_v40  ;;  %v2329_v40 = vrot.slane %v8019_v62, 7 }
 0x2f1   :  { %v8059_v14 = vadd.f32 %v2721_v55, %v7958_v38  ;;  %v2514_v29 = vadd.f32 %v6363_v48, %v2336_v6  ;;  %v2692_v32 = vrot.slane %v6395_v26, 1  ;;  %v2461_v31 = vpop.f32.mrb[109].mxu1  ;;  %v2639_v22 = vpop.f32.mrb[109].mxu0 }
 0x2f2   :  { %v8063_v54 = vadd.f32 %v2719_v60, %v7962_v25  ;;  %v2512_v11 = vadd.f32 %v2461_v31, %v2334_v17  ;;  %v2690_v41 = vrot.slane %v2639_v22, 1  ;;  %v6364_v5 = vpop.f32.mrb[110].mxu1  ;;  %v6396_v45 = vpop.f32.mrb[110].mxu0  ;;  %v2328_v31 = vrot.slane %v8015_v24, 7 }
 0x2f3   :  { %v2708_v38 = vmul.f32 %v7177_v52, %v2692_v32  ;;  %v2515_v58 = vadd.f32 %v6364_v5, %v2337_v20  ;;  %v2693_v28 = vrot.slane %v6396_v45, 1  ;;  %v2464_v56 = vpop.f32.mrb[111].mxu1  ;;  %v2642_v46 = vpop.f32.mrb[111].mxu0  ;;  %v2339_v32 = vmul.f32 %v7173_v47, %v2323_v3 }
 0x2f4   :  { %v2706_v12 = vmul.f32 %v7177_v52, %v2690_v41  ;;  %v2513_v25 = vadd.f32 %v2464_v56, %v2335_v63  ;;  %v2691_v35 = vrot.slane %v2642_v46, 1  ;;  %v2326_v5 = vrot.slane %v8017_v10, 7 }
 0x2f5   :  { %v2724_v0 = vadd.f32 %v2708_v38, %v2514_v29  ;;  %v2709_v34 = vmul.f32 %v7177_v52, %v2693_v28  ;;  %v2327_v28 = vrot.slane %v8022_v2, 7  ;;  %v2344_v10 = vmul.f32 %v7173_v47, %v2328_v31 }
 0x2f6   :  { %v2722_v37 = vadd.f32 %v2706_v12, %v2512_v11  ;;  %v2707_v19 = vmul.f32 %v7177_v52, %v2691_v35  ;;  %v2342_v62 = vmul.f32 %v7173_v47, %v2326_v5 }
 0x2f7   :  { %v8075_v49 = vadd.f32 %v2724_v0, %v7989_v43  ;;  %v2725_v15 = vadd.f32 %v2709_v34, %v2515_v58  ;;  %v2341_v43 = vmul.f32 %v7173_v47, %v2325_v59 }
 0x2f8   :  { %v8079_v8 = vadd.f32 %v2722_v37, %v7966_v1  ;;  %v2723_v57 = vadd.f32 %v2707_v19, %v2513_v25  ;;  %v6367_v4 = vpop.f32.mrb[112].mxu1  ;;  %v6399_v23 = vpop.f32.mrb[112].mxu0  ;;  %v2345_v37 = vmul.f32 %v7173_v47, %v2329_v40 }
 0x2f9   :  { %v8083_v21 = vadd.f32 %v2725_v15, %v7982_v9  ;;  %v2518_v30 = vadd.f32 %v6367_v4, %v2340_v36  ;;  %v2696_v55 = vrot.slane %v6399_v23, 1  ;;  %v2477_v6 = vpop.f32.mrb[113].mxu1  ;;  %v2655_v60 = vpop.f32.mrb[113].mxu0  ;;  %v2343_v4 = vmul.f32 %v7173_v47, %v2327_v28 }
 0x2fa   :  { %v8087_v48 = vadd.f32 %v2723_v57, %v7985_v13  ;;  %v2516_v26 = vadd.f32 %v2477_v6, %v2338_v50  ;;  %v2694_v1 = vrot.slane %v2655_v60, 1  ;;  %v6368_v17 = vpop.f32.mrb[114].mxu1  ;;  %v6400_v29 = vpop.f32.mrb[114].mxu0 }
 0x2fb   :  { %v2712_v9 = vmul.f32 %v7177_v52, %v2696_v55  ;;  %v2519_v22 = vadd.f32 %v6368_v17, %v2341_v43  ;;  %v2697_v20 = vrot.slane %v6400_v29, 1  ;;  %v2480_v11 = vpop.f32.mrb[115].mxu1  ;;  %v2658_v41 = vpop.f32.mrb[115].mxu0 }
 0x2fc   :  { %v2710_v45 = vmul.f32 %v7177_v52, %v2694_v1  ;;  %v2517_v13 = vadd.f32 %v2480_v11, %v2339_v32  ;;  %v2695_v63 = vrot.slane %v2658_v41, 1 }
 0x2fd   :  { %v2728_v38 = vadd.f32 %v2712_v9, %v2518_v30  ;;  %v2713_v58 = vmul.f32 %v7177_v52, %v2697_v20 }
 0x2fe   :  { %v8097_v24 = vadd.f32 %v2710_v45, %v2516_v26  ;;  %v2711_v56 = vmul.f32 %v7177_v52, %v2695_v63 }
 0x2ff   :  { %v8101_v46 = vadd.f32 %v2728_v38, %v8013_v27  ;;  %v2729_v61 = vadd.f32 %v2713_v58, %v2519_v22 }
 0x300   :  { %v2727_v12 = vadd.f32 %v2711_v56, %v2517_v13  ;;  %v6371_v25 = vpop.f32.mrb[116].mxu1  ;;  %v6403_v35 = vpop.f32.mrb[116].mxu0 }
 0x301   :  { %v8106_v59 = vadd.f32 %v2729_v61, %v8002_v44  ;;  %v2522_v0 = vadd.f32 %v6371_v25, %v2344_v10  ;;  %v2700_v2 = vrot.slane %v6403_v35, 1  ;;  %v2493_v34 = vpop.f32.mrb[117].mxu1  ;;  %v2671_v3 = vpop.f32.mrb[117].mxu0 }
 0x302   :  { %v8110_v27 = vadd.f32 %v2727_v12, %v8006_v53  ;;  %v2520_v19 = vadd.f32 %v2493_v34, %v2342_v62  ;;  %v2698_v15 = vrot.slane %v2671_v3, 1  ;;  %v6372_v36 = vpop.f32.mrb[118].mxu1  ;;  %v6404_v57 = vpop.f32.mrb[118].mxu0 }
 0x303   :  { %v2716_v23 = vmul.f32 %v7177_v52, %v2700_v2  ;;  %v2523_v50 = vadd.f32 %v6372_v36, %v2345_v37  ;;  %v2701_v44 = vrot.slane %v6404_v57, 1  ;;  %v2496_v30 = vpop.f32.mrb[119].mxu1  ;;  %v2674_v55 = vpop.f32.mrb[119].mxu0 }
 0x304   :  { %v2714_v6 = vmul.f32 %v7177_v52, %v2698_v15  ;;  %v2521_v60 = vadd.f32 %v2496_v30, %v2343_v4  ;;  %v2699_v43 = vrot.slane %v2674_v55, 1 }
 0x305   :  { %v2732_v26 = vadd.f32 %v2716_v23, %v2522_v0  ;;  %v2717_v53 = vmul.f32 %v7177_v52, %v2701_v44 }
 0x306   :  { %v2730_v1 = vadd.f32 %v2714_v6, %v2520_v19  ;;  %v2715_v17 = vmul.f32 %v7177_v52, %v2699_v43 }
 0x307   :  { %v8118_v29 = vadd.f32 %v2732_v26, %v8037_v42  ;;  %v2733_v32 = vadd.f32 %v2717_v53, %v2523_v50 }
 0x308   :  { %v8121_v31 = vadd.f32 %v2730_v1, %v8010_v7  ;;  %v2731_v9 = vadd.f32 %v2715_v17, %v2521_v60 }
 0x309   :  { %v8124_v22 = vadd.f32 %v2733_v32, %v8028_v33  ;;  %v6423_v20 = vpop.f32.mrb[120].mxu1  ;;  %v6455_v11 = vpop.f32.mrb[120].mxu0 }
 0x30a   :  { %v8127_v41 = vadd.f32 %v2731_v9, %v8032_v16  ;;  %v2895_v5 = vrot.slane %v6423_v20, 7  ;;  %v2833_v45 = vpop.f32.mrb[121].mxu1  ;;  %v3021_v13 = vpop.f32.mrb[121].mxu0 }
 0x30b   :  { %v6424_v63 = vpop.f32.mrb[122].mxu1  ;;  %v6456_v40 = vpop.f32.mrb[122].mxu0 }
 0x30c   :  { %v2909_v42 = vmul.f32 %v7173_v47, %v2895_v5  ;;  %v2896_v38 = vrot.slane %v6424_v63, 7  ;;  %v2835_v58 = vpop.f32.mrb[123].mxu1  ;;  %v3023_v7 = vpop.f32.mrb[123].mxu0 }
 0x30d   :  { %v2894_v28 = vrot.slane %v2835_v58, 7 }
 0x30e   :  { %v8130_v56 = vadd.f32 %v6455_v11, %v2909_v42  ;;  %v2910_v33 = vmul.f32 %v7173_v47, %v2896_v38 }
 0x30f   :  { %v2908_v61 = vmul.f32 %v7173_v47, %v2894_v28 }
 0x310   :  { %v8134_v10 = vadd.f32 %v6456_v40, %v2910_v33 }
 0x311   :  { %v8136_v16 = vadd.f32 %v3023_v7, %v2908_v61  ;;  %v6427_v12 = vpop.f32.mrb[124].mxu1  ;;  %v6459_v25 = vpop.f32.mrb[124].mxu0 }
 0x312   :  { %v2899_v35 = vrot.slane %v6427_v12, 7  ;;  %v2848_v62 = vpop.f32.mrb[125].mxu1  ;;  %v3036_v0 = vpop.f32.mrb[125].mxu0 }
 0x313   :  { %v2897_v2 = vrot.slane %v2848_v62, 7  ;;  %v6428_v34 = vpop.f32.mrb[126].mxu1  ;;  %v6460_v3 = vpop.f32.mrb[126].mxu0 }
 0x314   :  { %v2913_v37 = vmul.f32 %v7173_v47, %v2899_v35  ;;  %v2900_v19 = vrot.slane %v6428_v34, 7  ;;  %v2851_v15 = vpop.f32.mrb[127].mxu1  ;;  %v3039_v36 = vpop.f32.mrb[127].mxu0 }
 0x315   :  { %v2911_v57 = vmul.f32 %v7173_v47, %v2897_v2  ;;  %v2898_v4 = vrot.slane %v2851_v15, 7 }
 0x316   :  { %v8140_v23 = vadd.f32 %v6459_v25, %v2913_v37  ;;  %v2914_v50 = vmul.f32 %v7173_v47, %v2900_v19 }
 0x317   :  { %v8143_v44 = vadd.f32 %v3036_v0, %v2911_v57  ;;  %v2912_v30 = vmul.f32 %v7173_v47, %v2898_v4 }
 0x318   :  { %v8146_v55 = vadd.f32 %v6460_v3, %v2914_v50  ;;  %v6820_v50 = vld [vmem:[%s9172_s7] sm:$0xff]  }
 0x319   :  { %v8148_v6 = vadd.f32 %v3039_v36, %v2912_v30  ;;  %v6431_v60 = vpop.f32.mrb[128].mxu1  ;;  %v6463_v43 = vpop.f32.mrb[128].mxu0  ;;  %6501 = vmatprep.subr.bf16.mxu0 %v6820_v50 }
 0x31a   :  { %v2902_v26 = vrot.slane %v6431_v60, 7  ;;  %v2864_v53 = vpop.f32.mrb[129].mxu1  ;;  %v3052_v1 = vpop.f32.mrb[129].mxu0  ;;  %6502 = vmatpush3.bf16.msra.mxu0 %v6820_v50 }
 0x31b   :  { %v6432_v17 = vpop.f32.mrb[130].mxu1  ;;  %v6464_v32 = vpop.f32.mrb[130].mxu0 }
 0x31c   :  { %v2916_v9 = vmul.f32 %v7173_v47, %v2902_v26  ;;  %v2903_v20 = vrot.slane %v6432_v17, 7  ;;  %v2866_v11 = vpop.f32.mrb[131].mxu1  ;;  %v3054_v5 = vpop.f32.mrb[131].mxu0  ;;  %v6821_v17 = vld [vmem:[%s9172_s7 + $0x8] sm:$0xff]  }
 0x31d   :  { %v2901_v45 = vrot.slane %v2866_v11, 7  ;;  %6503 = vmatprep.subr.bf16.mxu0 %v6821_v17 }
 0x31e   :  { %v8151_v13 = vadd.f32 %v6463_v43, %v2916_v9  ;;  %v2917_v63 = vmul.f32 %v7173_v47, %v2903_v20  ;;  %v6823_v43 = vld [vmem:[%s9172_s7 + $0x20] sm:$0xff]   ;;  %6504 = vmatpush3.bf16.msra.mxu0 %v6821_v17 }
 0x31f   :  { %v2915_v40 = vmul.f32 %v7173_v47, %v2901_v45  ;;  %6525 = vmatprep.subr.bf16.mxu1 %v6823_v43 }
 0x320   :  { %v8155_v42 = vadd.f32 %v6464_v32, %v2917_v63  ;;  %v6824_v32 = vld [vmem:[%s9172_s7 + $0x28] sm:$0xff]   ;;  %6526 = vmatpush3.bf16.msra.mxu1 %v6823_v43 }
 0x321   :  { %v8157_v38 = vadd.f32 %v3054_v5, %v2915_v40  ;;  %v6435_v58 = vpop.f32.mrb[132].mxu1  ;;  %v6467_v7 = vpop.f32.mrb[132].mxu0  ;;  %6527 = vmatprep.subr.bf16.mxu1 %v6824_v32 }
 0x322   :  { %v2906_v28 = vrot.slane %v6435_v58, 7  ;;  %v2879_v33 = vpop.f32.mrb[133].mxu1  ;;  %v3067_v61 = vpop.f32.mrb[133].mxu0  ;;  %v6822_v58 = vld [vmem:[%s9172_s7 + $0x10] sm:$0xff]  }
 0x323   :  { %v2904_v12 = vrot.slane %v2879_v33, 7  ;;  %v6436_v25 = vpop.f32.mrb[134].mxu1  ;;  %v6468_v35 = vpop.f32.mrb[134].mxu0  ;;  %6505 = vmatprep.subr.bf16.mxu0 %v6822_v58 }
 0x324   :  { %v2920_v62 = vmul.f32 %v7173_v47, %v2906_v28  ;;  %v2907_v0 = vrot.slane %v6436_v25, 7  ;;  %v2882_v2 = vpop.f32.mrb[135].mxu1  ;;  %v3070_v34 = vpop.f32.mrb[135].mxu0  ;;  %6528 = vmatpush3.bf16.msra.mxu1 %v6824_v32  ;;  %6506 = vmatpush3.bf16.msra.mxu0 %v6822_v58 }
 0x325   :  { %v2918_v3 = vmul.f32 %v7173_v47, %v2904_v12  ;;  %v2905_v37 = vrot.slane %v2882_v2, 7 }
 0x326   :  { %v8161_v19 = vadd.f32 %v6467_v7, %v2920_v62  ;;  %v2921_v15 = vmul.f32 %v7173_v47, %v2907_v0  ;;  %v6826_v7 = vld [vmem:[%s9172_s7 + $0x30] sm:$0xff]   ;;  %v6825_v62 = vld [vmem:[%s9172_s7 + $0x18] sm:$0xff]  }
 0x327   :  { %v8164_v36 = vadd.f32 %v3067_v61, %v2918_v3  ;;  %v2919_v57 = vmul.f32 %v7173_v47, %v2905_v37  ;;  %6529 = vmatprep.subr.bf16.mxu1 %v6826_v7  ;;  %6507 = vmatprep.subr.bf16.mxu0 %v6825_v62 }
 0x328   :  { %v8167_v4 = vadd.f32 %v6468_v35, %v2921_v15  ;;  %6530 = vmatpush3.bf16.msra.mxu1 %v6826_v7  ;;  %6508 = vmatpush3.bf16.msra.mxu0 %v6825_v62 }
 0x329   :  { %v8172_v30 = vadd.f32 %v3070_v34, %v2919_v57 }
 0x32a   :  { %v6487_v60 = vpop.f32.mrb[136].mxu1 }
 0x32b   :  { %v3257_v26 = vrot.slane %v6487_v60, 1  ;;  %v3195_v53 = vpop.f32.mrb[137].mxu1 }
 0x32c   :  { %v6488_v1 = vpop.f32.mrb[138].mxu1 }
 0x32d   :  { %v3271_v9 = vmul.f32 %v7177_v52, %v3257_v26  ;;  %v3258_v20 = vrot.slane %v6488_v1, 1  ;;  %v3197_v11 = vpop.f32.mrb[139].mxu1 }
 0x32e   :  { %v3256_v5 = vrot.slane %v3197_v11, 1 }
 0x32f   :  { %v3285_v45 = vadd.f32 %v3271_v9, %v8130_v56  ;;  %v3272_v63 = vmul.f32 %v7177_v52, %v3258_v20 }
 0x330   :  { %v3270_v40 = vmul.f32 %v7177_v52, %v3256_v5 }
 0x331   :  { %v8194_v28 = vadd.f32 %v8063_v54, %v3285_v45  ;;  %v3286_v33 = vadd.f32 %v3272_v63, %v8134_v10  ;;  %v6827_v54 = vld [vmem:[%s9172_s7 + $0x38] sm:$0xff]  }
 0x332   :  { %v3284_v56 = vadd.f32 %v3270_v40, %v8136_v16  ;;  %v6491_v61 = vpop.f32.mrb[140].mxu1  ;;  %6531 = vmatprep.subr.bf16.mxu1 %v6827_v54 }
 0x333   :  { %v8199_v12 = vadd.f32 %v8054_v39, %v3286_v33  ;;  %v3261_v25 = vrot.slane %v6491_v61, 1  ;;  %v3210_v35 = vpop.f32.mrb[141].mxu1  ;;  %v3332_v3 = vsel %vm3330_vm3, %v8194_v28, 0.0  ;;  %6532 = vmatpush3.bf16.msra.mxu1 %v6827_v54 }
 0x334   :  { %v8208_v10 = vadd.f32 %v3284_v56, %v8050_v51  ;;  %v3259_v16 = vrot.slane %v3210_v35, 1  ;;  %v6492_v0 = vpop.f32.mrb[142].mxu1  ;;  %v8219_v51 = vld [vmem:[%s9172_s7 + $0x40] sm:$0xff]  }
 0x335   :  { %v3275_v39 = vmul.f32 %v7177_v52, %v3261_v25  ;;  %v3262_v2 = vrot.slane %v6492_v0, 1  ;;  %v3213_v34 = vpop.f32.mrb[143].mxu1  ;;  %6549 = vmatprep.subr.bf16.mxu0 %v8219_v51  ;;  %v3334_v32 = vsel %vm3330_vm3, %v8199_v12, 0.0 }
 0x336   :  { %v3331_v37 = vsel %vm3330_vm3, %v8208_v10, 0.0  ;;  %v3273_v15 = vmul.f32 %v7177_v52, %v3259_v16  ;;  %v3260_v57 = vrot.slane %v3213_v34, 1 }
 0x337   :  { %v3333_v50 = vadd.f32 %v3332_v3, %v3331_v37  ;;  %v3289_v60 = vadd.f32 %v3275_v39, %v8140_v23  ;;  %v3276_v43 = vmul.f32 %v7177_v52, %v3262_v2  ;;  %v3344_v2 = vsel %vm3330_vm3, %v8083_v21, 0.0 }
 0x338   :  { %v3287_v26 = vadd.f32 %v3273_v15, %v8143_v44  ;;  %v3274_v53 = vmul.f32 %v7177_v52, %v3260_v57 }
 0x339   :  { %v8227_v1 = vadd.f32 %v8087_v48, %v3289_v60  ;;  %v3290_v17 = vadd.f32 %v3276_v43, %v8146_v55  ;;  %v3335_v44 = vadd.f32 %v3334_v32, %v3333_v50 }
 0x33a   :  { %v8233_v23 = vadd.f32 %v8059_v14, %v3287_v26  ;;  %v3288_v9 = vadd.f32 %v3274_v53, %v8148_v6  ;;  %v6495_v20 = vpop.f32.mrb[144].mxu1 }
 0x33b   :  { %v8237_v11 = vadd.f32 %v8075_v49, %v3290_v17  ;;  %v3264_v5 = vrot.slane %v6495_v20, 1  ;;  %v3226_v45 = vpop.f32.mrb[145].mxu1  ;;  %v3340_v6 = vsel %vm3330_vm3, %v8227_v1, 0.0 }
 0x33c   :  { %v3336_v48 = vsel %vm3330_vm3, %v8233_v23, 0.0  ;;  %v8242_v55 = vadd.f32 %v8079_v8, %v3288_v9  ;;  %v6496_v63 = vpop.f32.mrb[146].mxu1 }
 0x33d   :  { %v3337_v40 = vadd.f32 %v3336_v48, %v3335_v44  ;;  %v3278_v14 = vmul.f32 %v7177_v52, %v3264_v5  ;;  %v3265_v58 = vrot.slane %v6496_v63, 1  ;;  %v3228_v7 = vpop.f32.mrb[147].mxu1  ;;  %v3342_v16 = vsel %vm3330_vm3, %v8237_v11, 0.0 }
 0x33e   :  { %v3338_v49 = vsel %vm3330_vm3, %v8242_v55, 0.0  ;;  %v3263_v33 = vrot.slane %v3228_v7, 1 }
 0x33f   :  { %v3339_v56 = vadd.f32 %v3338_v49, %v3337_v40  ;;  %v3292_v61 = vadd.f32 %v3278_v14, %v8151_v13  ;;  %v3279_v25 = vmul.f32 %v7177_v52, %v3265_v58 }
 0x340   :  { %v3277_v8 = vmul.f32 %v7177_v52, %v3263_v33  ;;  %v3360_v33 = vsel %vm3330_vm3, %v8124_v22, 0.0 }
 0x341   :  { %v3341_v35 = vadd.f32 %v3340_v6, %v3339_v56  ;;  %v8253_v62 = vadd.f32 %v8110_v27, %v3292_v61  ;;  %v3293_v54 = vadd.f32 %v3279_v25, %v8155_v42 }
 0x342   :  { %v3291_v0 = vadd.f32 %v3277_v8, %v8157_v38  ;;  %v6499_v39 = vpop.f32.mrb[148].mxu1 }
 0x343   :  { %v8262_v13 = vadd.f32 %v8101_v46, %v3293_v54  ;;  %v3343_v34 = vadd.f32 %v3342_v16, %v3341_v35  ;;  %v3268_v3 = vrot.slane %v6499_v39, 1  ;;  %v3241_v37 = vpop.f32.mrb[149].mxu1  ;;  %v3348_v43 = vsel %vm3330_vm3, %v8253_v62, 0.0 }
 0x344   :  { %v8265_v27 = vadd.f32 %v3291_v0, %v8097_v24  ;;  %v3266_v15 = vrot.slane %v3241_v37, 1  ;;  %v6500_v42 = vpop.f32.mrb[150].mxu1  ;;  %v8276_v24 = vld [vmem:[%s9172_s7 + $0x60] sm:$0xff]  }
 0x345   :  { %v3345_v57 = vadd.f32 %v3344_v2, %v3343_v34  ;;  %v3282_v50 = vmul.f32 %v7177_v52, %v3268_v3  ;;  %v3269_v60 = vrot.slane %v6500_v42, 1  ;;  %v3244_v38 = vpop.f32.mrb[151].mxu1  ;;  %v3350_v17 = vsel %vm3330_vm3, %v8262_v13, 0.0  ;;  %6573 = vmatprep.subr.bf16.mxu1 %v8276_v24 }
 0x346   :  { %v3346_v46 = vsel %vm3330_vm3, %v8265_v27, 0.0  ;;  %v3280_v26 = vmul.f32 %v7177_v52, %v3266_v15  ;;  %v3267_v53 = vrot.slane %v3244_v38, 1 }
 0x347   :  { %v3347_v32 = vadd.f32 %v3346_v46, %v3345_v57  ;;  %v3296_v9 = vadd.f32 %v3282_v50, %v8161_v19  ;;  %v3283_v20 = vmul.f32 %v7177_v52, %v3269_v60 }
 0x348   :  { %v3294_v44 = vadd.f32 %v3280_v26, %v8164_v36  ;;  %v3281_v5 = vmul.f32 %v7177_v52, %v3267_v53 }
 0x349   :  { %v3349_v45 = vadd.f32 %v3348_v43, %v3347_v32  ;;  %v8286_v48 = vadd.f32 %v8127_v41, %v3296_v9  ;;  %v3297_v63 = vadd.f32 %v3283_v20, %v8167_v4 }
 0x34a   :  { %v8290_v40 = vadd.f32 %v8106_v59, %v3294_v44  ;;  %v3295_v14 = vadd.f32 %v3281_v5, %v8172_v30 }
 0x34b   :  { %v3351_v19 = vadd.f32 %v3350_v17, %v3349_v45  ;;  %v8294_v58 = vadd.f32 %v8118_v29, %v3297_v63  ;;  %v3356_v59 = vsel %vm3330_vm3, %v8286_v48, 0.0 }
 0x34c   :  { %v3352_v36 = vsel %vm3330_vm3, %v8290_v40, 0.0  ;;  %v8299_v7 = vadd.f32 %v8121_v31, %v3295_v14 }
 0x34d   :  { %v3353_v6 = vadd.f32 %v3352_v36, %v3351_v19  ;;  %v3358_v30 = vsel %vm3330_vm3, %v8294_v58, 0.0 }
 0x34e   :  { %v3354_v41 = vsel %vm3330_vm3, %v8299_v7, 0.0 }
 0x34f   :  { %v3355_v4 = vadd.f32 %v3354_v41, %v3353_v6 }
 0x351   :  { %v3357_v49 = vadd.f32 %v3356_v59, %v3355_v4 }
 0x353   :  { %v3359_v29 = vadd.f32 %v3358_v30, %v3357_v49 }
 0x355   :  { %v3361_v56 = vadd.f32 %v3360_v33, %v3359_v29 }
 0x357   :  { %v3362_v61 = vrot.slane %v3361_v56, 4 }
 0x359   :  { %v3363_v31 = vadd.f32 %v3362_v61, %v3361_v56 }
 0x35b   :  { %v3364_v25 = vrot.slane %v3363_v31, 2 }
 0x35d   :  { %v3365_v8 = vadd.f32 %v3364_v25, %v3363_v31 }
 0x35f   :  { %v3366_v35 = vrot.slane %v3365_v8, 1 }
 0x361   :  { %v3367_v54 = vadd.f32 %v3366_v35, %v3365_v8 }
 0x363   :  { %v8309_v16 = vmul.f32 0.0078125, %v3367_v54 }
 0x365   :  { %v3369_v0 = vsub.f32 %v8208_v10, %v8309_v16  ;;  %v3370_v39 = vsub.f32 %v8194_v28, %v8309_v16  ;;  %v3371_v2 = vsub.f32 %v8199_v12, %v8309_v16  ;;  %v3372_v34 = vsub.f32 %v8233_v23, %v8309_v16 }
 0x366   :  { %v3373_v15 = vsub.f32 %v8242_v55, %v8309_v16  ;;  %v3374_v57 = vsub.f32 %v8227_v1, %v8309_v16  ;;  %v3375_v46 = vsub.f32 %v8237_v11, %v8309_v16  ;;  %v3376_v32 = vsub.f32 %v8083_v21, %v8309_v16 }
 0x367   :  { %v3385_v3 = vmul.f32 %v3369_v0, %v3369_v0  ;;  %v3386_v37 = vmul.f32 %v3370_v39, %v3370_v39  ;;  %v3387_v42 = vmul.f32 %v3371_v2, %v3371_v2  ;;  %v3388_v50 = vmul.f32 %v3372_v34, %v3372_v34 }
 0x368   :  { %v3389_v26 = vmul.f32 %v3373_v15, %v3373_v15  ;;  %v3390_v9 = vmul.f32 %v3374_v57, %v3374_v57  ;;  %v3377_v5 = vsub.f32 %v8265_v27, %v8309_v16  ;;  %v3391_v45 = vmul.f32 %v3375_v46, %v3375_v46 }
 0x369   :  { %v3401_v60 = vsel %vm3330_vm3, %v3385_v3, 0.0  ;;  %v3402_v38 = vsel %vm3330_vm3, %v3386_v37, 0.0  ;;  %v3404_v53 = vsel %vm3330_vm3, %v3387_v42, 0.0  ;;  %v3406_v20 = vsel %vm3330_vm3, %v3388_v50, 0.0 }
 0x36a   :  { %v3403_v43 = vadd.f32 %v3402_v38, %v3401_v60  ;;  %v3408_v63 = vsel %vm3330_vm3, %v3389_v26, 0.0  ;;  %v3378_v19 = vsub.f32 %v8253_v62, %v8309_v16  ;;  %v3392_v36 = vmul.f32 %v3376_v32, %v3376_v32 }
 0x36b   :  { %v3410_v6 = vsel %vm3330_vm3, %v3390_v9, 0.0  ;;  %v3379_v4 = vsub.f32 %v8262_v13, %v8309_v16  ;;  %v3393_v59 = vmul.f32 %v3377_v5, %v3377_v5  ;;  %v3412_v49 = vsel %vm3330_vm3, %v3391_v45, 0.0 }
 0x36c   :  { %v3405_v17 = vadd.f32 %v3404_v53, %v3403_v43  ;;  %v3380_v29 = vsub.f32 %v8290_v40, %v8309_v16  ;;  %v3394_v33 = vmul.f32 %v3378_v19, %v3378_v19  ;;  %v3414_v56 = vsel %vm3330_vm3, %v3392_v36, 0.0 }
 0x36d   :  { %v3381_v31 = vsub.f32 %v8299_v7, %v8309_v16  ;;  %v3395_v25 = vmul.f32 %v3379_v4, %v3379_v4  ;;  %v3416_v8 = vsel %vm3330_vm3, %v3393_v59, 0.0  ;;  %v3382_v54 = vsub.f32 %v8286_v48, %v8309_v16  ;;  %v3439_v4 = vld [vmem:[%s9173_s5] sm:$0x1] }
 0x36e   :  { %v3407_v44 = vadd.f32 %v3406_v20, %v3405_v17  ;;  %v3396_v0 = vmul.f32 %v3380_v29, %v3380_v29  ;;  %v3418_v39 = vsel %vm3330_vm3, %v3394_v33, 0.0  ;;  %v3383_v34 = vsub.f32 %v8294_v58, %v8309_v16 }
 0x36f   :  { %v3397_v3 = vmul.f32 %v3381_v31, %v3381_v31  ;;  %v3420_v37 = vsel %vm3330_vm3, %v3395_v25, 0.0  ;;  %v3384_v42 = vsub.f32 %v8124_v22, %v8309_v16  ;;  %v3398_v57 = vmul.f32 %v3382_v54, %v3382_v54 }
 0x370   :  { %v3409_v14 = vadd.f32 %v3408_v63, %v3407_v44  ;;  %v3422_v50 = vsel %vm3330_vm3, %v3396_v0, 0.0  ;;  %v3399_v38 = vmul.f32 %v3383_v34, %v3383_v34 }
 0x371   :  { %v3424_v43 = vsel %vm3330_vm3, %v3397_v3, 0.0  ;;  %v3400_v26 = vmul.f32 %v3384_v42, %v3384_v42  ;;  %v3426_v53 = vsel %vm3330_vm3, %v3398_v57, 0.0 }
 0x372   :  { %v3411_v41 = vadd.f32 %v3410_v6, %v3409_v14  ;;  %v3428_v32 = vsel %vm3330_vm3, %v3399_v38, 0.0 }
 0x373   :  { %v3430_v20 = vsel %vm3330_vm3, %v3400_v26, 0.0  ;;  %v6832_v26 = vld [vmem:[%s9172_s7 + $0x68] sm:$0xff]  }
 0x374   :  { %v3413_v30 = vadd.f32 %v3412_v49, %v3411_v41 }
 0x376   :  { %v3415_v61 = vadd.f32 %v3414_v56, %v3413_v30  ;;  %v3443_v30 = vld [vmem:[%s9174_s6] sm:$0x1] }
 0x378   :  { %v3417_v35 = vadd.f32 %v3416_v8, %v3415_v61 }
 0x37a   :  { %v3419_v2 = vadd.f32 %v3418_v39, %v3417_v35 }
 0x37c   :  { %v3421_v15 = vadd.f32 %v3420_v37, %v3419_v2 }
 0x37e   :  { %v3423_v60 = vadd.f32 %v3422_v50, %v3421_v15 }
 0x380   :  { %v3425_v46 = vadd.f32 %v3424_v43, %v3423_v60 }
 0x382   :  { %v3427_v17 = vadd.f32 %v3426_v53, %v3425_v46 }
 0x384   :  { %v3429_v9 = vadd.f32 %v3428_v32, %v3427_v17 }
 0x386   :  { %v3431_v44 = vadd.f32 %v3430_v20, %v3429_v9  ;;  %v6830_v20 = vld [vmem:[%s9172_s7 + $0x50] sm:$0xff]  }
 0x388   :  { %v3432_v5 = vrot.slane %v3431_v44, 4 }
 0x38a   :  { %v3433_v45 = vadd.f32 %v3432_v5, %v3431_v44  ;;  %v6834_v44 = vld [vmem:[%s9172_s7 + $0x70] sm:$0xff]  }
 0x38c   :  { %v3434_v63 = vrot.slane %v3433_v45, 2 }
 0x38e   :  { %v3435_v14 = vadd.f32 %v3434_v63, %v3433_v45 }
 0x390   :  { %v3436_v19 = vrot.slane %v3435_v14, 1 }
 0x392   :  { %v3437_v36 = vadd.f32 %v3436_v19, %v3435_v14 }
 0x394   :  { %v3438_v6 = vmul.f32 0.0078125, %v3437_v36 }
 0x396   :  { %v3440_v41 = vadd.f32 1e-05, %v3438_v6 }
 0x398   :  { %6858 = vrsqrt.f32 %v3440_v41 }
 0x3a2   :  { %v6859_v59 = vpop.eup %6858 }
 0x3a3   :  { %v3442_v49 = vmul.f32 %v6859_v59, %v3439_v4 }
 0x3a5   :  { %v3444_v29 = vmul.f32 %v3442_v49, %v8309_v16  ;;  %v8367_v33 = vrot.slane %v3442_v49, %v7593_v18  ;;  %v6836_v49 = vld [vmem:[%s9172_s7 + $0x80] sm:$0xff]  }
 0x3a7   :  { %v3445_v56 = vsub.f32 %v3443_v30, %v3444_v29  ;;  %v3452_v31 = vmul.f32 %v8367_v33, %v8208_v10  ;;  %v3453_v25 = vmul.f32 %v8367_v33, %v8194_v28  ;;  %v3454_v8 = vmul.f32 %v8367_v33, %v8199_v12  ;;  %v6839_v30 = vld [vmem:[%s9172_s7 + $0xa0] sm:$0xff]  }
 0x3a8   :  { %v3455_v35 = vmul.f32 %v8367_v33, %v8233_v23  ;;  %v3456_v16 = vmul.f32 %v8367_v33, %v8242_v55  ;;  %v3457_v54 = vmul.f32 %v8367_v33, %v8227_v1  ;;  %v3458_v55 = vmul.f32 %v8367_v33, %v8237_v11 }
 0x3a9   :  { %v8370_v61 = vrot.slane %v3445_v56, %v7593_v18  ;;  %v3459_v1 = vmul.f32 %v8367_v33, %v8083_v21  ;;  %v3460_v50 = vmul.f32 %v8367_v33, %v8265_v27  ;;  %v3461_v60 = vmul.f32 %v8367_v33, %v8253_v62  ;;  %v6829_v27 = vld [vmem:[%s9172_s7 + $0x48] sm:$0xff]  }
 0x3aa   :  { %v3462_v5 = vmul.f32 %v8367_v33, %v8262_v13  ;;  %v3465_v45 = vmul.f32 %v8367_v33, %v8286_v48  ;;  %v6835_v48 = vld [vmem:[%s9172_s7 + $0x78] sm:$0xff]   ;;  %v3466_v29 = vmul.f32 %v8367_v33, %v8294_v58  ;;  %v3467_v56 = vmul.f32 %v8367_v33, %v8124_v22 }
 0x3ab   :  { %v3474_v0 = vadd.f32 %v8370_v61, %v3452_v31  ;;  %v3475_v39 = vadd.f32 %v8370_v61, %v3453_v25  ;;  %v3476_v10 = vadd.f32 %v8370_v61, %v3454_v8  ;;  %v3477_v28 = vadd.f32 %v8370_v61, %v3455_v35 }
 0x3ac   :  { %v3478_v2 = vadd.f32 %v8370_v61, %v3456_v16  ;;  %v3479_v12 = vadd.f32 %v8370_v61, %v3457_v54  ;;  %v3480_v43 = vadd.f32 %v8370_v61, %v3458_v55  ;;  %v3481_v11 = vadd.f32 %v8370_v61, %v3459_v1  ;;  %v6840_v16 = vld [vmem:[%s9172_s7 + $0xa8] sm:$0xff]   ;;  %v6838_v54 = vld [vmem:[%s9172_s7 + $0x90] sm:$0xff]   ;;  %v6849_v1 = vld [vmem:[%s9172_s7 + $0xd8] sm:$0xff]  }
 0x3ad   :  { %v3490_v34 = vmax.f32 %v3474_v0, 0.0  ;;  %v3491_v23 = vmax.f32 %v3475_v39, 0.0  ;;  %v3492_v3 = vmax.f32 %v3476_v10, 0.0  ;;  %v3493_v37 = vmax.f32 %v3477_v28, 0.0  ;;  %v6842_v0 = vld [vmem:[%s9172_s7 + $0xb0] sm:$0xff]   ;;  %v6841_v39 = vld [vmem:[%s9172_s7 + $0x98] sm:$0xff]  }
 0x3ae   :  { %v3494_v15 = vmax.f32 %v3478_v2, 0.0  ;;  %v3495_v42 = vmax.f32 %v3479_v12, 0.0  ;;  %v3482_v62 = vadd.f32 %v8370_v61, %v3460_v50  ;;  %v3483_v46 = vadd.f32 %v8370_v61, %v3461_v60  ;;  %v6843_v10 = vld [vmem:[%s9172_s7 + $0xb8] sm:$0xff]   ;;  %v6844_v28 = vld [vmem:[%s9172_s7 + $0xc0] sm:$0xff]   ;;  %v6845_v12 = vld [vmem:[%s9172_s7 + $0xc8] sm:$0xff]  }
 0x3af   :  { %v8394_v57 = vpack.c.bf16 %v3491_v23, %v3490_v34  ;;  %v8400_v38 = vpack.c.bf16 %v3493_v37, %v3492_v3  ;;  %v3496_v53 = vmax.f32 %v3480_v43, 0.0  ;;  %v3497_v17 = vmax.f32 %v3481_v11, 0.0  ;;  %v6847_v2 = vld [vmem:[%s9172_s7 + $0xe0] sm:$0xff]   ;;  %v6848_v34 = vld [vmem:[%s9172_s7 + $0xe8] sm:$0xff]   ;;  %v6846_v23 = vld [vmem:[%s9172_s7 + $0xd0] sm:$0xff]  }
 0x3b0   :  { %v8408_v21 = vpack.c.bf16 %v3495_v42, %v3494_v15  ;;  %v3498_v32 = vmax.f32 %v3482_v62, 0.0  ;;  %v3499_v9 = vmax.f32 %v3483_v46, 0.0  ;;  %v3484_v14 = vadd.f32 %v8370_v61, %v3462_v5  ;;  %v6850_v55 = vld [vmem:[%s9172_s7 + $0xf0] sm:$0xff]   ;;  %v6851_v3 = vld [vmem:[%s9172_s7 + $0xf8] sm:$0xff]   ;;  %v6852_v37 = vld [vmem:[%s9172_s7 + $0x100] sm:$0xff]  }
 0x3b1   :  { %6509 = vmatprep.mubr.msk.bf16.mxu0 %vm3330_vm3, %v8394_v57  ;;  %6533 = vmatprep.mubr.msk.bf16.mxu1 %vm3330_vm3, %v8394_v57  ;;  %v8442_v63 = vpack.c.bf16 %v3497_v17, %v3496_v53  ;;  %v3487_v13 = vadd.f32 %v8370_v61, %v3465_v45  ;;  %v3488_v25 = vadd.f32 %v8370_v61, %v3466_v29  ;;  %v6853_v15 = vld [vmem:[%s9172_s7 + $0x108] sm:$0xff]   ;;  %v6854_v42 = vld [vmem:[%s9172_s7 + $0x110] sm:$0xff]   ;;  %v6855_v50 = vld [vmem:[%s9172_s7 + $0x118] sm:$0xff]  }
 0x3b2   :  { %6510 = vmatmul.mubr.msk.bf16.vlgmr.msra.gmra.mrb[136].mxu0 %vm3330_vm3, %v8400_v38  ;;  %6534 = vmatmul.mubr.msk.bf16.vlgmr.msra.gmra.mrb[152].mxu1 %vm3330_vm3, %v8400_v38  ;;  %v8448_v6 = vpack.c.bf16 %v3499_v9, %v3498_v32  ;;  %v3489_v8 = vadd.f32 %v8370_v61, %v3467_v56 }
 0x3b3   :  { %6513 = vmatprep.mubr.msk.bf16.mxu0 %vm3330_vm3, %v8408_v21  ;;  %6537 = vmatprep.mubr.msk.bf16.mxu1 %vm3330_vm3, %v8408_v21  ;;  %v3503_v59 = vmax.f32 %v3487_v13, 0.0  ;;  %v3504_v22 = vmax.f32 %v3488_v25, 0.0 }
 0x3b4   :  { %6550 = vmatpush3.bf16.msra.mxu0 %v8219_v51  ;;  %6574 = vmatpush3.bf16.msra.mxu1 %v8276_v24  ;;  %v3463_v51 = vmul.f32 %v8367_v33, %v8290_v40  ;;  %v3464_v24 = vmul.f32 %v8367_v33, %v8299_v7  ;;  %v6833_v40 = vld [vmem:[%s9172_s7 + $0x58] sm:$0xff]   ;;  %v3500_v7 = vmax.f32 %v3484_v14, 0.0  ;;  %v3505_v58 = vmax.f32 %v3489_v8, 0.0 }
 0x3b5   :  { %6551 = vmatprep.subr.bf16.mxu0 %v6829_v27  ;;  %6575 = vmatprep.subr.bf16.mxu1 %v6832_v26 }
 0x3b6   :  { %v3485_v19 = vadd.f32 %v8370_v61, %v3463_v51  ;;  %v3486_v36 = vadd.f32 %v8370_v61, %v3464_v24  ;;  %v8488_v33 = vpack.c.bf16 %v3505_v58, %v3504_v22  ;;  %v6837_v61 = vld [vmem:[%s9172_s7 + $0x88] sm:$0xff]  }
 0x3b8   :  { %6552 = vmatpush3.bf16.msra.mxu0 %v6829_v27  ;;  %6576 = vmatpush3.bf16.msra.mxu1 %v6832_v26  ;;  %v3501_v41 = vmax.f32 %v3485_v19, 0.0  ;;  %v3502_v4 = vmax.f32 %v3486_v36, 0.0 }
 0x3b9   :  { %6553 = vmatprep.subr.bf16.mxu0 %v6830_v20  ;;  %6577 = vmatprep.subr.bf16.mxu1 %v6834_v44 }
 0x3ba   :  { %6514 = vmatmul.mubr.msk.bf16.gmra.mrb[140].mxu0 %vm3330_vm3, %v8442_v63  ;;  %6538 = vmatmul.mubr.msk.bf16.gmra.mrb[156].mxu1 %vm3330_vm3, %v8442_v63  ;;  %v8474_v31 = vpack.c.bf16 %v3501_v41, %v3500_v7  ;;  %v8478_v35 = vpack.c.bf16 %v3503_v59, %v3502_v4 }
 0x3bb   :  { %6517 = vmatprep.mubr.msk.bf16.mxu0 %vm3330_vm3, %v8448_v6  ;;  %6541 = vmatprep.mubr.msk.bf16.mxu1 %vm3330_vm3, %v8448_v6 }
 0x3bc   :  { %6554 = vmatpush3.bf16.msra.mxu0 %v6830_v20  ;;  %6578 = vmatpush3.bf16.msra.mxu1 %v6834_v44 }
 0x3bd   :  { %6555 = vmatprep.subr.bf16.mxu0 %v6833_v40  ;;  %6579 = vmatprep.subr.bf16.mxu1 %v6835_v48 }
 0x3c0   :  { %6556 = vmatpush3.bf16.msra.mxu0 %v6833_v40  ;;  %6580 = vmatpush3.bf16.msra.mxu1 %v6835_v48 }
 0x3c1   :  { %6597 = vmatprep.subr.bf16.mxu0 %v6836_v49  ;;  %6621 = vmatprep.subr.bf16.mxu1 %v6839_v30 }
 0x3c2   :  { %6518 = vmatmul.mubr.msk.bf16.gmra.mrb[144].mxu0 %vm3330_vm3, %v8474_v31  ;;  %6542 = vmatmul.mubr.msk.bf16.gmra.mrb[160].mxu1 %vm3330_vm3, %v8474_v31 }
 0x3c3   :  { %6521 = vmatprep.mubr.msk.bf16.mxu0 %vm3330_vm3, %v8478_v35  ;;  %6545 = vmatprep.mubr.msk.bf16.mxu1 %vm3330_vm3, %v8478_v35 }
 0x3ca   :  { %6522 = vmatmul.mubr.msk.bf16.gmra.mrb[148].mxu0 %vm3330_vm3, %v8488_v33  ;;  %6546 = vmatmul.mubr.msk.bf16.gmra.mrb[164].mxu1 %vm3330_vm3, %v8488_v33 }
 0x3cb   :  { %6557 = vmatprep.mubr.msk.bf16.mxu0 %vm3330_vm3, %v8394_v57  ;;  %6581 = vmatprep.mubr.msk.bf16.mxu1 %vm3330_vm3, %v8394_v57 }
 0x3d2   :  { %6558 = vmatmul.mubr.msk.bf16.vlgmr.msra.gmra.mrb[152].mxu0 %vm3330_vm3, %v8400_v38  ;;  %6582 = vmatmul.mubr.msk.bf16.vlgmr.msra.gmra.mrb[168].mxu1 %vm3330_vm3, %v8400_v38 }
 0x3d3   :  { %6561 = vmatprep.mubr.msk.bf16.mxu0 %vm3330_vm3, %v8408_v21  ;;  %6585 = vmatprep.mubr.msk.bf16.mxu1 %vm3330_vm3, %v8408_v21 }
 0x3d4   :  { %6598 = vmatpush3.bf16.msra.mxu0 %v6836_v49  ;;  %6622 = vmatpush3.bf16.msra.mxu1 %v6839_v30 }
 0x3d5   :  { %6599 = vmatprep.subr.bf16.mxu0 %v6837_v61  ;;  %6623 = vmatprep.subr.bf16.mxu1 %v6840_v16 }
 0x3d8   :  { %6600 = vmatpush3.bf16.msra.mxu0 %v6837_v61  ;;  %6624 = vmatpush3.bf16.msra.mxu1 %v6840_v16 }
 0x3d9   :  { %6601 = vmatprep.subr.bf16.mxu0 %v6838_v54  ;;  %6625 = vmatprep.subr.bf16.mxu1 %v6842_v0 }
 0x3da   :  { %6562 = vmatmul.mubr.msk.bf16.gmra.mrb[156].mxu0 %vm3330_vm3, %v8442_v63  ;;  %6586 = vmatmul.mubr.msk.bf16.gmra.mrb[172].mxu1 %vm3330_vm3, %v8442_v63 }
 0x3db   :  { %6565 = vmatprep.mubr.msk.bf16.mxu0 %vm3330_vm3, %v8448_v6  ;;  %6589 = vmatprep.mubr.msk.bf16.mxu1 %vm3330_vm3, %v8448_v6 }
 0x3dc   :  { %6602 = vmatpush3.bf16.msra.mxu0 %v6838_v54  ;;  %6626 = vmatpush3.bf16.msra.mxu1 %v6842_v0 }
 0x3dd   :  { %6603 = vmatprep.subr.bf16.mxu0 %v6841_v39  ;;  %6627 = vmatprep.subr.bf16.mxu1 %v6843_v10 }
 0x3e0   :  { %6604 = vmatpush3.bf16.msra.mxu0 %v6841_v39  ;;  %6628 = vmatpush3.bf16.msra.mxu1 %v6843_v10 }
 0x3e1   :  { %6645 = vmatprep.subr.bf16.mxu0 %v6844_v28  ;;  %6669 = vmatprep.subr.bf16.mxu1 %v6847_v2 }
 0x3e2   :  { %6566 = vmatmul.mubr.msk.bf16.gmra.mrb[160].mxu0 %vm3330_vm3, %v8474_v31  ;;  %6590 = vmatmul.mubr.msk.bf16.gmra.mrb[176].mxu1 %vm3330_vm3, %v8474_v31 }
 0x3e3   :  { %6569 = vmatprep.mubr.msk.bf16.mxu0 %vm3330_vm3, %v8478_v35  ;;  %6593 = vmatprep.mubr.msk.bf16.mxu1 %vm3330_vm3, %v8478_v35 }
 0x3ea   :  { %6570 = vmatmul.mubr.msk.bf16.gmra.mrb[164].mxu0 %vm3330_vm3, %v8488_v33  ;;  %6594 = vmatmul.mubr.msk.bf16.gmra.mrb[180].mxu1 %vm3330_vm3, %v8488_v33 }
 0x3eb   :  { %6605 = vmatprep.mubr.msk.bf16.mxu0 %vm3330_vm3, %v8394_v57  ;;  %6629 = vmatprep.mubr.msk.bf16.mxu1 %vm3330_vm3, %v8394_v57 }
 0x3f2   :  { %6606 = vmatmul.mubr.msk.bf16.vlgmr.msra.gmra.mrb[168].mxu0 %vm3330_vm3, %v8400_v38  ;;  %6630 = vmatmul.mubr.msk.bf16.vlgmr.msra.gmra.mrb[184].mxu1 %vm3330_vm3, %v8400_v38 }
 0x3f3   :  { %6609 = vmatprep.mubr.msk.bf16.mxu0 %vm3330_vm3, %v8408_v21  ;;  %6633 = vmatprep.mubr.msk.bf16.mxu1 %vm3330_vm3, %v8408_v21 }
 0x3f4   :  { %6646 = vmatpush3.bf16.msra.mxu0 %v6844_v28  ;;  %6670 = vmatpush3.bf16.msra.mxu1 %v6847_v2 }
 0x3f5   :  { %6647 = vmatprep.subr.bf16.mxu0 %v6845_v12  ;;  %6671 = vmatprep.subr.bf16.mxu1 %v6848_v34 }
 0x3f8   :  { %6648 = vmatpush3.bf16.msra.mxu0 %v6845_v12  ;;  %6672 = vmatpush3.bf16.msra.mxu1 %v6848_v34 }
 0x3f9   :  { %6649 = vmatprep.subr.bf16.mxu0 %v6846_v23  ;;  %6673 = vmatprep.subr.bf16.mxu1 %v6850_v55 }
 0x3fa   :  { %6610 = vmatmul.mubr.msk.bf16.gmra.mrb[172].mxu0 %vm3330_vm3, %v8442_v63  ;;  %6634 = vmatmul.mubr.msk.bf16.gmra.mrb[188].mxu1 %vm3330_vm3, %v8442_v63 }
 0x3fb   :  { %6613 = vmatprep.mubr.msk.bf16.mxu0 %vm3330_vm3, %v8448_v6  ;;  %6637 = vmatprep.mubr.msk.bf16.mxu1 %vm3330_vm3, %v8448_v6 }
 0x3fc   :  { %6650 = vmatpush3.bf16.msra.mxu0 %v6846_v23  ;;  %6674 = vmatpush3.bf16.msra.mxu1 %v6850_v55 }
 0x3fd   :  { %6651 = vmatprep.subr.bf16.mxu0 %v6849_v1  ;;  %6675 = vmatprep.subr.bf16.mxu1 %v6851_v3 }
 0x400   :  { %6652 = vmatpush3.bf16.msra.mxu0 %v6849_v1  ;;  %6676 = vmatpush3.bf16.msra.mxu1 %v6851_v3 }
 0x401   :  { %6693 = vmatprep.subr.bf16.mxu0 %v6852_v37 }
 0x402   :  { %6614 = vmatmul.mubr.msk.bf16.gmra.mrb[176].mxu0 %vm3330_vm3, %v8474_v31  ;;  %6638 = vmatmul.mubr.msk.bf16.gmra.mrb[192].mxu1 %vm3330_vm3, %v8474_v31 }
 0x403   :  { %6617 = vmatprep.mubr.msk.bf16.mxu0 %vm3330_vm3, %v8478_v35  ;;  %6641 = vmatprep.mubr.msk.bf16.mxu1 %vm3330_vm3, %v8478_v35 }
 0x40a   :  { %6618 = vmatmul.mubr.msk.bf16.gmra.mrb[180].mxu0 %vm3330_vm3, %v8488_v33  ;;  %6642 = vmatmul.mubr.msk.bf16.gmra.mrb[196].mxu1 %vm3330_vm3, %v8488_v33 }
 0x40b   :  { %6653 = vmatprep.mubr.msk.bf16.mxu0 %vm3330_vm3, %v8394_v57  ;;  %6677 = vmatprep.mubr.msk.bf16.mxu1 %vm3330_vm3, %v8394_v57 }
 0x412   :  { %6654 = vmatmul.mubr.msk.bf16.vlgmr.msra.gmra.mrb[184].mxu0 %vm3330_vm3, %v8400_v38  ;;  %6678 = vmatmul.mubr.msk.bf16.vlgmr.msra.gmra.mrb[200].mxu1 %vm3330_vm3, %v8400_v38 }
 0x413   :  { %6657 = vmatprep.mubr.msk.bf16.mxu0 %vm3330_vm3, %v8408_v21  ;;  %6681 = vmatprep.mubr.msk.bf16.mxu1 %vm3330_vm3, %v8408_v21 }
 0x414   :  { %6694 = vmatpush3.bf16.msra.mxu0 %v6852_v37 }
 0x415   :  { %6695 = vmatprep.subr.bf16.mxu0 %v6853_v15 }
 0x418   :  { %6696 = vmatpush3.bf16.msra.mxu0 %v6853_v15 }
 0x419   :  { %6697 = vmatprep.subr.bf16.mxu0 %v6854_v42 }
 0x41a   :  { %6658 = vmatmul.mubr.msk.bf16.gmra.mrb[188].mxu0 %vm3330_vm3, %v8442_v63  ;;  %6682 = vmatmul.mubr.msk.bf16.gmra.mrb[204].mxu1 %vm3330_vm3, %v8442_v63 }
 0x41b   :  { %6661 = vmatprep.mubr.msk.bf16.mxu0 %vm3330_vm3, %v8448_v6  ;;  %6685 = vmatprep.mubr.msk.bf16.mxu1 %vm3330_vm3, %v8448_v6 }
 0x41c   :  { %6698 = vmatpush3.bf16.msra.mxu0 %v6854_v42 }
 0x41d   :  { %6699 = vmatprep.subr.bf16.mxu0 %v6855_v50 }
 0x420   :  { %6700 = vmatpush3.bf16.msra.mxu0 %v6855_v50 }
 0x422   :  { %6662 = vmatmul.mubr.msk.bf16.gmra.mrb[192].mxu0 %vm3330_vm3, %v8474_v31  ;;  %6686 = vmatmul.mubr.msk.bf16.gmra.mrb[208].mxu1 %vm3330_vm3, %v8474_v31 }
 0x423   :  { %6665 = vmatprep.mubr.msk.bf16.mxu0 %vm3330_vm3, %v8478_v35  ;;  %6689 = vmatprep.mubr.msk.bf16.mxu1 %vm3330_vm3, %v8478_v35 }
 0x42a   :  { %6666 = vmatmul.mubr.msk.bf16.gmra.mrb[196].mxu0 %vm3330_vm3, %v8488_v33  ;;  %6690 = vmatmul.mubr.msk.bf16.gmra.mrb[212].mxu1 %vm3330_vm3, %v8488_v33 }
 0x42b   :  { %6701 = vmatprep.mubr.msk.bf16.mxu0 %vm3330_vm3, %v8394_v57 }
 0x432   :  { %6702 = vmatmul.mubr.msk.bf16.vlgmr.msra.gmra.mrb[200].mxu0 %vm3330_vm3, %v8400_v38 }
 0x433   :  { %6705 = vmatprep.mubr.msk.bf16.mxu0 %vm3330_vm3, %v8408_v21 }
 0x43a   :  { %6706 = vmatmul.mubr.msk.bf16.gmra.mrb[204].mxu0 %vm3330_vm3, %v8442_v63 }
 0x43b   :  { %6709 = vmatprep.mubr.msk.bf16.mxu0 %vm3330_vm3, %v8448_v6 }
 0x442   :  { %6710 = vmatmul.mubr.msk.bf16.gmra.mrb[208].mxu0 %vm3330_vm3, %v8474_v31 }
 0x443   :  { %6713 = vmatprep.mubr.msk.bf16.mxu0 %vm3330_vm3, %v8478_v35 }
 0x44a   :  { %6714 = vmatmul.mubr.msk.bf16.gmra.mrb[212].mxu0 %vm3330_vm3, %v8488_v33 }
 0x485   :  { %v6511_v57 = vpop.f32.mrb[136].mxu0  ;;  %v6535_v60 = vpop.f32.mrb[152].mxu1 }
 0x486   :  { %v3667_v38 = vrot.slane %v6511_v57, 7  ;;  %v3604_v43 = vpop.f32.mrb[137].mxu0  ;;  %v3760_v11 = vpop.f32.mrb[153].mxu1 }
 0x487   :  { %v3665_v21 = vrot.slane %v3604_v43, 7  ;;  %v6512_v27 = vpop.f32.mrb[138].mxu0  ;;  %v6536_v62 = vpop.f32.mrb[154].mxu1 }
 0x488   :  { %v3681_v46 = vmul.f32 %v7173_v47, %v3667_v38  ;;  %v3668_v26 = vrot.slane %v6512_v27, 7  ;;  %v3607_v53 = vpop.f32.mrb[139].mxu0  ;;  %v3763_v17 = vpop.f32.mrb[155].mxu1 }
 0x489   :  { %v3679_v32 = vmul.f32 %v7173_v47, %v3665_v21  ;;  %v3666_v9 = vrot.slane %v3607_v53, 7 }
 0x48a   :  { %v8662_v20 = vadd.f32 %v6535_v60, %v3681_v46  ;;  %v3682_v44 = vmul.f32 %v7173_v47, %v3668_v26 }
 0x48b   :  { %v8665_v5 = vadd.f32 %v3760_v11, %v3679_v32  ;;  %v3680_v51 = vmul.f32 %v7173_v47, %v3666_v9 }
 0x48c   :  { %v8668_v24 = vadd.f32 %v6536_v62, %v3682_v44 }
 0x48d   :  { %v8670_v45 = vadd.f32 %v3763_v17, %v3680_v51  ;;  %v6515_v63 = vpop.f32.mrb[140].mxu0  ;;  %v6539_v14 = vpop.f32.mrb[156].mxu1 }
 0x48e   :  { %v3671_v19 = vrot.slane %v6515_v63, 7  ;;  %v3620_v36 = vpop.f32.mrb[141].mxu0  ;;  %v3776_v13 = vpop.f32.mrb[157].mxu1 }
 0x48f   :  { %v3669_v6 = vrot.slane %v3620_v36, 7  ;;  %v6516_v40 = vpop.f32.mrb[142].mxu0  ;;  %v6540_v48 = vpop.f32.mrb[158].mxu1 }
 0x490   :  { %v3685_v7 = vmul.f32 %v7173_v47, %v3671_v19  ;;  %v3623_v41 = vpop.f32.mrb[143].mxu0  ;;  %v3779_v4 = vpop.f32.mrb[159].mxu1 }
 0x491   :  { %v3683_v59 = vmul.f32 %v7173_v47, %v3669_v6  ;;  %v3670_v49 = vrot.slane %v3623_v41, 7 }
 0x492   :  { %v8674_v30 = vadd.f32 %v6539_v14, %v3685_v7 }
 0x493   :  { %v8676_v29 = vadd.f32 %v3776_v13, %v3683_v59  ;;  %v3684_v56 = vmul.f32 %v7173_v47, %v3670_v49 }
 0x495   :  { %v8679_v31 = vadd.f32 %v3779_v4, %v3684_v56  ;;  %v6519_v25 = vpop.f32.mrb[144].mxu0  ;;  %v6543_v8 = vpop.f32.mrb[160].mxu1  ;;  %v15_v56 = vstv %s9175_s8 }
 0x496   :  { %v3674_v35 = vrot.slane %v6519_v25, 7  ;;  %v3635_v22 = vpop.f32.mrb[145].mxu0  ;;  %v3791_v58 = vpop.f32.mrb[161].mxu1  ;;  %16 = vst [vmem:[#allocation2] sm:$0x1] %v15_v56 }
 0x497   :  { %v3672_v33 = vrot.slane %v3635_v22, 7  ;;  %v6520_v61 = vpop.f32.mrb[146].mxu0  ;;  %v6544_v16 = vpop.f32.mrb[162].mxu1 }
 0x498   :  { %v3688_v54 = vmul.f32 %v7173_v47, %v3674_v35  ;;  %v3675_v0 = vrot.slane %v6520_v61, 7  ;;  %v3638_v39 = vpop.f32.mrb[147].mxu0  ;;  %v3794_v10 = vpop.f32.mrb[163].mxu1  ;;  %v17_v35 = vstv %s9176_s9 }
 0x499   :  { %v3686_v28 = vmul.f32 %v7173_v47, %v3672_v33  ;;  %v3673_v2 = vrot.slane %v3638_v39, 7  ;;  %18 = vst [vmem:[#allocation3] sm:$0x1] %v17_v35 }
 0x49a   :  { %v8683_v12 = vadd.f32 %v6543_v8, %v3688_v54  ;;  %v3689_v34 = vmul.f32 %v7173_v47, %v3675_v0 }
 0x49b   :  { %v8686_v23 = vadd.f32 %v3791_v58, %v3686_v28  ;;  %v3687_v55 = vmul.f32 %v7173_v47, %v3673_v2 }
 0x49c   :  { %v8689_v1 = vadd.f32 %v6544_v16, %v3689_v34 }
 0x49d   :  { %v8691_v3 = vadd.f32 %v3794_v10, %v3687_v55  ;;  %v6523_v37 = vpop.f32.mrb[148].mxu0  ;;  %v6547_v15 = vpop.f32.mrb[164].mxu1 }
 0x49e   :  { %v3678_v42 = vrot.slane %v6523_v37, 7  ;;  %v3651_v50 = vpop.f32.mrb[149].mxu0  ;;  %v3807_v57 = vpop.f32.mrb[165].mxu1 }
 0x49f   :  { %v3676_v60 = vrot.slane %v3651_v50, 7  ;;  %v6524_v38 = vpop.f32.mrb[150].mxu0  ;;  %v6548_v43 = vpop.f32.mrb[166].mxu1 }
 0x4a0   :  { %v3692_v11 = vmul.f32 %v7173_v47, %v3678_v42  ;;  %v3654_v21 = vpop.f32.mrb[151].mxu0  ;;  %v3810_v27 = vpop.f32.mrb[167].mxu1 }
 0x4a1   :  { %v3690_v62 = vmul.f32 %v7173_v47, %v3676_v60  ;;  %v3677_v46 = vrot.slane %v3654_v21, 7 }
 0x4a2   :  { %v8695_v26 = vadd.f32 %v6547_v15, %v3692_v11 }
 0x4a3   :  { %v8697_v53 = vadd.f32 %v3807_v57, %v3690_v62  ;;  %v3691_v17 = vmul.f32 %v7173_v47, %v3677_v46 }
 0x4a5   :  { %v8700_v32 = vadd.f32 %v3810_v27, %v3691_v17  ;;  %v6559_v9 = vpop.f32.mrb[152].mxu0  ;;  %v8702_v44 = vpop.f32.mrb[168].mxu1 }
 0x4a6   :  { %v3965_v51 = vrot.slane %v6559_v9, 1  ;;  %v3902_v63 = vpop.f32.mrb[153].mxu0  ;;  %v8704_v14 = vpop.f32.mrb[169].mxu1 }
 0x4a7   :  { %v3963_v19 = vrot.slane %v3902_v63, 1  ;;  %v6560_v36 = vpop.f32.mrb[154].mxu0  ;;  %v8706_v13 = vpop.f32.mrb[170].mxu1 }
 0x4a8   :  { %v3979_v6 = vmul.f32 %v7177_v52, %v3965_v51  ;;  %v3966_v40 = vrot.slane %v6560_v36, 1  ;;  %v3905_v48 = vpop.f32.mrb[155].mxu0  ;;  %v8709_v7 = vpop.f32.mrb[171].mxu1 }
 0x4a9   :  { %v3977_v41 = vmul.f32 %v7177_v52, %v3963_v19  ;;  %v3964_v4 = vrot.slane %v3905_v48, 1 }
 0x4aa   :  { %v8713_v59 = vadd.f32 %v3979_v6, %v8662_v20  ;;  %v3980_v49 = vmul.f32 %v7177_v52, %v3966_v40 }
 0x4ab   :  { %v8720_v25 = vadd.f32 %v3977_v41, %v8665_v5  ;;  %v3978_v8 = vmul.f32 %v7177_v52, %v3964_v4 }
 0x4ac   :  { %v8727_v22 = vadd.f32 %v3980_v49, %v8668_v24 }
 0x4ad   :  { %v8730_v20 = vadd.f32 %v3978_v8, %v8670_v45  ;;  %v6563_v58 = vpop.f32.mrb[156].mxu0  ;;  %v8732_v33 = vpop.f32.mrb[172].mxu1 }
 0x4ae   :  { %v3969_v61 = vrot.slane %v6563_v58, 1  ;;  %v3918_v5 = vpop.f32.mrb[157].mxu0  ;;  %v8734_v16 = vpop.f32.mrb[173].mxu1 }
 0x4af   :  { %v3967_v54 = vrot.slane %v3918_v5, 1  ;;  %v6564_v0 = vpop.f32.mrb[158].mxu0  ;;  %v8736_v39 = vpop.f32.mrb[174].mxu1  ;;  %v4138_v5 = vrot.slane %v8706_v13, 7 }
 0x4b0   :  { %v3983_v10 = vmul.f32 %v7177_v52, %v3969_v61  ;;  %v3921_v28 = vpop.f32.mrb[159].mxu0  ;;  %v8739_v24 = vpop.f32.mrb[175].mxu1  ;;  %v4136_v0 = vrot.slane %v8709_v7, 7 }
 0x4b1   :  { %v3981_v2 = vmul.f32 %v7177_v52, %v3967_v54  ;;  %v3968_v45 = vrot.slane %v3921_v28, 1  ;;  %v4154_v7 = vmul.f32 %v7173_v47, %v4138_v5 }
 0x4b2   :  { %v8743_v34 = vadd.f32 %v3983_v10, %v8674_v30 }
 0x4b3   :  { %v8746_v55 = vadd.f32 %v3981_v2, %v8676_v29  ;;  %v3982_v37 = vmul.f32 %v7177_v52, %v3968_v45 }
 0x4b5   :  { %v8750_v15 = vadd.f32 %v3982_v37, %v8679_v31  ;;  %v6567_v42 = vpop.f32.mrb[160].mxu0  ;;  %v8752_v50 = vpop.f32.mrb[176].mxu1 }
 0x4b6   :  { %v3972_v57 = vrot.slane %v6567_v42, 1  ;;  %v3933_v60 = vpop.f32.mrb[161].mxu0  ;;  %v8754_v38 = vpop.f32.mrb[177].mxu1 }
 0x4b7   :  { %v3970_v43 = vrot.slane %v3933_v60, 1  ;;  %v6568_v11 = vpop.f32.mrb[162].mxu0  ;;  %v8756_v21 = vpop.f32.mrb[178].mxu1 }
 0x4b8   :  { %v3986_v30 = vmul.f32 %v7177_v52, %v3972_v57  ;;  %v3973_v29 = vrot.slane %v6568_v11, 1  ;;  %v3936_v27 = vpop.f32.mrb[163].mxu0  ;;  %v8759_v62 = vpop.f32.mrb[179].mxu1 }
 0x4b9   :  { %v3984_v31 = vmul.f32 %v7177_v52, %v3970_v43  ;;  %v3971_v46 = vrot.slane %v3936_v27, 1 }
 0x4ba   :  { %v8763_v17 = vadd.f32 %v3986_v30, %v8683_v12  ;;  %v3987_v9 = vmul.f32 %v7177_v52, %v3973_v29  ;;  %v4152_v30 = vmul.f32 %v7173_v47, %v4136_v0  ;;  %v4141_v29 = vrot.slane %v8732_v33, 7 }
 0x4bb   :  { %v8767_v51 = vadd.f32 %v3984_v31, %v8686_v23  ;;  %v3985_v63 = vmul.f32 %v7177_v52, %v3971_v46  ;;  %v4137_v23 = vrot.slane %v8702_v44, 7 }
 0x4bc   :  { %v8771_v19 = vadd.f32 %v3987_v9, %v8689_v1 }
 0x4bd   :  { %v8774_v36 = vadd.f32 %v3985_v63, %v8691_v3  ;;  %v6571_v6 = vpop.f32.mrb[164].mxu0  ;;  %v8776_v40 = vpop.f32.mrb[180].mxu1  ;;  %v4135_v3 = vrot.slane %v8704_v14, 7  ;;  %v4153_v28 = vmul.f32 %v7173_v47, %v4137_v23  ;;  %v4139_v63 = vrot.slane %v8734_v16, 7 }
 0x4be   :  { %v3976_v48 = vrot.slane %v6571_v6, 1  ;;  %v3949_v41 = vpop.f32.mrb[165].mxu0  ;;  %v8778_v12 = vpop.f32.mrb[181].mxu1  ;;  %v4157_v16 = vmul.f32 %v7173_v47, %v4141_v29  ;;  %v4143_v29 = vrot.slane %v8754_v38, 7 }
 0x4bf   :  { %v3974_v4 = vrot.slane %v3949_v41, 1  ;;  %v6572_v49 = vpop.f32.mrb[166].mxu0  ;;  %v8780_v56 = vpop.f32.mrb[182].mxu1  ;;  %v4151_v37 = vmul.f32 %v7173_v47, %v4135_v3 }
 0x4c0   :  { %v3990_v8 = vmul.f32 %v7177_v52, %v3976_v48  ;;  %v3952_v1 = vpop.f32.mrb[167].mxu0  ;;  %v8784_v35 = vpop.f32.mrb[183].mxu1 }
 0x4c1   :  { %v3988_v58 = vmul.f32 %v7177_v52, %v3974_v4  ;;  %v3975_v61 = vrot.slane %v3952_v1, 1  ;;  %v4142_v4 = vrot.slane %v8736_v39, 7  ;;  %v4155_v39 = vmul.f32 %v7173_v47, %v4139_v63 }
 0x4c2   :  { %v8790_v54 = vadd.f32 %v3990_v8, %v8695_v26  ;;  %v4140_v8 = vrot.slane %v8739_v24, 7  ;;  %v4144_v63 = vrot.slane %v8759_v62, 7 }
 0x4c3   :  { %v8794_v10 = vadd.f32 %v3988_v58, %v8697_v53  ;;  %v3989_v44 = vmul.f32 %v7177_v52, %v3975_v61 }
 0x4c5   :  { %v8799_v2 = vadd.f32 %v3989_v44, %v8700_v32  ;;  %v6607_v14 = vpop.f32.mrb[168].mxu0  ;;  %v6631_v45 = vpop.f32.mrb[184].mxu1 }
 0x4c6   :  { %v4299_v13 = vadd.f32 %v6607_v14, %v4153_v28  ;;  %v4445_v42 = vrot.slane %v6631_v45, 1  ;;  %v4234_v26 = vpop.f32.mrb[169].mxu0  ;;  %v4380_v57 = vpop.f32.mrb[185].mxu1 }
 0x4c7   :  { %v4297_v60 = vadd.f32 %v4234_v26, %v4151_v37  ;;  %v4443_v53 = vrot.slane %v4380_v57, 1  ;;  %v6608_v43 = vpop.f32.mrb[170].mxu0  ;;  %v6632_v11 = vpop.f32.mrb[186].mxu1  ;;  %v4158_v37 = vmul.f32 %v7173_v47, %v4142_v4 }
 0x4c8   :  { %v4461_v32 = vmul.f32 %v7177_v52, %v4445_v42  ;;  %v4300_v27 = vadd.f32 %v6608_v43, %v4154_v7  ;;  %v4446_v31 = vrot.slane %v6632_v11, 1  ;;  %v4237_v46 = vpop.f32.mrb[171].mxu0  ;;  %v4383_v9 = vpop.f32.mrb[187].mxu1  ;;  %v4156_v7 = vmul.f32 %v7173_v47, %v4140_v8 }
 0x4c9   :  { %v4459_v6 = vmul.f32 %v7177_v52, %v4443_v53  ;;  %v4298_v48 = vadd.f32 %v4237_v46, %v4152_v30  ;;  %v4444_v41 = vrot.slane %v4383_v9, 1  ;;  %v4159_v8 = vmul.f32 %v7173_v47, %v4143_v29 }
 0x4ca   :  { %v4477_v49 = vadd.f32 %v4461_v32, %v4299_v13  ;;  %v4462_v23 = vmul.f32 %v7177_v52, %v4446_v31  ;;  %v4146_v31 = vrot.slane %v8756_v21, 7 }
 0x4cb   :  { %v8811_v33 = vadd.f32 %v4459_v6, %v4297_v60  ;;  %v4460_v1 = vmul.f32 %v7177_v52, %v4444_v41  ;;  %v4145_v60 = vrot.slane %v8752_v50, 7 }
 0x4cc   :  { %v8815_v3 = vadd.f32 %v4477_v49, %v8730_v20  ;;  %v4478_v58 = vadd.f32 %v4462_v23, %v4300_v27 }
 0x4cd   :  { %v4476_v61 = vadd.f32 %v4460_v1, %v4298_v48  ;;  %v6611_v5 = vpop.f32.mrb[172].mxu0  ;;  %v6635_v0 = vpop.f32.mrb[188].mxu1  ;;  %v4161_v38 = vmul.f32 %v7173_v47, %v4145_v60  ;;  %v4150_v60 = vrot.slane %v8780_v56, 7 }
 0x4ce   :  { %v8820_v44 = vadd.f32 %v4478_v58, %v8713_v59  ;;  %v4303_v28 = vadd.f32 %v6611_v5, %v4157_v16  ;;  %v4449_v24 = vrot.slane %v6635_v0, 1  ;;  %v4250_v14 = vpop.f32.mrb[173].mxu0  ;;  %v4396_v45 = vpop.f32.mrb[189].mxu1 }
 0x4cf   :  { %v8824_v20 = vadd.f32 %v4476_v61, %v8720_v25  ;;  %v4301_v13 = vadd.f32 %v4250_v14, %v4155_v39  ;;  %v4447_v42 = vrot.slane %v4396_v45, 1  ;;  %v6612_v26 = vpop.f32.mrb[174].mxu0  ;;  %v6636_v57 = vpop.f32.mrb[190].mxu1  ;;  %v4149_v14 = vrot.slane %v8776_v40, 7 }
 0x4d0   :  { %v4465_v59 = vmul.f32 %v7177_v52, %v4449_v24  ;;  %v4304_v53 = vadd.f32 %v6612_v26, %v4158_v37  ;;  %v4450_v43 = vrot.slane %v6636_v57, 1  ;;  %v4253_v11 = vpop.f32.mrb[175].mxu0  ;;  %v4399_v30 = vpop.f32.mrb[191].mxu1  ;;  %v4160_v24 = vmul.f32 %v7173_v47, %v4144_v63 }
 0x4d1   :  { %v4463_v32 = vmul.f32 %v7177_v52, %v4447_v42  ;;  %v4302_v25 = vadd.f32 %v4253_v11, %v4156_v7  ;;  %v4448_v27 = vrot.slane %v4399_v30, 1  ;;  %v4147_v26 = vrot.slane %v8778_v12, 7 }
 0x4d2   :  { %v4481_v46 = vadd.f32 %v4465_v59, %v4303_v28  ;;  %v4466_v9 = vmul.f32 %v7177_v52, %v4450_v43  ;;  %v4148_v43 = vrot.slane %v8784_v35, 7  ;;  %v4165_v12 = vmul.f32 %v7173_v47, %v4149_v14 }
 0x4d3   :  { %v4479_v50 = vadd.f32 %v4463_v32, %v4301_v13  ;;  %v4464_v6 = vmul.f32 %v7177_v52, %v4448_v27  ;;  %v4163_v56 = vmul.f32 %v7173_v47, %v4147_v26 }
 0x4d4   :  { %v8836_v48 = vadd.f32 %v4481_v46, %v8750_v15  ;;  %v4482_v41 = vadd.f32 %v4466_v9, %v4304_v53  ;;  %v4162_v15 = vmul.f32 %v7173_v47, %v4146_v31 }
 0x4d5   :  { %v8840_v4 = vadd.f32 %v4479_v50, %v8727_v22  ;;  %v4480_v49 = vadd.f32 %v4464_v6, %v4302_v25  ;;  %v6615_v23 = vpop.f32.mrb[176].mxu0  ;;  %v6639_v21 = vpop.f32.mrb[192].mxu1  ;;  %v4166_v50 = vmul.f32 %v7173_v47, %v4150_v60 }
 0x4d6   :  { %v8844_v1 = vadd.f32 %v4482_v41, %v8743_v34  ;;  %v4307_v62 = vadd.f32 %v6615_v23, %v4161_v38  ;;  %v4453_v58 = vrot.slane %v6639_v21, 1  ;;  %v4266_v16 = vpop.f32.mrb[177].mxu0  ;;  %v4412_v61 = vpop.f32.mrb[193].mxu1  ;;  %v4164_v23 = vmul.f32 %v7173_v47, %v4148_v43 }
 0x4d7   :  { %v8848_v5 = vadd.f32 %v4480_v49, %v8746_v55  ;;  %v4305_v0 = vadd.f32 %v4266_v16, %v4159_v8  ;;  %v4451_v22 = vrot.slane %v4412_v61, 1  ;;  %v6616_v39 = vpop.f32.mrb[178].mxu0  ;;  %v6640_v28 = vpop.f32.mrb[194].mxu1 }
 0x4d8   :  { %v4469_v34 = vmul.f32 %v7177_v52, %v4453_v58  ;;  %v4308_v45 = vadd.f32 %v6616_v39, %v4162_v15  ;;  %v4454_v37 = vrot.slane %v6640_v28, 1  ;;  %v4269_v13 = vpop.f32.mrb[179].mxu0  ;;  %v4415_v42 = vpop.f32.mrb[195].mxu1 }
 0x4d9   :  { %v4467_v57 = vmul.f32 %v7177_v52, %v4451_v22  ;;  %v4306_v55 = vadd.f32 %v4269_v13, %v4160_v24  ;;  %v4452_v7 = vrot.slane %v4415_v42, 1 }
 0x4da   :  { %v4485_v59 = vadd.f32 %v4469_v34, %v4307_v62  ;;  %v4470_v53 = vmul.f32 %v7177_v52, %v4454_v37 }
 0x4db   :  { %v8858_v40 = vadd.f32 %v4467_v57, %v4305_v0  ;;  %v4468_v11 = vmul.f32 %v7177_v52, %v4452_v7 }
 0x4dc   :  { %v8862_v30 = vadd.f32 %v4485_v59, %v8774_v36  ;;  %v4486_v29 = vadd.f32 %v4470_v53, %v4308_v45 }
 0x4dd   :  { %v4484_v32 = vadd.f32 %v4468_v11, %v4306_v55  ;;  %v6619_v25 = vpop.f32.mrb[180].mxu0  ;;  %v6643_v27 = vpop.f32.mrb[196].mxu1 }
 0x4de   :  { %v8867_v31 = vadd.f32 %v4486_v29, %v8763_v17  ;;  %v4311_v46 = vadd.f32 %v6619_v25, %v4165_v12  ;;  %v4457_v35 = vrot.slane %v6643_v27, 1  ;;  %v4282_v9 = vpop.f32.mrb[181].mxu0  ;;  %v4428_v63 = vpop.f32.mrb[197].mxu1 }
 0x4df   :  { %v8871_v36 = vadd.f32 %v4484_v32, %v8767_v51  ;;  %v4309_v6 = vadd.f32 %v4282_v9, %v4163_v56  ;;  %v4455_v41 = vrot.slane %v4428_v63, 1  ;;  %v6620_v38 = vpop.f32.mrb[182].mxu0  ;;  %v6644_v49 = vpop.f32.mrb[198].mxu1 }
 0x4e0   :  { %v4473_v21 = vmul.f32 %v7177_v52, %v4457_v35  ;;  %v4312_v8 = vadd.f32 %v6620_v38, %v4166_v50  ;;  %v4458_v17 = vrot.slane %v6644_v49, 1  ;;  %v4285_v62 = vpop.f32.mrb[183].mxu0  ;;  %v4431_v58 = vpop.f32.mrb[199].mxu1 }
 0x4e1   :  { %v4471_v16 = vmul.f32 %v7177_v52, %v4455_v41  ;;  %v4310_v61 = vadd.f32 %v4285_v62, %v4164_v23  ;;  %v4456_v15 = vrot.slane %v4431_v58, 1 }
 0x4e2   :  { %v4489_v0 = vadd.f32 %v4473_v21, %v4311_v46  ;;  %v4474_v51 = vmul.f32 %v7177_v52, %v4458_v17 }
 0x4e3   :  { %v4487_v22 = vadd.f32 %v4471_v16, %v4309_v6  ;;  %v4472_v39 = vmul.f32 %v7177_v52, %v4456_v15 }
 0x4e4   :  { %v8879_v28 = vadd.f32 %v4489_v0, %v8799_v2  ;;  %v4490_v24 = vadd.f32 %v4474_v51, %v4312_v8 }
 0x4e5   :  { %v8882_v14 = vadd.f32 %v4487_v22, %v8771_v19  ;;  %v4488_v34 = vadd.f32 %v4472_v39, %v4310_v61  ;;  %v6655_v45 = vpop.f32.mrb[184].mxu0  ;;  %v6679_v37 = vpop.f32.mrb[200].mxu1 }
 0x4e6   :  { %v8885_v13 = vadd.f32 %v4490_v24, %v8790_v54  ;;  %v4620_v42 = vrot.slane %v6655_v45, 7  ;;  %v4558_v26 = vpop.f32.mrb[185].mxu0  ;;  %v4714_v57 = vpop.f32.mrb[201].mxu1 }
 0x4e7   :  { %v8888_v55 = vadd.f32 %v4488_v34, %v8794_v10  ;;  %v6656_v7 = vpop.f32.mrb[186].mxu0  ;;  %v6680_v60 = vpop.f32.mrb[202].mxu1 }
 0x4e8   :  { %v4634_v2 = vmul.f32 %v7173_v47, %v4620_v42  ;;  %v4621_v59 = vrot.slane %v6656_v7, 7  ;;  %v4560_v53 = vpop.f32.mrb[187].mxu0  ;;  %v4716_v19 = vpop.f32.mrb[203].mxu1 }
 0x4e9   :  { %v4619_v43 = vrot.slane %v4560_v53, 7 }
 0x4ea   :  { %v8891_v11 = vadd.f32 %v6679_v37, %v4634_v2  ;;  %v4635_v29 = vmul.f32 %v7173_v47, %v4621_v59 }
 0x4eb   :  { %v4633_v54 = vmul.f32 %v7173_v47, %v4619_v43 }
 0x4ec   :  { %v8895_v12 = vadd.f32 %v6680_v60, %v4635_v29 }
 0x4ed   :  { %v8897_v32 = vadd.f32 %v4716_v19, %v4633_v54  ;;  %v6659_v10 = vpop.f32.mrb[188].mxu0  ;;  %v6683_v25 = vpop.f32.mrb[204].mxu1 }
 0x4ee   :  { %v4624_v27 = vrot.slane %v6659_v10, 7  ;;  %v4573_v56 = vpop.f32.mrb[189].mxu0  ;;  %v4729_v46 = vpop.f32.mrb[205].mxu1 }
 0x4ef   :  { %v4622_v35 = vrot.slane %v4573_v56, 7  ;;  %v6660_v9 = vpop.f32.mrb[190].mxu0  ;;  %v6684_v63 = vpop.f32.mrb[206].mxu1 }
 0x4f0   :  { %v4638_v50 = vmul.f32 %v7173_v47, %v4624_v27  ;;  %v4625_v6 = vrot.slane %v6660_v9, 7  ;;  %v4576_v41 = vpop.f32.mrb[191].mxu0  ;;  %v4732_v38 = vpop.f32.mrb[207].mxu1 }
 0x4f1   :  { %v4636_v49 = vmul.f32 %v7173_v47, %v4622_v35  ;;  %v4623_v23 = vrot.slane %v4576_v41, 7 }
 0x4f2   :  { %v8901_v21 = vadd.f32 %v6683_v25, %v4638_v50  ;;  %v4639_v8 = vmul.f32 %v7173_v47, %v4625_v6 }
 0x4f3   :  { %v8904_v17 = vadd.f32 %v4729_v46, %v4636_v49  ;;  %v4637_v62 = vmul.f32 %v7173_v47, %v4623_v23 }
 0x4f4   :  { %v8907_v58 = vadd.f32 %v6684_v63, %v4639_v8 }
 0x4f5   :  { %v8909_v16 = vadd.f32 %v4732_v38, %v4637_v62  ;;  %v6663_v61 = vpop.f32.mrb[192].mxu0  ;;  %v6687_v15 = vpop.f32.mrb[208].mxu1 }
 0x4f6   :  { %v4627_v0 = vrot.slane %v6663_v61, 7  ;;  %v4589_v51 = vpop.f32.mrb[193].mxu0  ;;  %v4745_v22 = vpop.f32.mrb[209].mxu1 }
 0x4f7   :  { %v6664_v39 = vpop.f32.mrb[194].mxu0  ;;  %v6688_v24 = vpop.f32.mrb[210].mxu1 }
 0x4f8   :  { %v4641_v34 = vmul.f32 %v7173_v47, %v4627_v0  ;;  %v4628_v45 = vrot.slane %v6664_v39, 7  ;;  %v4591_v37 = vpop.f32.mrb[195].mxu0  ;;  %v4747_v42 = vpop.f32.mrb[211].mxu1 }
 0x4f9   :  { %v4626_v26 = vrot.slane %v4591_v37, 7 }
 0x4fa   :  { %v8912_v57 = vadd.f32 %v6687_v15, %v4641_v34  ;;  %v4642_v7 = vmul.f32 %v7173_v47, %v4628_v45 }
 0x4fb   :  { %v4640_v60 = vmul.f32 %v7173_v47, %v4626_v26 }
 0x4fc   :  { %v8916_v2 = vadd.f32 %v6688_v24, %v4642_v7 }
 0x4fd   :  { %v8918_v59 = vadd.f32 %v4747_v42, %v4640_v60  ;;  %v6667_v53 = vpop.f32.mrb[196].mxu0  ;;  %v6691_v19 = vpop.f32.mrb[212].mxu1 }
 0x4fe   :  { %v4631_v43 = vrot.slane %v6667_v53, 7  ;;  %v4604_v29 = vpop.f32.mrb[197].mxu0  ;;  %v4760_v54 = vpop.f32.mrb[213].mxu1 }
 0x4ff   :  { %v4629_v10 = vrot.slane %v4604_v29, 7  ;;  %v6668_v25 = vpop.f32.mrb[198].mxu0  ;;  %v6692_v27 = vpop.f32.mrb[214].mxu1 }
 0x500   :  { %v4645_v56 = vmul.f32 %v7173_v47, %v4631_v43  ;;  %v4632_v46 = vrot.slane %v6668_v25, 7  ;;  %v4607_v35 = vpop.f32.mrb[199].mxu0  ;;  %v4763_v9 = vpop.f32.mrb[215].mxu1 }
 0x501   :  { %v4643_v63 = vmul.f32 %v7173_v47, %v4629_v10  ;;  %v4630_v50 = vrot.slane %v4607_v35, 7 }
 0x502   :  { %v8922_v6 = vadd.f32 %v6691_v19, %v4645_v56  ;;  %v4646_v41 = vmul.f32 %v7173_v47, %v4632_v46 }
 0x503   :  { %v8925_v38 = vadd.f32 %v4760_v54, %v4643_v63  ;;  %v4644_v49 = vmul.f32 %v7173_v47, %v4630_v50 }
 0x504   :  { %v8928_v23 = vadd.f32 %v6692_v27, %v4646_v41 }
 0x505   :  { %v8930_v8 = vadd.f32 %v4763_v9, %v4644_v49  ;;  %v6703_v62 = vpop.f32.mrb[200].mxu0 }
 0x506   :  { %v4918_v61 = vrot.slane %v6703_v62, 1  ;;  %v4856_v15 = vpop.f32.mrb[201].mxu0 }
 0x507   :  { %v6704_v0 = vpop.f32.mrb[202].mxu0 }
 0x508   :  { %v4932_v51 = vmul.f32 %v7177_v52, %v4918_v61  ;;  %v4919_v22 = vrot.slane %v6704_v0, 1  ;;  %v4858_v39 = vpop.f32.mrb[203].mxu0 }
 0x509   :  { %v4917_v24 = vrot.slane %v4858_v39, 1 }
 0x50a   :  { %v4946_v34 = vadd.f32 %v4932_v51, %v8891_v11  ;;  %v4933_v45 = vmul.f32 %v7177_v52, %v4919_v22 }
 0x50b   :  { %v4931_v37 = vmul.f32 %v7177_v52, %v4917_v24 }
 0x50c   :  { %v8937_v47 = vadd.f32 %v8824_v20, %v4946_v34  ;;  %v4947_v42 = vadd.f32 %v4933_v45, %v8895_v12 }
 0x50d   :  { %v4945_v26 = vadd.f32 %v4931_v37, %v8897_v32  ;;  %v6707_v7 = vpop.f32.mrb[204].mxu0 }
 0x50e   :  { %v8942_v60 = vadd.f32 %v8815_v3, %v4947_v42  ;;  %v4922_v53 = vrot.slane %v6707_v7, 1  ;;  %v4871_v19 = vpop.f32.mrb[205].mxu0  ;;  %v4993_v12 = vsel %vm4991_vm4, %v8937_v47, 0.0 }
 0x50f   :  { %v8945_v43 = vadd.f32 %v4945_v26, %v8811_v33  ;;  %v4920_v11 = vrot.slane %v4871_v19, 1  ;;  %v6708_v29 = vpop.f32.mrb[206].mxu0 }
 0x510   :  { %v4936_v54 = vmul.f32 %v7177_v52, %v4922_v53  ;;  %v4923_v20 = vrot.slane %v6708_v29, 1  ;;  %v4874_v10 = vpop.f32.mrb[207].mxu0  ;;  %v4995_v50 = vsel %vm4991_vm4, %v8942_v60, 0.0 }
 0x511   :  { %v4992_v32 = vsel %vm4991_vm4, %v8945_v43, 0.0  ;;  %v4934_v3 = vmul.f32 %v7177_v52, %v4920_v11  ;;  %v4921_v25 = vrot.slane %v4874_v10, 1  ;;  %v5005_v10 = vsel %vm4991_vm4, %v8844_v1, 0.0 }
 0x512   :  { %v4994_v27 = vadd.f32 %v4993_v12, %v4992_v32  ;;  %v4950_v33 = vadd.f32 %v4936_v54, %v8901_v21  ;;  %v4937_v56 = vmul.f32 %v7177_v52, %v4923_v20 }
 0x513   :  { %v4948_v46 = vadd.f32 %v4934_v3, %v8904_v17  ;;  %v4935_v35 = vmul.f32 %v7177_v52, %v4921_v25 }
 0x514   :  { %v8958_v9 = vadd.f32 %v8848_v5, %v4950_v33  ;;  %v4951_v63 = vadd.f32 %v4937_v56, %v8907_v58  ;;  %v4996_v62 = vadd.f32 %v4995_v50, %v4994_v27 }
 0x515   :  { %v8964_v41 = vadd.f32 %v8820_v44, %v4948_v46  ;;  %v4949_v49 = vadd.f32 %v4935_v35, %v8909_v16  ;;  %v6711_v21 = vpop.f32.mrb[208].mxu0 }
 0x516   :  { %v8968_v61 = vadd.f32 %v8836_v48, %v4951_v63  ;;  %v4925_v17 = vrot.slane %v6711_v21, 1  ;;  %v4887_v15 = vpop.f32.mrb[209].mxu0  ;;  %v5001_v37 = vsel %vm4991_vm4, %v8958_v9, 0.0 }
 0x517   :  { %v4997_v5 = vsel %vm4991_vm4, %v8964_v41, 0.0  ;;  %v8973_v58 = vadd.f32 %v8840_v4, %v4949_v49  ;;  %v6712_v0 = vpop.f32.mrb[210].mxu0 }
 0x518   :  { %v4998_v51 = vadd.f32 %v4997_v5, %v4996_v62  ;;  %v4939_v44 = vmul.f32 %v7177_v52, %v4925_v17  ;;  %v4926_v22 = vrot.slane %v6712_v0, 1  ;;  %v4889_v39 = vpop.f32.mrb[211].mxu0  ;;  %v5003_v53 = vsel %vm4991_vm4, %v8968_v61, 0.0 }
 0x519   :  { %v4999_v16 = vsel %vm4991_vm4, %v8973_v58, 0.0  ;;  %v4924_v24 = vrot.slane %v4889_v39, 1 }
 0x51a   :  { %v5000_v48 = vadd.f32 %v4999_v16, %v4998_v51  ;;  %v4953_v34 = vadd.f32 %v4939_v44, %v8912_v57  ;;  %v4940_v45 = vmul.f32 %v7177_v52, %v4926_v22  ;;  %v5021_v22 = vsel %vm4991_vm4, %v8885_v13, 0.0 }
 0x51b   :  { %v4938_v4 = vmul.f32 %v7177_v52, %v4924_v24 }
 0x51c   :  { %v5002_v42 = vadd.f32 %v5001_v37, %v5000_v48  ;;  %v8984_v26 = vadd.f32 %v8871_v36, %v4953_v34  ;;  %v4954_v7 = vadd.f32 %v4940_v45, %v8916_v2 }
 0x51d   :  { %v4952_v19 = vadd.f32 %v4938_v4, %v8918_v59  ;;  %v6715_v11 = vpop.f32.mrb[212].mxu0 }
 0x51e   :  { %v8991_v57 = vadd.f32 %v8862_v30, %v4954_v7  ;;  %v5004_v29 = vadd.f32 %v5003_v53, %v5002_v42  ;;  %v4929_v54 = vrot.slane %v6715_v11, 1  ;;  %v4902_v20 = vpop.f32.mrb[213].mxu0 }
 0x51f   :  { %v8996_v36 = vadd.f32 %v4952_v19, %v8858_v40  ;;  %v4927_v12 = vrot.slane %v4902_v20, 1  ;;  %v6716_v2 = vpop.f32.mrb[214].mxu0  ;;  %v5009_v40 = vsel %vm4991_vm4, %v8984_v26, 0.0 }
 0x520   :  { %v5006_v32 = vadd.f32 %v5005_v10, %v5004_v29  ;;  %v4943_v3 = vmul.f32 %v7177_v52, %v4929_v54  ;;  %v4930_v25 = vrot.slane %v6716_v2, 1  ;;  %v4905_v59 = vpop.f32.mrb[215].mxu0  ;;  %v5011_v17 = vsel %vm4991_vm4, %v8991_v57, 0.0 }
 0x521   :  { %v5007_v30 = vsel %vm4991_vm4, %v8996_v36, 0.0  ;;  %v4941_v27 = vmul.f32 %v7177_v52, %v4927_v12  ;;  %v4928_v33 = vrot.slane %v4905_v59, 1 }
 0x522   :  { %v5008_v56 = vadd.f32 %v5007_v30, %v5006_v32  ;;  %v4957_v46 = vadd.f32 %v4943_v3, %v8922_v6  ;;  %v4944_v35 = vmul.f32 %v7177_v52, %v4930_v25 }
 0x523   :  { %v4955_v63 = vadd.f32 %v4941_v27, %v8925_v38  ;;  %v4942_v50 = vmul.f32 %v7177_v52, %v4928_v33 }
 0x524   :  { %v5010_v49 = vadd.f32 %v5009_v40, %v5008_v56  ;;  %v9009_v21 = vadd.f32 %v8888_v55, %v4957_v46  ;;  %v4958_v62 = vadd.f32 %v4944_v35, %v8928_v23 }
 0x525   :  { %v9015_v6 = vadd.f32 %v8867_v31, %v4955_v63  ;;  %v4956_v15 = vadd.f32 %v4942_v50, %v8930_v8 }
 0x526   :  { %v5012_v5 = vadd.f32 %v5011_v17, %v5010_v49  ;;  %v9019_v0 = vadd.f32 %v8879_v28, %v4958_v62  ;;  %v5017_v31 = vsel %vm4991_vm4, %v9009_v21, 0.0 }
 0x527   :  { %v5013_v52 = vsel %vm4991_vm4, %v9015_v6, 0.0  ;;  %v9024_v55 = vadd.f32 %v8882_v14, %v4956_v15 }
 0x528   :  { %v5014_v38 = vadd.f32 %v5013_v52, %v5012_v5  ;;  %v5019_v8 = vsel %vm4991_vm4, %v9019_v0, 0.0 }
 0x529   :  { %v5015_v23 = vsel %vm4991_vm4, %v9024_v55, 0.0 }
 0x52a   :  { %v5016_v51 = vadd.f32 %v5015_v23, %v5014_v38 }
 0x52c   :  { %v5018_v44 = vadd.f32 %v5017_v31, %v5016_v51 }
 0x52e   :  { %v5020_v28 = vadd.f32 %v5019_v8, %v5018_v44 }
 0x530   :  { %v5022_v39 = vadd.f32 %v5021_v22, %v5020_v28 }
 0x532   :  { %v5023_v16 = vrot.slane %v5022_v39, 4 }
 0x534   :  { %v5024_v14 = vadd.f32 %v5023_v16, %v5022_v39 }
 0x536   :  { %v5025_v24 = vrot.slane %v5024_v14, 2 }
 0x538   :  { %v5026_v48 = vadd.f32 %v5025_v24, %v5024_v14 }
 0x53a   :  { %v5027_v34 = vrot.slane %v5026_v48, 1 }
 0x53c   :  { %v5028_v45 = vadd.f32 %v5027_v34, %v5026_v48 }
 0x53e   :  { %v9034_v37 = vmul.f32 0.0078125, %v5028_v45 }
 0x540   :  { %v5030_v4 = vsub.f32 %v8945_v43, %v9034_v37  ;;  %v5031_v42 = vsub.f32 %v8937_v47, %v9034_v37  ;;  %v5032_v7 = vsub.f32 %v8942_v60, %v9034_v37  ;;  %v5033_v53 = vsub.f32 %v8964_v41, %v9034_v37 }
 0x541   :  { %v5034_v29 = vsub.f32 %v8973_v58, %v9034_v37  ;;  %v5035_v20 = vsub.f32 %v8958_v9, %v9034_v37  ;;  %v5036_v3 = vsub.f32 %v8968_v61, %v9034_v37  ;;  %v5037_v27 = vsub.f32 %v8844_v1, %v9034_v37 }
 0x542   :  { %v5046_v19 = vmul.f32 %v5030_v4, %v5030_v4  ;;  %v5047_v11 = vmul.f32 %v5031_v42, %v5031_v42  ;;  %v5048_v54 = vmul.f32 %v5032_v7, %v5032_v7  ;;  %v5049_v10 = vmul.f32 %v5033_v53, %v5033_v53 }
 0x543   :  { %v5050_v25 = vmul.f32 %v5034_v29, %v5034_v29  ;;  %v5051_v33 = vmul.f32 %v5035_v20, %v5035_v20  ;;  %v5038_v35 = vsub.f32 %v8996_v36, %v9034_v37  ;;  %v5052_v40 = vmul.f32 %v5036_v3, %v5036_v3 }
 0x544   :  { %v5062_v12 = vsel %vm4991_vm4, %v5046_v19, 0.0  ;;  %v5063_v2 = vsel %vm4991_vm4, %v5047_v11, 0.0  ;;  %v5065_v59 = vsel %vm4991_vm4, %v5048_v54, 0.0  ;;  %v5067_v56 = vsel %vm4991_vm4, %v5049_v10, 0.0 }
 0x545   :  { %v5064_v32 = vadd.f32 %v5063_v2, %v5062_v12  ;;  %v5069_v63 = vsel %vm4991_vm4, %v5050_v25, 0.0  ;;  %v5039_v49 = vsub.f32 %v8984_v26, %v9034_v37  ;;  %v5053_v62 = vmul.f32 %v5037_v27, %v5037_v27 }
 0x546   :  { %v5071_v17 = vsel %vm4991_vm4, %v5051_v33, 0.0  ;;  %v5040_v5 = vsub.f32 %v8991_v57, %v9034_v37  ;;  %v5054_v52 = vmul.f32 %v5038_v35, %v5038_v35  ;;  %v5073_v38 = vsel %vm4991_vm4, %v5052_v40, 0.0 }
 0x547   :  { %v5066_v30 = vadd.f32 %v5065_v59, %v5064_v32  ;;  %v5041_v51 = vsub.f32 %v9015_v6, %v9034_v37  ;;  %v5055_v31 = vmul.f32 %v5039_v49, %v5039_v49  ;;  %v5075_v44 = vsel %vm4991_vm4, %v5053_v62, 0.0  ;;  %v5100_v49 = vld [vmem:[#allocation2] sm:$0x1] }
 0x548   :  { %v5042_v28 = vsub.f32 %v9024_v55, %v9034_v37  ;;  %v5056_v22 = vmul.f32 %v5040_v5, %v5040_v5  ;;  %v5077_v39 = vsel %vm4991_vm4, %v5054_v52, 0.0  ;;  %v5043_v14 = vsub.f32 %v9009_v21, %v9034_v37 }
 0x549   :  { %v5068_v46 = vadd.f32 %v5067_v56, %v5066_v30  ;;  %v5057_v24 = vmul.f32 %v5041_v51, %v5041_v51  ;;  %v5079_v48 = vsel %vm4991_vm4, %v5055_v31, 0.0  ;;  %v5044_v45 = vsub.f32 %v9019_v0, %v9034_v37 }
 0x54a   :  { %v5058_v4 = vmul.f32 %v5042_v28, %v5042_v28  ;;  %v5081_v42 = vsel %vm4991_vm4, %v5056_v22, 0.0  ;;  %v5045_v53 = vsub.f32 %v8885_v13, %v9034_v37  ;;  %v5059_v19 = vmul.f32 %v5043_v14, %v5043_v14 }
 0x54b   :  { %v5070_v50 = vadd.f32 %v5069_v63, %v5068_v46  ;;  %v5083_v11 = vsel %vm4991_vm4, %v5057_v24, 0.0  ;;  %v5060_v54 = vmul.f32 %v5044_v45, %v5044_v45 }
 0x54c   :  { %v5085_v20 = vsel %vm4991_vm4, %v5058_v4, 0.0  ;;  %v5061_v12 = vmul.f32 %v5045_v53, %v5045_v53  ;;  %v5087_v2 = vsel %vm4991_vm4, %v5059_v19, 0.0 }
 0x54d   :  { %v5072_v15 = vadd.f32 %v5071_v17, %v5070_v50  ;;  %v5089_v3 = vsel %vm4991_vm4, %v5060_v54, 0.0 }
 0x54e   :  { %v5091_v59 = vsel %vm4991_vm4, %v5061_v12, 0.0 }
 0x54f   :  { %v5074_v23 = vadd.f32 %v5073_v38, %v5072_v15  ;;  %v5104_v15 = vld [vmem:[#allocation3] sm:$0x1] }
 0x551   :  { %v5076_v8 = vadd.f32 %v5075_v44, %v5074_v23 }
 0x553   :  { %v5078_v16 = vadd.f32 %v5077_v39, %v5076_v8 }
 0x555   :  { %v5080_v34 = vadd.f32 %v5079_v48, %v5078_v16 }
 0x557   :  { %v5082_v7 = vadd.f32 %v5081_v42, %v5080_v34 }
 0x559   :  { %v5084_v29 = vadd.f32 %v5083_v11, %v5082_v7 }
 0x55b   :  { %v5086_v10 = vadd.f32 %v5085_v20, %v5084_v29 }
 0x55d   :  { %v5088_v32 = vadd.f32 %v5087_v2, %v5086_v10 }
 0x55f   :  { %v5090_v25 = vadd.f32 %v5089_v3, %v5088_v32 }
 0x561   :  { %v5092_v30 = vadd.f32 %v5091_v59, %v5090_v25 }
 0x563   :  { %v5093_v27 = vrot.slane %v5092_v30, 4 }
 0x565   :  { %v5094_v33 = vadd.f32 %v5093_v27, %v5092_v30 }
 0x567   :  { %v5095_v56 = vrot.slane %v5094_v33, 2 }
 0x569   :  { %v5096_v46 = vadd.f32 %v5095_v56, %v5094_v33 }
 0x56b   :  { %v5097_v35 = vrot.slane %v5096_v46, 1 }
 0x56d   :  { %v5098_v40 = vadd.f32 %v5097_v35, %v5096_v46 }
 0x56f   :  { %v5099_v63 = vmul.f32 0.0078125, %v5098_v40 }
 0x571   :  { %v5101_v50 = vadd.f32 1e-05, %v5099_v63 }
 0x573   :  { %6860 = vrsqrt.f32 %v5101_v50 }
 0x57d   :  { %v6861_v62 = vpop.eup %6860 }
 0x57e   :  { %v5103_v17 = vmul.f32 %v6861_v62, %v5100_v49 }
 0x580   :  { %v5105_v5 = vmul.f32 %v5103_v17, %v9034_v37  ;;  %v5111_v52 = vrot.slane %v5103_v17, %v7593_v18 }
 0x582   :  { %v5106_v38 = vsub.f32 %v5104_v15, %v5105_v5  ;;  %v5113_v23 = vmul.f32 %v5111_v52, %v8945_v43  ;;  %v5114_v51 = vmul.f32 %v5111_v52, %v8937_v47  ;;  %v5115_v31 = vmul.f32 %v5111_v52, %v8942_v60 }
 0x583   :  { %v5116_v44 = vmul.f32 %v5111_v52, %v8964_v41  ;;  %v5117_v8 = vmul.f32 %v5111_v52, %v8973_v58  ;;  %v5118_v28 = vmul.f32 %v5111_v52, %v8958_v9  ;;  %v5119_v22 = vmul.f32 %v5111_v52, %v8968_v61 }
 0x584   :  { %v5120_v39 = vmul.f32 %v5111_v52, %v8844_v1  ;;  %v5121_v37 = vmul.f32 %v5111_v52, %v8996_v36  ;;  %v5122_v16 = vmul.f32 %v5111_v52, %v8984_v26  ;;  %v5123_v43 = vmul.f32 %v5111_v52, %v8991_v57 }
 0x585   :  { %v5124_v47 = vmul.f32 %v5111_v52, %v9015_v6  ;;  %v5133_v60 = vrot.slane %v5106_v38, %v7593_v18  ;;  %v5125_v41 = vmul.f32 %v5111_v52, %v9024_v55  ;;  %v5126_v58 = vmul.f32 %v5111_v52, %v9009_v21 }
 0x586   :  { %v5127_v9 = vmul.f32 %v5111_v52, %v9019_v0  ;;  %v5128_v61 = vmul.f32 %v5111_v52, %v8885_v13 }
 0x587   :  { %v5135_v14 = vadd.f32 %v5133_v60, %v5113_v23  ;;  %v5136_v1 = vadd.f32 %v5133_v60, %v5114_v51  ;;  %v5137_v24 = vadd.f32 %v5133_v60, %v5115_v31  ;;  %v5138_v36 = vadd.f32 %v5133_v60, %v5116_v44 }
 0x588   :  { %v5139_v48 = vadd.f32 %v5133_v60, %v5117_v8  ;;  %v5140_v26 = vadd.f32 %v5133_v60, %v5118_v28  ;;  %v5141_v34 = vadd.f32 %v5133_v60, %v5119_v22  ;;  %v5142_v57 = vadd.f32 %v5133_v60, %v5120_v39 }
 0x589   :  { %v5143_v45 = vadd.f32 %v5133_v60, %v5121_v37  ;;  %v5144_v6 = vadd.f32 %v5133_v60, %v5122_v16  ;;  %v5145_v4 = vadd.f32 %v5133_v60, %v5123_v43  ;;  %v5146_v18 = vadd.f32 %v5133_v60, %v5124_v47 }
 0x58a   :  { %v5147_v42 = vadd.f32 %v5133_v60, %v5125_v41  ;;  %v5148_v55 = vadd.f32 %v5133_v60, %v5126_v58  ;;  %v5149_v7 = vadd.f32 %v5133_v60, %v5127_v9  ;;  %v5150_v21 = vadd.f32 %v5133_v60, %v5128_v61 }
 0x58b   :  { %v5151_v53 = vmax.f32 %v5135_v14, 0.0  ;;  %v5152_v0 = vmax.f32 %v5136_v1, 0.0  ;;  %v5153_v19 = vmax.f32 %v5137_v24, 0.0  ;;  %v5154_v13 = vmax.f32 %v5138_v36, 0.0 }
 0x58c   :  { %v5155_v11 = vmax.f32 %v5139_v48, 0.0  ;;  %v5156_v29 = vmax.f32 %v5140_v26, 0.0  ;;  %v5157_v54 = vmax.f32 %v5141_v34, 0.0  ;;  %v5158_v20 = vmax.f32 %v5142_v57, 0.0 }
 0x58d   :  { %v5159_v10 = vmax.f32 %v5143_v45, 0.0  ;;  %v5160_v12 = vmax.f32 %v5144_v6, 0.0  ;;  %v5161_v2 = vmax.f32 %v5145_v4, 0.0  ;;  %v5162_v32 = vmax.f32 %v5146_v18, 0.0  ;;  %5167 = vst.msk [vmem:[%s9177_s10] sm:$0xff] %vm4991_vm4, %v5151_v53  ;;  %5168 = vst.msk [vmem:[%s9177_s10 + $0x8] sm:$0xff] %vm4991_vm4, %v5152_v0 }
 0x58e   :  { %5169 = vst.msk [vmem:[%s9177_s10 + $0x10] sm:$0xff] %vm4991_vm4, %v5153_v19  ;;  %5170 = vst.msk [vmem:[%s9177_s10 + $0x18] sm:$0xff] %vm4991_vm4, %v5154_v13  ;;  %v5163_v3 = vmax.f32 %v5147_v42, 0.0  ;;  %v5164_v25 = vmax.f32 %v5148_v55, 0.0  ;;  %v5165_v59 = vmax.f32 %v5149_v7, 0.0  ;;  %v5166_v30 = vmax.f32 %v5150_v21, 0.0 }
 0x58f   :  { %5171 = vst.msk [vmem:[%s9177_s10 + $0x20] sm:$0xff] %vm4991_vm4, %v5155_v11  ;;  %5172 = vst.msk [vmem:[%s9177_s10 + $0x28] sm:$0xff] %vm4991_vm4, %v5156_v29 }
 0x590   :  { %5173 = vst.msk [vmem:[%s9177_s10 + $0x30] sm:$0xff] %vm4991_vm4, %v5157_v54  ;;  %5174 = vst.msk [vmem:[%s9177_s10 + $0x38] sm:$0xff] %vm4991_vm4, %v5158_v20 }
 0x591   :  { %5175 = vst.msk [vmem:[%s9177_s10 + $0x40] sm:$0xff] %vm4991_vm4, %v5159_v10  ;;  %5176 = vst.msk [vmem:[%s9177_s10 + $0x48] sm:$0xff] %vm4991_vm4, %v5160_v12 }
 0x592   :  { %5177 = vst.msk [vmem:[%s9177_s10 + $0x50] sm:$0xff] %vm4991_vm4, %v5161_v2  ;;  %5178 = vst.msk [vmem:[%s9177_s10 + $0x58] sm:$0xff] %vm4991_vm4, %v5162_v32 }
 0x593   :  { %5179 = vst.msk [vmem:[%s9177_s10 + $0x60] sm:$0xff] %vm4991_vm4, %v5163_v3  ;;  %5180 = vst.msk [vmem:[%s9177_s10 + $0x68] sm:$0xff] %vm4991_vm4, %v5164_v25 }
 0x594   :  { %5181 = vst.msk [vmem:[%s9177_s10 + $0x70] sm:$0xff] %vm4991_vm4, %v5165_v59  ;;  %5182 = vst.msk [vmem:[%s9177_s10 + $0x78] sm:$0xff] %vm4991_vm4, %v5166_v30 }

</bundles_post_ra>
